<compile_context>
chip_gen: v5e
topology: v5e:2x2
jax: 0.10.0
libtpu: 0.0.40
codegen_flags: <defaults>
</compile_context>

<pallas_src>
import jax
import jax.numpy as jnp
from jax.experimental import pallas as pl
from jax.experimental.pallas import tpu as pltpu


def _round_up(x, m):
    return ((x + m - 1) // m) * m


def _pack_params(params, sigma, C):
    """Fold all parameters + sigma into one packed f32 weight matrix.

    Row layout (8-row-aligned blocks, width C+1):
      [0       : C+1)  A        = [wq|bq]^T @ [wk|bk]      (energy bilinear form)
      [off_v   : +C )  Wv_aug   = sigma*gamma * [wv | bv]  (value conv, residual scale folded)
      [off_rgb : +3 )  Wrgb_aug = [wrgb | brgb]            (toRGB conv)
    """
    Cp = C + 1
    off_v = _round_up(Cp, 8)
    off_rgb = off_v + _round_up(C, 8)
    rows = off_rgb + 8
    f32 = jnp.float32

    wq = params["wq"].astype(f32).reshape(1, C)
    bq = params["bq"].astype(f32).reshape(1, 1)
    wk = params["wk"].astype(f32).reshape(1, C)
    bk = params["bk"].astype(f32).reshape(1, 1)
    a_mat = jnp.concatenate([wq, bq], axis=1).T @ jnp.concatenate([wk, bk], axis=1)

    sg = jnp.asarray(sigma, f32).reshape(()) * params["gamma"].astype(f32).reshape(())
    wv_aug = sg * jnp.concatenate(
        [params["wv"].astype(f32), params["bv"].astype(f32).reshape(C, 1)], axis=1)
    wrgb_aug = jnp.concatenate(
        [params["wrgb"].astype(f32), params["brgb"].astype(f32).reshape(3, 1)], axis=1)

    wpack = jnp.zeros((rows, Cp), f32)
    wpack = wpack.at[0:Cp, :].set(a_mat)
    wpack = wpack.at[off_v:off_v + C, :].set(wv_aug)
    wpack = wpack.at[off_rgb:off_rgb + 3, :].set(wrgb_aug)
    return wpack, off_v, off_rgb, rows


def _make_kernel(C, Cp, off_v, off_rgb, bb):
    def kernel(wpack_ref, xf_ref, xq_ref, rgb_ref, attn_ref):
        # Hoist the tiny weight loads once, outside the per-sample loop.
        a_mat = wpack_ref[0:Cp, 0:Cp]                      # (Cp, Cp)
        wv_aug = wpack_ref[off_v:off_v + C, 0:Cp]          # (C, Cp)  sigma*gamma*[wv|bv]
        wrgb_aug = wpack_ref[off_rgb:off_rgb + 3, 0:Cp]    # (3, Cp)  [wrgb|brgb]
        wrgb = wrgb_aug[:, 0:C]                            # (3, C)

        for b in range(bb):                                # static unroll over batch block
            xf = xf_ref[b]                                 # (Cp, N)   augmented features [x; 1]
            xq = xq_ref[b]                                 # (Cp, Tq)  query-row slab of the same

            # energy[i, j] = q[i]*k[j] == x_aug[:, i]^T A x_aug[:, j]   (MXU)
            t = jnp.dot(a_mat, xf, preferred_element_type=jnp.float32)          # (Cp, N)
            energy = jnp.einsum("cq,cn->qn", xq, t,
                                preferred_element_type=jnp.float32)             # (Tq, N)

            # row softmax; the divide is replaced by the EUP approximate reciprocal
            m = jnp.max(energy, axis=-1, keepdims=True)
            e = jnp.exp(energy - m)
            attn = e * pl.reciprocal(jnp.sum(e, axis=-1, keepdims=True), approx=True)

            # value conv (bias + sigma*gamma residual scale already folded in)
            v = jnp.dot(wv_aug, xf, preferred_element_type=jnp.float32)         # (C, N)
            out_attn = jnp.einsum("cj,qj->cq", v, attn,
                                  preferred_element_type=jnp.float32)           # (C, Tq)

            # rgb = wrgb @ (x + sigma*gamma * (v @ attn^T)) + brgb
            #     = [wrgb|brgb] @ [x; 1]  +  wrgb @ out_attn
            rgb = (jnp.dot(wrgb_aug, xq, preferred_element_type=jnp.float32)
                   + jnp.dot(wrgb, out_attn, preferred_element_type=jnp.float32))

            rgb_ref[b] = rgb.astype(rgb_ref.dtype)
            attn_ref[b] = attn.astype(attn_ref.dtype)

    return kernel


def _pick_row_tile(N):
    # Full-N query rows unless the (Tq, N) attention block / exp working set
    # would press on VMEM (v7x: 64 MiB); then tile rows in lane-aligned slabs.
    if N <= 1024 or N % 128 != 0:
        return N
    for cand in (512, 256, 128):
        if N % cand == 0:
            return cand
    return N


def _num_tensorcores():
    try:
        return max(1, int(getattr(jax.devices()[0], "num_cores", 1) or 1))
    except Exception:
        return 1


def generator_forward(x, params, sigma=0.0, *, attn_dtype=jnp.float32,
                      batch_block=None):
    """x: (B, C, H, W) float32.  Returns (rgb (B,3,H,W), attention (B,N,N))."""
    B, C, H, W = x.shape
    N = H * W
    Cp = C + 1

    # Augmented features: append a ones row so every bias folds into a matmul.
    x_flat = x.reshape(B, C, N).astype(jnp.float32)
    x_aug = jnp.concatenate([x_flat, jnp.ones((B, 1, N), jnp.float32)], axis=1)

    wpack, off_v, off_rgb, rows = _pack_params(params, sigma, C)

    # Batch blocking: fuse the whole batch into one grid step on single-TC
    # chips (v5e/v6e); keep a parallel batch axis on multi-TC chips (v7x).
    if batch_block is None:
        cores = _num_tensorcores()
        if cores > 1 and B % cores == 0:
            batch_block = B // cores
        else:
            batch_block = B if cores <= 1 else 1
    bb = max(1, min(B, batch_block))
    if B % bb != 0:
        bb = 1
    tq = _pick_row_tile(N)

    kernel = _make_kernel(C, Cp, off_v, off_rgb, bb)

    rgb_flat, attn = pl.pallas_call(
        kernel,
        out_shape=(
            jax.ShapeDtypeStruct((B, 3, N), jnp.float32),
            jax.ShapeDtypeStruct((B, N, N), attn_dtype),   # bf16 also supported if tolerated
        ),
        grid_spec=pltpu.PrefetchScalarGridSpec(
            num_scalar_prefetch=0,
            grid=(B // bb, N // tq),
            in_specs=[
                pl.BlockSpec((rows, Cp), lambda b, q: (0, 0)),       # packed weights (single DMA)
                pl.BlockSpec((bb, Cp, N), lambda b, q: (b, 0, 0)),   # full keys/values
                pl.BlockSpec((bb, Cp, tq), lambda b, q: (b, 0, q)),  # query-row slab
            ],
            out_specs=[
                pl.BlockSpec((bb, 3, tq), lambda b, q: (b, 0, q)),   # rgb (lane-dense last dim)
                pl.BlockSpec((bb, tq, N), lambda b, q: (b, q, 0)),   # attention
            ],
        ),
        compiler_params=pltpu.CompilerParams(
            dimension_semantics=("parallel", "parallel"),
            vmem_limit_bytes=32 * 1024 * 1024,
        ),
    )(wpack, x_aug, x_aug)

    return rgb_flat.reshape(B, 3, H, W), attn


def reference_forward(x, p, sigma):
    """Plain-JAX reference mirroring the PyTorch forward (exact math)."""
    B, C, H, W = x.shape
    N = H * W
    hi = jax.lax.Precision.HIGHEST
    xf = x.reshape(B, C, N)
    q = jnp.einsum("oc,bcn->bon", p["wq"], xf, precision=hi) + p["bq"].reshape(1, 1, 1)
    k = jnp.einsum("oc,bcn->bon", p["wk"], xf, precision=hi) + p["bk"].reshape(1, 1, 1)
    energy = jnp.einsum("bqn,bqm->bnm", q, k, precision=hi)          # (B, N, N)
    attn = jax.nn.softmax(energy, axis=-1)
    v = jnp.einsum("oc,bcn->bon", p["wv"], xf, precision=hi) + p["bv"].reshape(1, C, 1)
    out = jnp.einsum("bcn,bmn->bcm", v, attn, precision=hi)          # bmm(v, attn^T)
    out = p["gamma"].reshape(()) * out + xf
    out = sigma * out + (1.0 - sigma) * xf
    rgb = jnp.einsum("oc,bcn->bon", p["wrgb"], out, precision=hi) + p["brgb"].reshape(1, 3, 1)
    return rgb.reshape(B, 3, H, W), attn


def init_params(key, attention_dim=3):
    C = attention_dim
    ks = jax.random.split(key, 8)
    return {
        "wq":   jax.random.normal(ks[0], (1, C), jnp.float32) * 0.5,
        "bq":   jax.random.normal(ks[1], (1, 1), jnp.float32) * 0.1,
        "wk":   jax.random.normal(ks[2], (1, C), jnp.float32) * 0.5,
        "bk":   jax.random.normal(ks[3], (1, 1), jnp.float32) * 0.1,
        "wv":   jax.random.normal(ks[4], (C, C), jnp.float32) * 0.5,
        "bv":   jax.random.normal(ks[5], (C, 1), jnp.float32) * 0.1,
        "gamma": jnp.ones((1, 1), jnp.float32),                      # nn.Parameter(torch.ones(1))
        "wrgb": jax.random.normal(ks[6], (3, C), jnp.float32) * 0.5,
        "brgb": jax.random.normal(ks[7], (3, 1), jnp.float32) * 0.1,
    }


if __name__ == "__main__":
    key = jax.random.PRNGKey(0)
    k_param, k_x = jax.random.split(key)

    B, C, H, W = 2, 3, 16, 16          # attention_dim = 3 (default)
    params = init_params(k_param, attention_dim=C)
    x = jax.random.normal(k_x, (B, C, H, W), jnp.float32)

    sigma = 0.7                        # as if update_sigma(0.7) had been called

    rgb, attn = generator_forward(x, params, sigma=sigma)
    jax.block_until_ready((rgb, attn))

    rgb_ref, attn_ref = reference_forward(x, params, sigma)
    assert rgb.shape == (B, 3, H, W) and attn.shape == (B, H * W, H * W)
    # Tolerance is looser than strict f32 because the kernel normalizes the
    # softmax with the EUP approximate reciprocal (per perf review) and folds
    # sigma*gamma / all biases into the packed weights host-side.
    assert jnp.allclose(rgb, rgb_ref, rtol=5e-3, atol=5e-3)
    assert jnp.allclose(attn, attn_ref, rtol=5e-3, atol=5e-3)

    print("KERNEL_OK")
</pallas_src>

<mosaic_0001>
module attributes {stable_mosaic.version = 11 : i64} {
  func.func @kernel(%arg0: i32, %arg1: i32, %arg2: memref<24x4xf32, #tpu.memory_space<vmem>>, %arg3: memref<2x4x256xf32, #tpu.memory_space<vmem>>, %arg4: memref<2x4x256xf32, #tpu.memory_space<vmem>>, %arg5: memref<2x3x256xf32, #tpu.memory_space<vmem>>, %arg6: memref<2x256x256xf32, #tpu.memory_space<vmem>>) attributes {dimension_semantics = [#tpu.dimension_semantics<parallel>, #tpu.dimension_semantics<parallel>], iteration_bounds = array<i64: 1, 1>, scalar_prefetch = 0 : i64, scratch_operands = 0 : i64, tpu.core_type = #tpu.core_type<tc>, window_params = [{pipeline_mode = #tpu.pipeline_mode<synchronous>, transform_indices = @transform_0, window_bounds = array<i64: 24, 4>}, {transform_indices = @transform_1, window_bounds = array<i64: 2, 4, 256>}, {transform_indices = @transform_2, window_bounds = array<i64: 2, 4, 256>}, {transform_indices = @transform_3, window_bounds = array<i64: 2, 3, 256>}, {transform_indices = @transform_4, window_bounds = array<i64: 2, 256, 256>}]} {
    %c0 = arith.constant 0 : index
    %c0_0 = arith.constant 0 : index
    %0 = vector.load %arg2[%c0, %c0_0] : memref<24x4xf32, #tpu.memory_space<vmem>>, vector<4x4xf32>
    %c8 = arith.constant 8 : index
    %c0_1 = arith.constant 0 : index
    %1 = vector.load %arg2[%c8, %c0_1] : memref<24x4xf32, #tpu.memory_space<vmem>>, vector<3x4xf32>
    %c16 = arith.constant 16 : index
    %c0_2 = arith.constant 0 : index
    %2 = vector.load %arg2[%c16, %c0_2] : memref<24x4xf32, #tpu.memory_space<vmem>>, vector<3x4xf32>
    %3 = vector.extract_strided_slice %2 {offsets = [0, 0], sizes = [3, 3], strides = [1, 1]} : vector<3x4xf32> to vector<3x3xf32>
    %c0_3 = arith.constant 0 : index
    %c0_4 = arith.constant 0 : index
    %c0_5 = arith.constant 0 : index
    %4 = vector.load %arg3[%c0_3, %c0_4, %c0_5] : memref<2x4x256xf32, #tpu.memory_space<vmem>>, vector<1x4x256xf32>
    %5 = vector.shape_cast %4 : vector<1x4x256xf32> to vector<4x256xf32>
    %c0_6 = arith.constant 0 : index
    %c0_7 = arith.constant 0 : index
    %c0_8 = arith.constant 0 : index
    %6 = vector.load %arg4[%c0_6, %c0_7, %c0_8] : memref<2x4x256xf32, #tpu.memory_space<vmem>>, vector<1x4x256xf32>
    %7 = vector.shape_cast %6 : vector<1x4x256xf32> to vector<4x256xf32>
    %cst = arith.constant dense<0.000000e+00> : vector<4x256xf32>
    %8 = tpu.matmul %0, %5, %cst {dimension_numbers = #tpu.dot_dimension_numbers<[1], [0], [0], [1], [0, 0, 1, 1], [], []>} : vector<4x4xf32>, vector<4x256xf32>, vector<4x256xf32> -> vector<4x256xf32>
    "tpu.trace_start"() <{level = 10 : i32, message = "cq,cn->qn"}> : () -> ()
    %cst_9 = arith.constant dense<0.000000e+00> : vector<256x256xf32>
    %9 = tpu.matmul %7, %8, %cst_9 {dimension_numbers = #tpu.dot_dimension_numbers<[0], [0], [1], [1], [0, 1, 1, 1], [], []>} : vector<4x256xf32>, vector<4x256xf32>, vector<256x256xf32> -> vector<256x256xf32>
    "tpu.trace_stop"() : () -> ()
    %cst_10 = arith.constant dense<0xFF800000> : vector<256xf32>
    %10 = vector.multi_reduction <maximumf>, %9, %cst_10 [1] : vector<256x256xf32> to vector<256xf32>
    %11 = vector.shape_cast %10 : vector<256xf32> to vector<256x1xf32>
    %12 = vector.broadcast %11 : vector<256x1xf32> to vector<256x256xf32>
    %13 = arith.subf %9, %12 : vector<256x256xf32>
    %14 = math.exp %13 : vector<256x256xf32>
    %cst_11 = arith.constant dense<0.000000e+00> : vector<256xf32>
    %15 = vector.multi_reduction <add>, %14, %cst_11 [1] : vector<256x256xf32> to vector<256xf32>
    %16 = vector.shape_cast %15 : vector<256xf32> to vector<256x1xf32>
    %17 = tpu.reciprocal %16 {approx = true} : vector<256x1xf32> -> vector<256x1xf32>
    %18 = vector.broadcast %17 : vector<256x1xf32> to vector<256x256xf32>
    %19 = arith.mulf %14, %18 : vector<256x256xf32>
    %cst_12 = arith.constant dense<0.000000e+00> : vector<3x256xf32>
    %20 = tpu.matmul %1, %5, %cst_12 {dimension_numbers = #tpu.dot_dimension_numbers<[1], [0], [0], [1], [0, 0, 1, 1], [], []>} : vector<3x4xf32>, vector<4x256xf32>, vector<3x256xf32> -> vector<3x256xf32>
    "tpu.trace_start"() <{level = 10 : i32, message = "cj,qj->cq"}> : () -> ()
    %cst_13 = arith.constant dense<0.000000e+00> : vector<3x256xf32>
    %21 = tpu.matmul %20, %19, %cst_13 {dimension_numbers = #tpu.dot_dimension_numbers<[1], [1], [0], [0], [0, 0, 1, 0], [], []>} : vector<3x256xf32>, vector<256x256xf32>, vector<3x256xf32> -> vector<3x256xf32>
    "tpu.trace_stop"() : () -> ()
    %cst_14 = arith.constant dense<0.000000e+00> : vector<3x256xf32>
    %22 = tpu.matmul %2, %7, %cst_14 {dimension_numbers = #tpu.dot_dimension_numbers<[1], [0], [0], [1], [0, 0, 1, 1], [], []>} : vector<3x4xf32>, vector<4x256xf32>, vector<3x256xf32> -> vector<3x256xf32>
    %cst_15 = arith.constant dense<0.000000e+00> : vector<3x256xf32>
    %23 = tpu.matmul %3, %21, %cst_15 {dimension_numbers = #tpu.dot_dimension_numbers<[1], [0], [0], [1], [0, 0, 1, 1], [], []>} : vector<3x3xf32>, vector<3x256xf32>, vector<3x256xf32> -> vector<3x256xf32>
    %24 = arith.addf %22, %23 : vector<3x256xf32>
    %c0_16 = arith.constant 0 : index
    %c0_17 = arith.constant 0 : index
    %c0_18 = arith.constant 0 : index
    %25 = vector.load %arg5[%c0_16, %c0_17, %c0_18] : memref<2x3x256xf32, #tpu.memory_space<vmem>>, vector<1x3x256xf32>
    %26 = vector.shape_cast %25 : vector<1x3x256xf32> to vector<3x256xf32>
    %27 = vector.shape_cast %24 : vector<3x256xf32> to vector<1x3x256xf32>
    tpu.vector_store %arg5[%c0_16, %c0_17, %c0_18], %27 {strides = array<i32>} : memref<2x3x256xf32, #tpu.memory_space<vmem>>, vector<1x3x256xf32>,
    %c0_19 = arith.constant 0 : index
    %c0_20 = arith.constant 0 : index
    %c0_21 = arith.constant 0 : index
    %28 = vector.load %arg6[%c0_19, %c0_20, %c0_21] : memref<2x256x256xf32, #tpu.memory_space<vmem>>, vector<1x256x256xf32>
    %29 = vector.shape_cast %28 : vector<1x256x256xf32> to vector<256x256xf32>
    %30 = vector.shape_cast %19 : vector<256x256xf32> to vector<1x256x256xf32>
    tpu.vector_store %arg6[%c0_19, %c0_20, %c0_21], %30 {strides = array<i32>} : memref<2x256x256xf32, #tpu.memory_space<vmem>>, vector<1x256x256xf32>,
    %c1 = arith.constant 1 : index
    %c0_22 = arith.constant 0 : index
    %c0_23 = arith.constant 0 : index
    %31 = vector.load %arg3[%c1, %c0_22, %c0_23] : memref<2x4x256xf32, #tpu.memory_space<vmem>>, vector<1x4x256xf32>
    %32 = vector.shape_cast %31 : vector<1x4x256xf32> to vector<4x256xf32>
    %c1_24 = arith.constant 1 : index
    %c0_25 = arith.constant 0 : index
    %c0_26 = arith.constant 0 : index
    %33 = vector.load %arg4[%c1_24, %c0_25, %c0_26] : memref<2x4x256xf32, #tpu.memory_space<vmem>>, vector<1x4x256xf32>
    %34 = vector.shape_cast %33 : vector<1x4x256xf32> to vector<4x256xf32>
    %cst_27 = arith.constant dense<0.000000e+00> : vector<4x256xf32>
    %35 = tpu.matmul %0, %32, %cst_27 {dimension_numbers = #tpu.dot_dimension_numbers<[1], [0], [0], [1], [0, 0, 1, 1], [], []>} : vector<4x4xf32>, vector<4x256xf32>, vector<4x256xf32> -> vector<4x256xf32>
    "tpu.trace_start"() <{level = 10 : i32, message = "cq,cn->qn"}> : () -> ()
    %cst_28 = arith.constant dense<0.000000e+00> : vector<256x256xf32>
    %36 = tpu.matmul %34, %35, %cst_28 {dimension_numbers = #tpu.dot_dimension_numbers<[0], [0], [1], [1], [0, 1, 1, 1], [], []>} : vector<4x256xf32>, vector<4x256xf32>, vector<256x256xf32> -> vector<256x256xf32>
    "tpu.trace_stop"() : () -> ()
    %cst_29 = arith.constant dense<0xFF800000> : vector<256xf32>
    %37 = vector.multi_reduction <maximumf>, %36, %cst_29 [1] : vector<256x256xf32> to vector<256xf32>
    %38 = vector.shape_cast %37 : vector<256xf32> to vector<256x1xf32>
    %39 = vector.broadcast %38 : vector<256x1xf32> to vector<256x256xf32>
    %40 = arith.subf %36, %39 : vector<256x256xf32>
    %41 = math.exp %40 : vector<256x256xf32>
    %cst_30 = arith.constant dense<0.000000e+00> : vector<256xf32>
    %42 = vector.multi_reduction <add>, %41, %cst_30 [1] : vector<256x256xf32> to vector<256xf32>
    %43 = vector.shape_cast %42 : vector<256xf32> to vector<256x1xf32>
    %44 = tpu.reciprocal %43 {approx = true} : vector<256x1xf32> -> vector<256x1xf32>
    %45 = vector.broadcast %44 : vector<256x1xf32> to vector<256x256xf32>
    %46 = arith.mulf %41, %45 : vector<256x256xf32>
    %cst_31 = arith.constant dense<0.000000e+00> : vector<3x256xf32>
    %47 = tpu.matmul %1, %32, %cst_31 {dimension_numbers = #tpu.dot_dimension_numbers<[1], [0], [0], [1], [0, 0, 1, 1], [], []>} : vector<3x4xf32>, vector<4x256xf32>, vector<3x256xf32> -> vector<3x256xf32>
    "tpu.trace_start"() <{level = 10 : i32, message = "cj,qj->cq"}> : () -> ()
    %cst_32 = arith.constant dense<0.000000e+00> : vector<3x256xf32>
    %48 = tpu.matmul %47, %46, %cst_32 {dimension_numbers = #tpu.dot_dimension_numbers<[1], [1], [0], [0], [0, 0, 1, 0], [], []>} : vector<3x256xf32>, vector<256x256xf32>, vector<3x256xf32> -> vector<3x256xf32>
    "tpu.trace_stop"() : () -> ()
    %cst_33 = arith.constant dense<0.000000e+00> : vector<3x256xf32>
    %49 = tpu.matmul %2, %34, %cst_33 {dimension_numbers = #tpu.dot_dimension_numbers<[1], [0], [0], [1], [0, 0, 1, 1], [], []>} : vector<3x4xf32>, vector<4x256xf32>, vector<3x256xf32> -> vector<3x256xf32>
    %cst_34 = arith.constant dense<0.000000e+00> : vector<3x256xf32>
    %50 = tpu.matmul %3, %48, %cst_34 {dimension_numbers = #tpu.dot_dimension_numbers<[1], [0], [0], [1], [0, 0, 1, 1], [], []>} : vector<3x3xf32>, vector<3x256xf32>, vector<3x256xf32> -> vector<3x256xf32>
    %51 = arith.addf %49, %50 : vector<3x256xf32>
    %c1_35 = arith.constant 1 : index
    %c0_36 = arith.constant 0 : index
    %c0_37 = arith.constant 0 : index
    %52 = vector.load %arg5[%c1_35, %c0_36, %c0_37] : memref<2x3x256xf32, #tpu.memory_space<vmem>>, vector<1x3x256xf32>
    %53 = vector.shape_cast %52 : vector<1x3x256xf32> to vector<3x256xf32>
    %54 = vector.shape_cast %51 : vector<3x256xf32> to vector<1x3x256xf32>
    tpu.vector_store %arg5[%c1_35, %c0_36, %c0_37], %54 {strides = array<i32>} : memref<2x3x256xf32, #tpu.memory_space<vmem>>, vector<1x3x256xf32>,
    %c1_38 = arith.constant 1 : index
    %c0_39 = arith.constant 0 : index
    %c0_40 = arith.constant 0 : index
    %55 = vector.load %arg6[%c1_38, %c0_39, %c0_40] : memref<2x256x256xf32, #tpu.memory_space<vmem>>, vector<1x256x256xf32>
    %56 = vector.shape_cast %55 : vector<1x256x256xf32> to vector<256x256xf32>
    %57 = vector.shape_cast %46 : vector<256x256xf32> to vector<1x256x256xf32>
    tpu.vector_store %arg6[%c1_38, %c0_39, %c0_40], %57 {strides = array<i32>} : memref<2x256x256xf32, #tpu.memory_space<vmem>>, vector<1x256x256xf32>,
    return
  }
  func.func @transform_0(%arg0: i32, %arg1: i32) -> (i32, i32) {
    %c0_i32 = arith.constant 0 : i32
    %c0_i32_0 = arith.constant 0 : i32
    %c0_i32_1 = arith.constant 0 : i32
    return %c0_i32, %c0_i32_0 : i32, i32
  }
  func.func @transform_1(%arg0: i32, %arg1: i32) -> (i32, i32, i32) {
    %c0_i32 = arith.constant 0 : i32
    %c0_i32_0 = arith.constant 0 : i32
    %c0_i32_1 = arith.constant 0 : i32
    return %arg0, %c0_i32, %c0_i32_0 : i32, i32, i32
  }
  func.func @transform_2(%arg0: i32, %arg1: i32) -> (i32, i32, i32) {
    %c0_i32 = arith.constant 0 : i32
    %c0_i32_0 = arith.constant 0 : i32
    return %arg0, %c0_i32, %arg1 : i32, i32, i32
  }
  func.func @transform_3(%arg0: i32, %arg1: i32) -> (i32, i32, i32) {
    %c0_i32 = arith.constant 0 : i32
    %c0_i32_0 = arith.constant 0 : i32
    return %arg0, %c0_i32, %arg1 : i32, i32, i32
  }
  func.func @transform_4(%arg0: i32, %arg1: i32) -> (i32, i32, i32) {
    %c0_i32 = arith.constant 0 : i32
    %c0_i32_0 = arith.constant 0 : i32
    return %arg0, %arg1, %c0_i32 : i32, i32, i32
  }
}

</mosaic_0001>

<bundles_post_ra>
// kernel: tpu_custom_call.1
= control target key start
LH: loop header
LB: loop body
LE: loop exit
PB: predicated region body
PF: predicated region fallthrough
CT: control target
= control target key end

     0   :  { %10 = vsyncpa [#allocation3], 0  ;;  %s4859_s0 = inlined_call_operand.vmem [shape: f32[24,4], index: 0, kind: input, shape index: {}]   ;;  %s4860_s1 = inlined_call_operand.vmem [shape: f32[2,4,256], index: 1, kind: input, shape index: {}]   ;;  %s4861_s2 = inlined_call_operand.hbm [shape: f32[2,4,256], index: 2, kind: input, shape index: {}]   ;;  %s4862_s3 = inlined_call_operand.vmem [shape: f32[2,3,256], index: 3, kind: output, shape index: {0}]   ;;  %s4863_s4 = inlined_call_operand.hbm [shape: f32[2,256,256], index: 4, kind: output, shape index: {1}]  }
   0x1   :  { %11 = vsyncpa [#allocation4], 0  ;;  %s20_s17 = sshll.u32 %s4861_s2, 4  ;;  %s3125_s18 = smov [#allocation2]   ;;  %s21_s17 = int_to_ptr.hbm [resolvable:$true] %s20_s17 }
   0x2   :  { %s22_s19 = sshll.u32 %s3125_s18, 4  ;;  %s3126_s20 = smov 128   ;;  %s23_s19 = int_to_ptr.vmem [resolvable:$true] %s22_s19 }
   0x3   :  { %s3127_s21 = smov 8  }
   0x4   :  { %28 = dma.hbm_to_vmem [thread:$0]  %s21_s17, 256, %s23_s19, [#allocation3], %s3126_s20, %s3126_s20, %s3127_s21  }
   0x5   :  { %3121 = dma.done.wait [#allocation3], 256  }
   0x6   :  { %3122 = vsyncadd [#allocation3], 4294967040  ;;  %v36_v0 = vld [vmem:[%s4860_s1] sm:$0xff]  ;;  %v3162_v1 = vld [vmem:[#allocation2] sm:$0xff]  ;;  %vm46_vm0 = vcmask 1043456   ;;  %vm42_vm1 = vcmask 31744  }
   0x7   :  { %39 = vst [vmem:[#allocation1] ss:$2 sm:$0xff] %v36_v0  ;;  %v33_v2 = vld [vmem:[%s4859_s0] sm:$0xf]  ;;  %vm1103_vm2 = vcmask 1042432   ;;  %vm1099_vm3 = vcmask 23552  }
   0x8   :  { %s2499_s11 = sshll.u32 %s4863_s4, 4  ;;  %s3128_s12 = smov [#allocation5]   ;;  %s2500_s11 = int_to_ptr.hbm [resolvable:$true] %s2499_s11 }
   0x9   :  { %s2497_s13 = sshll.u32 %s3128_s12, 4  ;;  %s3129_s14 = smov 256   ;;  %s2498_s13 = int_to_ptr.vmem [resolvable:$true] %s2497_s13 }
   0xa   :  { %s3130_s15 = smov 16  }
   0xe   :  { %v40_v3 = vld.sshfl [vmem:[#allocation1] sm:$0xff pattern:$0x75316420]  ;;  %v41_v4 = vld.sshfl [vmem:[#allocation1 + $0x8] sm:$0xff pattern:$0x75316420] }
   0xf   :  { %92 = vst [vmem:[#allocation1] ss:$2 sm:$0xff] %v3162_v1  ;;  %2514 = vmatpush.msk.msra.mxu2 %vm46_vm0, %v40_v3  ;;  %2516 = vmatpush.msk.msra.mxu3 %vm46_vm0, %v41_v4 }
  0x10   :  { %2515 = vmatmul.msk.f32.vlgmr.msra.gmra.mxu2 %vm42_vm1, %v33_v2  ;;  %2517 = vmatmul.msk.f32.vlgmr.msra.gmra.mxu3 %vm42_vm1, %v33_v2 }
  0x16   :  { %v93_v5 = vld.sshfl [vmem:[#allocation1] sm:$0xff pattern:$0x75316420]  ;;  %v94_v6 = vld.sshfl [vmem:[#allocation1 + $0x8] sm:$0xff pattern:$0x75316420] }
  0x17   :  { %97 = vxpose.xlu0.b32.start.end [1/1] (short) %v93_v5, 128  ;;  %969 = vst [vmem:[#allocation1] ss:$2 sm:$0xff] %v36_v0 }
  0x93   :  { %v68_v7 = vpop.f32.mrf.mxu2  ;;  %v88_v8 = vpop.f32.mrf.mxu3 }
  0x94   :  { %2518 = vmatpush.msk.msrb.mxu2 %vm46_vm0, %v68_v7  ;;  %2551 = vmatpush.msk.msrb.mxu3 %vm46_vm0, %v88_v8 }
  0x97   :  { %129 = vxpose.xlu0.b32.start.end [1/1] (short) %v94_v6, 128 }
  0xbb   :  { %v113_v9 = vpop.trf.xlu0 }
  0xbc   :  { %2519 = vmatmul.msk.f32.vlgmr.msrb.gmra.mxu2 %vm42_vm1, %v113_v9  ;;  %2552 = vmatmul.msk.f32.vlgmr.msrb.gmra.mxu3 %vm42_vm1, %v113_v9 }
  0xc3   :  { %v114_v10 = vpop.trf.xlu0 }
  0xc4   :  { %2520 = vmatmul.msk.f32.gmra.mxu2 %vm42_vm1, %v114_v10  ;;  %2553 = vmatmul.msk.f32.gmra.mxu3 %vm42_vm1, %v114_v10 }
  0xcb   :  { %v115_v11 = vpop.trf.xlu0 }
  0xcc   :  { %2521 = vmatmul.msk.f32.gmra.mxu2 %vm42_vm1, %v115_v11  ;;  %2554 = vmatmul.msk.f32.gmra.mxu3 %vm42_vm1, %v115_v11 }
  0xd3   :  { %v116_v12 = vpop.trf.xlu0 }
  0xd4   :  { %2522 = vmatmul.msk.f32.gmra.mxu2 %vm42_vm1, %v116_v12  ;;  %2555 = vmatmul.msk.f32.gmra.mxu3 %vm42_vm1, %v116_v12 }
  0xdb   :  { %v117_v13 = vpop.trf.xlu0 }
  0xdc   :  { %2523 = vmatmul.msk.f32.gmra.mxu2 %vm42_vm1, %v117_v13  ;;  %2556 = vmatmul.msk.f32.gmra.mxu3 %vm42_vm1, %v117_v13 }
  0xe3   :  { %v118_v14 = vpop.trf.xlu0 }
  0xe4   :  { %2524 = vmatmul.msk.f32.gmra.mxu2 %vm42_vm1, %v118_v14  ;;  %2557 = vmatmul.msk.f32.gmra.mxu3 %vm42_vm1, %v118_v14 }
  0xeb   :  { %v119_v15 = vpop.trf.xlu0 }
  0xec   :  { %2525 = vmatmul.msk.f32.gmra.mxu2 %vm42_vm1, %v119_v15  ;;  %2558 = vmatmul.msk.f32.gmra.mxu3 %vm42_vm1, %v119_v15 }
  0xf3   :  { %v120_v16 = vpop.trf.xlu0 }
  0xf4   :  { %2526 = vmatmul.msk.f32.gmra.mxu2 %vm42_vm1, %v120_v16  ;;  %2559 = vmatmul.msk.f32.gmra.mxu3 %vm42_vm1, %v120_v16 }
  0xfb   :  { %v121_v17 = vpop.trf.xlu0 }
  0xfc   :  { %2527 = vmatmul.msk.f32.gmra.mxu2 %vm42_vm1, %v121_v17  ;;  %2560 = vmatmul.msk.f32.gmra.mxu3 %vm42_vm1, %v121_v17 }
 0x103   :  { %v122_v18 = vpop.trf.xlu0 }
 0x104   :  { %2528 = vmatmul.msk.f32.gmra.mxu2 %vm42_vm1, %v122_v18  ;;  %2561 = vmatmul.msk.f32.gmra.mxu3 %vm42_vm1, %v122_v18 }
 0x10b   :  { %v123_v19 = vpop.trf.xlu0 }
 0x10c   :  { %2529 = vmatmul.msk.f32.gmra.mxu2 %vm42_vm1, %v123_v19  ;;  %2562 = vmatmul.msk.f32.gmra.mxu3 %vm42_vm1, %v123_v19 }
 0x113   :  { %v124_v20 = vpop.trf.xlu0 }
 0x114   :  { %2530 = vmatmul.msk.f32.gmra.mxu2 %vm42_vm1, %v124_v20  ;;  %2563 = vmatmul.msk.f32.gmra.mxu3 %vm42_vm1, %v124_v20 }
 0x11b   :  { %v125_v21 = vpop.trf.xlu0 }
 0x11c   :  { %2531 = vmatmul.msk.f32.gmra.mxu2 %vm42_vm1, %v125_v21  ;;  %2564 = vmatmul.msk.f32.gmra.mxu3 %vm42_vm1, %v125_v21 }
 0x123   :  { %v126_v22 = vpop.trf.xlu0 }
 0x124   :  { %2532 = vmatmul.msk.f32.gmra.mxu2 %vm42_vm1, %v126_v22  ;;  %2565 = vmatmul.msk.f32.gmra.mxu3 %vm42_vm1, %v126_v22 }
 0x12b   :  { %v127_v23 = vpop.trf.xlu0 }
 0x12c   :  { %2533 = vmatmul.msk.f32.gmra.mxu2 %vm42_vm1, %v127_v23  ;;  %2566 = vmatmul.msk.f32.gmra.mxu3 %vm42_vm1, %v127_v23 }
 0x133   :  { %v128_v24 = vpop.trf.xlu0 }
 0x134   :  { %2534 = vmatmul.msk.f32.gmra.mxu2 %vm42_vm1, %v128_v24  ;;  %2567 = vmatmul.msk.f32.gmra.mxu3 %vm42_vm1, %v128_v24 }
 0x13b   :  { %v145_v25 = vpop.trf.xlu0 }
 0x13c   :  { %2535 = vmatmul.msk.f32.gmra.mxu2 %vm42_vm1, %v145_v25  ;;  %2568 = vmatmul.msk.f32.gmra.mxu3 %vm42_vm1, %v145_v25 }
 0x13f   :  { %v3208_v26 = vpop.f32.mrf.mxu2  ;;  %v3210_v27 = vpop.f32.mrf.mxu3 }
 0x140   :  { %4926 = vst [vmem:[#allocation8_spill] sm:$0xff] %v3208_v26  ;;  %v489_v28 = vmax.f32 %v3208_v26, %v3210_v27 }
 0x141   :  { %4927 = vst [vmem:[#allocation9_spill] sm:$0xff] %v3210_v27 }
 0x142   :  { %490 = vmax.xlane.f32.xlu1 %v489_v28 }
 0x143   :  { %v146_v29 = vpop.trf.xlu0 }
 0x144   :  { %2536 = vmatmul.msk.f32.gmra.mxu2 %vm42_vm1, %v146_v29  ;;  %2569 = vmatmul.msk.f32.gmra.mxu3 %vm42_vm1, %v146_v29 }
 0x147   :  { %v3216_v30 = vpop.f32.mrf.mxu2  ;;  %v3218_v31 = vpop.f32.mrf.mxu3 }
 0x148   :  { %4928 = vst [vmem:[#allocation10_spill] sm:$0xff] %v3216_v30  ;;  %v492_v32 = vmax.f32 %v3216_v30, %v3218_v31 }
 0x149   :  { %4929 = vst [vmem:[#allocation11_spill] sm:$0xff] %v3218_v31 }
 0x14a   :  { %493 = vmax.xlane.f32.xlu2 %v492_v32 }
 0x14b   :  { %v147_v33 = vpop.trf.xlu0 }
 0x14c   :  { %2537 = vmatmul.msk.f32.gmra.mxu2 %vm42_vm1, %v147_v33  ;;  %2570 = vmatmul.msk.f32.gmra.mxu3 %vm42_vm1, %v147_v33 }
 0x14f   :  { %v3224_v34 = vpop.f32.mrf.mxu2  ;;  %v3226_v35 = vpop.f32.mrf.mxu3 }
 0x150   :  { %4930 = vst [vmem:[#allocation12_spill] sm:$0xff] %v3224_v34  ;;  %v495_v36 = vmax.f32 %v3224_v34, %v3226_v35 }
 0x151   :  { %4931 = vst [vmem:[#allocation13_spill] sm:$0xff] %v3226_v35 }
 0x152   :  { %496 = vmax.xlane.f32.xlu1 %v495_v36 }
 0x153   :  { %v148_v37 = vpop.trf.xlu0 }
 0x154   :  { %2538 = vmatmul.msk.f32.gmra.mxu2 %vm42_vm1, %v148_v37  ;;  %2571 = vmatmul.msk.f32.gmra.mxu3 %vm42_vm1, %v148_v37 }
 0x157   :  { %v3232_v38 = vpop.f32.mrf.mxu2  ;;  %v3234_v39 = vpop.f32.mrf.mxu3 }
 0x158   :  { %4932 = vst [vmem:[#allocation14_spill] sm:$0xff] %v3232_v38  ;;  %v498_v40 = vmax.f32 %v3232_v38, %v3234_v39 }
 0x159   :  { %4933 = vst [vmem:[#allocation15_spill] sm:$0xff] %v3234_v39 }
 0x15a   :  { %499 = vmax.xlane.f32.xlu1 %v498_v40 }
 0x15b   :  { %v149_v41 = vpop.trf.xlu0 }
 0x15c   :  { %2539 = vmatmul.msk.f32.gmra.mxu2 %vm42_vm1, %v149_v41  ;;  %2572 = vmatmul.msk.f32.gmra.mxu3 %vm42_vm1, %v149_v41 }
 0x15f   :  { %v3240_v42 = vpop.f32.mrf.mxu2  ;;  %v3242_v43 = vpop.f32.mrf.mxu3 }
 0x160   :  { %4934 = vst [vmem:[#allocation16_spill] sm:$0xff] %v3242_v43  ;;  %v501_v44 = vmax.f32 %v3240_v42, %v3242_v43 }
 0x162   :  { %502 = vmax.xlane.f32.xlu1 %v501_v44 }
 0x163   :  { %v150_v45 = vpop.trf.xlu0 }
 0x164   :  { %2540 = vmatmul.msk.f32.gmra.mxu2 %vm42_vm1, %v150_v45  ;;  %2573 = vmatmul.msk.f32.gmra.mxu3 %vm42_vm1, %v150_v45 }
 0x167   :  { %v3248_v46 = vpop.f32.mrf.mxu2  ;;  %v3250_v47 = vpop.f32.mrf.mxu3 }
 0x168   :  { %v504_v48 = vmax.f32 %v3248_v46, %v3250_v47 }
 0x16a   :  { %505 = vmax.xlane.f32.xlu1 %v504_v48 }
 0x16b   :  { %v151_v49 = vpop.trf.xlu0 }
 0x16c   :  { %2541 = vmatmul.msk.f32.gmra.mxu2 %vm42_vm1, %v151_v49  ;;  %2574 = vmatmul.msk.f32.gmra.mxu3 %vm42_vm1, %v151_v49 }
 0x16f   :  { %v3256_v50 = vpop.f32.mrf.mxu2  ;;  %v3258_v51 = vpop.f32.mrf.mxu3 }
 0x170   :  { %v507_v52 = vmax.f32 %v3256_v50, %v3258_v51 }
 0x172   :  { %508 = vmax.xlane.f32.xlu1 %v507_v52 }
 0x173   :  { %v152_v53 = vpop.trf.xlu0 }
 0x174   :  { %2542 = vmatmul.msk.f32.gmra.mxu2 %vm42_vm1, %v152_v53  ;;  %2575 = vmatmul.msk.f32.gmra.mxu3 %vm42_vm1, %v152_v53 }
 0x177   :  { %v3264_v54 = vpop.f32.mrf.mxu2  ;;  %v3266_v55 = vpop.f32.mrf.mxu3 }
 0x178   :  { %v510_v56 = vmax.f32 %v3264_v54, %v3266_v55 }
 0x17a   :  { %511 = vmax.xlane.f32.xlu1 %v510_v56 }
 0x17b   :  { %v153_v57 = vpop.trf.xlu0 }
 0x17c   :  { %2543 = vmatmul.msk.f32.gmra.mxu2 %vm42_vm1, %v153_v57  ;;  %2576 = vmatmul.msk.f32.gmra.mxu3 %vm42_vm1, %v153_v57 }
 0x17f   :  { %v3272_v58 = vpop.f32.mrf.mxu2  ;;  %v3274_v59 = vpop.f32.mrf.mxu3 }
 0x180   :  { %v513_v60 = vmax.f32 %v3272_v58, %v3274_v59 }
 0x182   :  { %514 = vmax.xlane.f32.xlu1 %v513_v60 }
 0x183   :  { %v154_v61 = vpop.trf.xlu0 }
 0x184   :  { %2544 = vmatmul.msk.f32.gmra.mxu2 %vm42_vm1, %v154_v61  ;;  %2577 = vmatmul.msk.f32.gmra.mxu3 %vm42_vm1, %v154_v61 }
 0x187   :  { %v3280_v62 = vpop.f32.mrf.mxu2  ;;  %v3282_v63 = vpop.f32.mrf.mxu3 }
 0x188   :  { %v516_v0 = vmax.f32 %v3280_v62, %v3282_v63 }
 0x18a   :  { %517 = vmax.xlane.f32.xlu1 %v516_v0 }
 0x18b   :  { %v155_v2 = vpop.trf.xlu0 }
 0x18c   :  { %2545 = vmatmul.msk.f32.gmra.mxu2 %vm42_vm1, %v155_v2  ;;  %2578 = vmatmul.msk.f32.gmra.mxu3 %vm42_vm1, %v155_v2 }
 0x18f   :  { %v3288_v3 = vpop.f32.mrf.mxu2  ;;  %v3290_v4 = vpop.f32.mrf.mxu3 }
 0x190   :  { %v519_v5 = vmax.f32 %v3288_v3, %v3290_v4 }
 0x192   :  { %520 = vmax.xlane.f32.xlu1 %v519_v5 }
 0x193   :  { %v156_v6 = vpop.trf.xlu0 }
 0x194   :  { %2546 = vmatmul.msk.f32.gmra.mxu2 %vm42_vm1, %v156_v6  ;;  %2579 = vmatmul.msk.f32.gmra.mxu3 %vm42_vm1, %v156_v6 }
 0x197   :  { %v3296_v7 = vpop.f32.mrf.mxu2  ;;  %v3298_v8 = vpop.f32.mrf.mxu3 }
 0x198   :  { %v522_v9 = vmax.f32 %v3296_v7, %v3298_v8 }
 0x19a   :  { %523 = vmax.xlane.f32.xlu1 %v522_v9 }
 0x19b   :  { %v157_v10 = vpop.trf.xlu0 }
 0x19c   :  { %2547 = vmatmul.msk.f32.gmra.mxu2 %vm42_vm1, %v157_v10  ;;  %2580 = vmatmul.msk.f32.gmra.mxu3 %vm42_vm1, %v157_v10 }
 0x19f   :  { %v3304_v11 = vpop.f32.mrf.mxu2  ;;  %v3306_v12 = vpop.f32.mrf.mxu3 }
 0x1a0   :  { %v525_v13 = vmax.f32 %v3304_v11, %v3306_v12 }
 0x1a2   :  { %526 = vmax.xlane.f32.xlu1 %v525_v13 }
 0x1a3   :  { %v158_v14 = vpop.trf.xlu0 }
 0x1a4   :  { %2548 = vmatmul.msk.f32.gmra.mxu2 %vm42_vm1, %v158_v14  ;;  %2581 = vmatmul.msk.f32.gmra.mxu3 %vm42_vm1, %v158_v14 }
 0x1a7   :  { %v3312_v15 = vpop.f32.mrf.mxu2  ;;  %v3314_v16 = vpop.f32.mrf.mxu3 }
 0x1a8   :  { %v528_v17 = vmax.f32 %v3312_v15, %v3314_v16 }
 0x1aa   :  { %529 = vmax.xlane.f32.xlu2 %v528_v17 }
 0x1ab   :  { %v159_v18 = vpop.trf.xlu0 }
 0x1ac   :  { %2549 = vmatmul.msk.f32.gmra.mxu2 %vm42_vm1, %v159_v18  ;;  %2582 = vmatmul.msk.f32.gmra.mxu3 %vm42_vm1, %v159_v18 }
 0x1af   :  { %v3320_v19 = vpop.f32.mrf.mxu2  ;;  %v3322_v20 = vpop.f32.mrf.mxu3 }
 0x1b0   :  { %v531_v21 = vmax.f32 %v3320_v19, %v3322_v20 }
 0x1b2   :  { %532 = vmax.xlane.f32.xlu1 %v531_v21 }
 0x1b3   :  { %v160_v22 = vpop.trf.xlu0 }
 0x1b4   :  { %2550 = vmatmul.msk.f32.gmra.mxu2 %vm42_vm1, %v160_v22  ;;  %2583 = vmatmul.msk.f32.gmra.mxu3 %vm42_vm1, %v160_v22 }
 0x1b5   :  { %v3334_v28 = vpop.xlane.xlu1 %490 }
 0x1b6   :  { %4935 = vst [vmem:[#allocation17_spill] sm:$0xff] %v3334_v28 }
 0x1b7   :  { %v3328_v23 = vpop.f32.mrf.mxu2  ;;  %v3330_v24 = vpop.f32.mrf.mxu3 }
 0x1b8   :  { %v534_v25 = vmax.f32 %v3328_v23, %v3330_v24 }
 0x1ba   :  { %535 = vmax.xlane.f32.xlu1 %v534_v25 }
 0x1bf   :  { %v3336_v29 = vpop.f32.mrf.mxu2  ;;  %v3338_v32 = vpop.f32.mrf.mxu3 }
 0x1c0   :  { %4936 = vst [vmem:[#allocation18_spill] sm:$0xff] %v3336_v29  ;;  %v537_v33 = vmax.f32 %v3336_v29, %v3338_v32  ;;  %v3422_v29 = vpop.xlane.xlu2 %493 }
 0x1c1   :  { %4937 = vst [vmem:[#allocation19_spill] sm:$0xff] %v3338_v32 }
 0x1c2   :  { %538 = vmax.xlane.f32.xlu1 %v537_v33  ;;  %4946 = vst [vmem:[#allocation28_spill] sm:$0xff] %v3422_v29 }
 0x1c5   :  { %v3342_v36 = vpop.xlane.xlu1 %496 }
 0x1c6   :  { %4938 = vst [vmem:[#allocation20_spill] sm:$0xff] %v3342_v36 }
 0x1c7   :  { %v3344_v37 = vpop.f32.mrf.mxu2  ;;  %v3346_v40 = vpop.f32.mrf.mxu3 }
 0x1c8   :  { %4939 = vst [vmem:[#allocation21_spill] sm:$0xff] %v3344_v37  ;;  %v540_v41 = vmax.f32 %v3344_v37, %v3346_v40 }
 0x1c9   :  { %4940 = vst [vmem:[#allocation22_spill] sm:$0xff] %v3346_v40 }
 0x1ca   :  { %541 = vmax.xlane.f32.xlu0 %v540_v41 }
 0x1cd   :  { %v3350_v44 = vpop.xlane.xlu1 %499 }
 0x1ce   :  { %4941 = vst [vmem:[#allocation23_spill] sm:$0xff] %v3350_v44 }
 0x1cf   :  { %v3352_v45 = vpop.f32.mrf.mxu2  ;;  %v3354_v48 = vpop.f32.mrf.mxu3 }
 0x1d0   :  { %4942 = vst [vmem:[#allocation24_spill] sm:$0xff] %v3352_v45  ;;  %v543_v49 = vmax.f32 %v3352_v45, %v3354_v48 }
 0x1d1   :  { %4943 = vst [vmem:[#allocation25_spill] sm:$0xff] %v3354_v48 }
 0x1d2   :  { %544 = vmax.xlane.f32.xlu2 %v543_v49 }
 0x1d5   :  { %v3358_v52 = vpop.xlane.xlu1 %502 }
 0x1d7   :  { %v3360_v53 = vpop.f32.mrf.mxu2  ;;  %v3362_v56 = vpop.f32.mrf.mxu3 }
 0x1d8   :  { %4944 = vst [vmem:[#allocation26_spill] sm:$0xff] %v3360_v53  ;;  %v546_v57 = vmax.f32 %v3360_v53, %v3362_v56 }
 0x1d9   :  { %4945 = vst [vmem:[#allocation27_spill] sm:$0xff] %v3362_v56 }
 0x1da   :  { %547 = vmax.xlane.f32.xlu1 %v546_v57 }
 0x1dd   :  { %v3366_v60 = vpop.xlane.xlu1 %505 }
 0x1df   :  { %v3368_v61 = vpop.f32.mrf.mxu2  ;;  %v3370_v0 = vpop.f32.mrf.mxu3 }
 0x1e0   :  { %v549_v2 = vmax.f32 %v3368_v61, %v3370_v0 }
 0x1e2   :  { %550 = vmax.xlane.f32.xlu2 %v549_v2 }
 0x1e5   :  { %v3374_v5 = vpop.xlane.xlu1 %508 }
 0x1e7   :  { %v3376_v6 = vpop.f32.mrf.mxu2  ;;  %v3378_v9 = vpop.f32.mrf.mxu3 }
 0x1e8   :  { %v552_v10 = vmax.f32 %v3376_v6, %v3378_v9 }
 0x1ea   :  { %553 = vmax.xlane.f32.xlu2 %v552_v10 }
 0x1ed   :  { %v3382_v13 = vpop.xlane.xlu1 %511 }
 0x1ef   :  { %v3384_v14 = vpop.f32.mrf.mxu2  ;;  %v3386_v17 = vpop.f32.mrf.mxu3 }
 0x1f0   :  { %v555_v18 = vmax.f32 %v3384_v14, %v3386_v17 }
 0x1f2   :  { %556 = vmax.xlane.f32.xlu2 %v555_v18 }
 0x1f5   :  { %v3390_v21 = vpop.xlane.xlu1 %514 }
 0x1f7   :  { %v3392_v22 = vpop.f32.mrf.mxu2  ;;  %v3394_v25 = vpop.f32.mrf.mxu3 }
 0x1f8   :  { %v558_v33 = vmax.f32 %v3392_v22, %v3394_v25 }
 0x1fa   :  { %559 = vmax.xlane.f32.xlu2 %v558_v33 }
 0x1fd   :  { %v3398_v41 = vpop.xlane.xlu1 %517 }
 0x1ff   :  { %v3400_v49 = vpop.f32.mrf.mxu2  ;;  %v3402_v57 = vpop.f32.mrf.mxu3 }
 0x200   :  { %v561_v2 = vmax.f32 %v3400_v49, %v3402_v57 }
 0x202   :  { %562 = vmax.xlane.f32.xlu2 %v561_v2 }
 0x205   :  { %v3406_v10 = vpop.xlane.xlu1 %520 }
 0x207   :  { %v3408_v18 = vpop.f32.mrf.mxu2  ;;  %v3410_v40 = vpop.f32.mrf.mxu3 }
 0x208   :  { %v564_v37 = vmax.f32 %v3408_v18, %v3410_v40 }
 0x20a   :  { %565 = vmax.xlane.f32.xlu2 %v564_v37 }
 0x20d   :  { %v524_v33 = vpop.xlane.xlu1 %523 }
 0x20e   :  { %v607_v27 = vsub.f32 %v3296_v7, %v524_v33  ;;  %v608_v26 = vsub.f32 %v3298_v8, %v524_v33 }
 0x20f   :  { %v3416_v28 = vpop.f32.mrf.mxu2  ;;  %v3418_v31 = vpop.f32.mrf.mxu3 }
 0x210   :  { %v567_v2 = vmax.f32 %v3416_v28, %v3418_v31  ;;  %v693_v30 = vmul.f32 1.442695, %v607_v27  ;;  %v695_v32 = vmul.f32 1.442695, %v608_v26 }
 0x212   :  { %568 = vmax.xlane.f32.xlu2 %v567_v2  ;;  %2687 = vpow2.f32 %v693_v30 }
 0x213   :  { %2689 = vpow2.f32 %v695_v32 }
 0x215   :  { %v527_v35 = vpop.xlane.xlu1 %526 }
 0x216   :  { %v609_v37 = vsub.f32 %v3304_v11, %v527_v35  ;;  %v610_v7 = vsub.f32 %v3306_v12, %v527_v35 }
 0x217   :  { %v3426_v8 = vpop.f32.mrf.mxu2  ;;  %v3428_v33 = vpop.f32.mrf.mxu3 }
 0x218   :  { %v697_v34 = vmul.f32 1.442695, %v609_v37  ;;  %v699_v36 = vmul.f32 1.442695, %v610_v7  ;;  %v570_v27 = vmax.f32 %v3426_v8, %v3428_v33  ;;  %v3432_v26 = vpop.eup %2687 }
 0x219   :  { %v3434_v30 = vpop.eup %2689 }
 0x21a   :  { %2691 = vpow2.f32 %v697_v34  ;;  %571 = vmax.xlane.f32.xlu2 %v570_v27  ;;  %v810_v34 = vadd.f32 %v3434_v30, %v3432_v26 }
 0x21b   :  { %2693 = vpow2.f32 %v699_v36 }
 0x21d   :  { %v530_v11 = vpop.xlane.xlu2 %529 }
 0x21e   :  { %v611_v35 = vsub.f32 %v3312_v15, %v530_v11  ;;  %v612_v12 = vsub.f32 %v3314_v16, %v530_v11 }
 0x21f   :  { %v3438_v32 = vpop.f32.mrf.mxu2  ;;  %v3440_v2 = vpop.f32.mrf.mxu3 }
 0x220   :  { %v3442_v37 = vpop.eup %2691  ;;  %v701_v7 = vmul.f32 1.442695, %v611_v35  ;;  %v703_v29 = vmul.f32 1.442695, %v612_v12  ;;  %v573_v27 = vmax.f32 %v3438_v32, %v3440_v2 }
 0x221   :  { %v3446_v36 = vpop.eup %2693 }
 0x222   :  { %2695 = vpow2.f32 %v701_v7  ;;  %811 = vadd.xlane.f32.xlu2 %v810_v34  ;;  %v813_v15 = vadd.f32 %v3446_v36, %v3442_v37 }
 0x223   :  { %2697 = vpow2.f32 %v703_v29 }
 0x224   :  { %814 = vadd.xlane.f32.xlu1 %v813_v15 }
 0x225   :  { %v533_v16 = vpop.xlane.xlu1 %532 }
 0x226   :  { %v613_v29 = vsub.f32 %v3320_v19, %v533_v16  ;;  %v614_v38 = vsub.f32 %v3322_v20, %v533_v16 }
 0x227   :  { %v3456_v12 = vpop.f32.mrf.mxu2  ;;  %v3458_v48 = vpop.f32.mrf.mxu3 }
 0x228   :  { %v3452_v11 = vpop.eup %2695  ;;  %v576_v39 = vmax.f32 %v3456_v12, %v3458_v48  ;;  %v705_v53 = vmul.f32 1.442695, %v613_v29 }
 0x229   :  { %v3454_v35 = vpop.eup %2697 }
 0x22a   :  { %574 = vmax.xlane.f32.xlu2 %v573_v27  ;;  %v816_v7 = vadd.f32 %v3454_v35, %v3452_v11  ;;  %v707_v27 = vmul.f32 1.442695, %v614_v38 }
 0x22c   :  { %817 = vadd.xlane.f32.xlu1 %v816_v7 }
 0x22d   :  { %v536_v34 = vpop.xlane.xlu1 %535 }
 0x22e   :  { %v615_v15 = vsub.f32 %v3328_v23, %v536_v34  ;;  %v616_v45 = vsub.f32 %v3330_v24, %v536_v34 }
 0x22f   :  { %v3468_v7 = vpop.f32.mrf.mxu2  ;;  %v3470_v43 = vpop.f32.mrf.mxu3 }
 0x230   :  { %v709_v44 = vmul.f32 1.442695, %v615_v15  ;;  %v711_v56 = vmul.f32 1.442695, %v616_v45  ;;  %v579_v19 = vmax.f32 %v3468_v7, %v3470_v43  ;;  %v606_v45 = vsub.f32 %v3290_v4, %v3406_v10 }
 0x231   :  { %v603_v15 = vsub.f32 %v3280_v62, %v3398_v41  ;;  %v604_v4 = vsub.f32 %v3282_v63, %v3398_v41  ;;  %v601_v62 = vsub.f32 %v3272_v58, %v3390_v21  ;;  %v599_v58 = vsub.f32 %v3264_v54, %v3382_v13 }
 0x232   :  { %2699 = vpow2.f32 %v709_v44  ;;  %577 = vmax.xlane.f32.xlu2 %v576_v39  ;;  %v605_v44 = vsub.f32 %v3288_v3, %v3406_v10  ;;  %v691_v16 = vmul.f32 1.442695, %v606_v45  ;;  %v602_v45 = vsub.f32 %v3274_v59, %v3390_v21 }
 0x233   :  { %2701 = vpow2.f32 %v711_v56  ;;  %v685_v10 = vmul.f32 1.442695, %v603_v15  ;;  %v681_v41 = vmul.f32 1.442695, %v601_v62  ;;  %v600_v59 = vsub.f32 %v3266_v55, %v3382_v13 }
 0x234   :  { %2703 = vpow2.f32 %v705_v53  ;;  %v689_v56 = vmul.f32 1.442695, %v605_v44  ;;  %v597_v54 = vsub.f32 %v3256_v50, %v3374_v5  ;;  %v598_v55 = vsub.f32 %v3258_v51, %v3374_v5 }
 0x235   :  { %2705 = vpow2.f32 %v707_v27  ;;  %v687_v27 = vmul.f32 1.442695, %v604_v4  ;;  %v679_v4 = vmul.f32 1.442695, %v600_v59 }
 0x236   :  { %2707 = vpow2.f32 %v689_v56 }
 0x237   :  { %v3490_v34 = vpop.f32.mrf.mxu2  ;;  %v3492_v29 = vpop.f32.mrf.mxu3  ;;  %2709 = vpow2.f32 %v691_v16 }
 0x238   :  { %v3474_v23 = vpop.eup %2699  ;;  %v582_v3 = vmax.f32 %v3490_v34, %v3492_v29  ;;  %2711 = vpow2.f32 %v685_v10 }
 0x239   :  { %v3476_v24 = vpop.eup %2701  ;;  %2713 = vpow2.f32 %v687_v27 }
 0x23a   :  { %580 = vmax.xlane.f32.xlu2 %v579_v19  ;;  %v822_v20 = vadd.f32 %v3476_v24, %v3474_v23  ;;  %v3480_v39 = vpop.eup %2703  ;;  %2715 = vpow2.f32 %v681_v41 }
 0x23b   :  { %v3482_v38 = vpop.eup %2705 }
 0x23c   :  { %823 = vadd.xlane.f32.xlu1 %v822_v20  ;;  %v819_v53 = vadd.f32 %v3482_v38, %v3480_v39  ;;  %v3500_v19 = vpop.eup %2707 }
 0x23d   :  { %v3502_v20 = vpop.eup %2709 }
 0x23e   :  { %v807_v63 = vadd.f32 %v3502_v20, %v3500_v19  ;;  %v3512_v56 = vpop.eup %2711 }
 0x23f   :  { %v3514_v16 = vpop.eup %2713 }
 0x240   :  { %v804_v21 = vadd.f32 %v3514_v16, %v3512_v56  ;;  %v3524_v10 = vpop.eup %2715 }
 0x242   :  { %820 = vadd.xlane.f32.xlu2 %v819_v53  ;;  %v683_v53 = vmul.f32 1.442695, %v602_v45  ;;  %v673_v45 = vmul.f32 1.442695, %v597_v54 }
 0x244   :  { %2717 = vpow2.f32 %v683_v53 }
 0x245   :  { %v3504_v44 = vpop.xlane.xlu2 %544 }
 0x24a   :  { %583 = vmax.xlane.f32.xlu2 %v582_v3  ;;  %v677_v3 = vmul.f32 1.442695, %v599_v58  ;;  %v3526_v27 = vpop.eup %2717 }
 0x24b   :  { %4947 = vst [vmem:[#allocation29_spill] sm:$0xff] %v3526_v27  ;;  %v801_v13 = vadd.f32 %v3526_v27, %v3524_v10 }
 0x24c   :  { %2719 = vpow2.f32 %v677_v3 }
 0x24d   :  { %2721 = vpow2.f32 %v679_v4 }
 0x24e   :  { %2723 = vpow2.f32 %v673_v45 }
 0x252   :  { %808 = vadd.xlane.f32.xlu2 %v807_v63  ;;  %v675_v63 = vmul.f32 1.442695, %v598_v55  ;;  %v3536_v41 = vpop.eup %2719 }
 0x253   :  { %4948 = vst [vmem:[#allocation30_spill] sm:$0xff] %v3536_v41  ;;  %v3538_v53 = vpop.eup %2721 }
 0x254   :  { %4949 = vst [vmem:[#allocation31_spill] sm:$0xff] %v3538_v53  ;;  %2725 = vpow2.f32 %v675_v63  ;;  %v798_v50 = vadd.f32 %v3538_v53, %v3536_v41  ;;  %v3544_v51 = vpop.eup %2723 }
 0x255   :  { %v3516_v15 = vpop.xlane.xlu2 %550 }
 0x25a   :  { %805 = vadd.xlane.f32.xlu2 %v804_v21  ;;  %v3546_v5 = vpop.eup %2725 }
 0x25b   :  { %4950 = vst [vmem:[#allocation32_spill] sm:$0xff] %v3546_v5  ;;  %v795_v21 = vadd.f32 %v3546_v5, %v3544_v51 }
 0x25d   :  { %v3528_v62 = vpop.xlane.xlu2 %553 }
 0x262   :  { %802 = vadd.xlane.f32.xlu2 %v801_v13 }
 0x265   :  { %v3540_v58 = vpop.xlane.xlu2 %556 }
 0x26a   :  { %799 = vadd.xlane.f32.xlu2 %v798_v50 }
 0x26d   :  { %v3548_v59 = vpop.xlane.xlu2 %559 }
 0x272   :  { %796 = vadd.xlane.f32.xlu2 %v795_v21 }
 0x275   :  { %v563_v3 = vpop.xlane.xlu2 %562 }
 0x276   :  { %v633_v4 = vsub.f32 %v3400_v49, %v563_v3  ;;  %v634_v54 = vsub.f32 %v3402_v57, %v563_v3 }
 0x278   :  { %v745_v55 = vmul.f32 1.442695, %v633_v4  ;;  %v747_v13 = vmul.f32 1.442695, %v634_v54 }
 0x27a   :  { %2727 = vpow2.f32 %v745_v55 }
 0x27b   :  { %2729 = vpow2.f32 %v747_v13 }
 0x27d   :  { %v566_v45 = vpop.xlane.xlu2 %565 }
 0x27e   :  { %v635_v63 = vsub.f32 %v3408_v18, %v566_v45  ;;  %v636_v50 = vsub.f32 %v3410_v40, %v566_v45  ;;  %v3564_v18 = vpop.xlane.xlu1 %538 }
 0x280   :  { %v3556_v53 = vpop.eup %2727  ;;  %v749_v41 = vmul.f32 1.442695, %v635_v63  ;;  %v751_v27 = vmul.f32 1.442695, %v636_v50 }
 0x281   :  { %v3558_v5 = vpop.eup %2729 }
 0x282   :  { %2731 = vpow2.f32 %v749_v41  ;;  %v849_v49 = vadd.f32 %v3558_v5, %v3556_v53 }
 0x283   :  { %2733 = vpow2.f32 %v751_v27 }
 0x284   :  { %850 = vadd.xlane.f32.xlu1 %v849_v49 }
 0x285   :  { %v569_v57 = vpop.xlane.xlu2 %568 }
 0x286   :  { %v637_v21 = vsub.f32 %v3416_v28, %v569_v57  ;;  %v638_v3 = vsub.f32 %v3418_v31, %v569_v57  ;;  %v3574_v31 = vpop.xlane.xlu1 %547 }
 0x288   :  { %v3566_v40 = vpop.eup %2731  ;;  %v753_v4 = vmul.f32 1.442695, %v637_v21  ;;  %v755_v54 = vmul.f32 1.442695, %v638_v3 }
 0x289   :  { %v3568_v55 = vpop.eup %2733  ;;  %v970_v3 = vld.sshfl [vmem:[#allocation1] sm:$0xff pattern:$0x75316420] }
 0x28a   :  { %2735 = vpow2.f32 %v753_v4  ;;  %v852_v41 = vadd.f32 %v3568_v55, %v3566_v40  ;;  %2584 = vmatpush.msk.msra.mxu0 %vm46_vm0, %v970_v3 }
 0x28b   :  { %2737 = vpow2.f32 %v755_v54 }
 0x28c   :  { %853 = vadd.xlane.f32.xlu1 %v852_v41 }
 0x28d   :  { %v572_v27 = vpop.xlane.xlu2 %571 }
 0x28e   :  { %v639_v13 = vsub.f32 %v3426_v8, %v572_v27  ;;  %v640_v28 = vsub.f32 %v3428_v33, %v572_v27  ;;  %v971_v8 = vld.sshfl [vmem:[#allocation1 + $0x8] sm:$0xff pattern:$0x75316420] }
 0x28f   :  { %2586 = vmatpush.msk.msra.mxu1 %vm46_vm0, %v971_v8  ;;  %1150 = vst [vmem:[#allocation1] ss:$2 sm:$0xff] %v3162_v1 }
 0x290   :  { %v3576_v45 = vpop.eup %2735  ;;  %v757_v63 = vmul.f32 1.442695, %v639_v13  ;;  %v759_v50 = vmul.f32 1.442695, %v640_v28  ;;  %v3594_v13 = vld [vmem:[%s4860_s1 + $0x8] sm:$0xff] }
 0x291   :  { %v3578_v49 = vpop.eup %2737 }
 0x292   :  { %2739 = vpow2.f32 %v757_v63  ;;  %v855_v57 = vadd.f32 %v3578_v49, %v3576_v45 }
 0x293   :  { %2741 = vpow2.f32 %v759_v50 }
 0x294   :  { %856 = vadd.xlane.f32.xlu1 %v855_v57 }
 0x295   :  { %v812_v21 = vpop.xlane.xlu2 %811 }
 0x296   :  { %2743 = vrcp.f32 %v812_v21  ;;  %v3601_v21 = vld.sshfl [vmem:[#allocation1] sm:$0xff pattern:$0x75316420]  ;;  %v3603_v3 = vld.sshfl [vmem:[#allocation1 + $0x8] sm:$0xff pattern:$0x75316420] }
 0x297   :  { %v815_v4 = vpop.xlane.xlu1 %814  ;;  %1274 = vst [vmem:[#allocation1] ss:$2 sm:$0xff] %v3594_v13 }
 0x298   :  { %v3585_v33 = vpop.eup %2739  ;;  %2745 = vrcp.f32 %v815_v4 }
 0x299   :  { %v3587_v54 = vpop.eup %2741 }
 0x29a   :  { %4951 = vst [vmem:[#allocation33_spill] sm:$0xff] %v3587_v54  ;;  %v858_v41 = vadd.f32 %v3587_v54, %v3585_v33 }
 0x29c   :  { %v2744_v27 = vpop.eup %2743  ;;  %859 = vadd.xlane.f32.xlu1 %v858_v41 }
 0x29d   :  { %v575_v28 = vpop.xlane.xlu2 %574  ;;  %v3597_v63 = vmul.f32 %v2744_v27, %v3432_v26  ;;  %v3613_v26 = vmul.f32 %v2744_v27, %v3434_v30  ;;  %v631_v27 = vsub.f32 %v3392_v22, %v3548_v59 }
 0x29e   :  { %v2746_v1 = vpop.eup %2745  ;;  %v641_v50 = vsub.f32 %v3438_v32, %v575_v28  ;;  %v642_v57 = vsub.f32 %v3440_v2, %v575_v28 }
 0x29f   :  { %v818_v8 = vpop.xlane.xlu1 %817  ;;  %v3607_v4 = vmul.f32 %v2746_v1, %v3442_v37  ;;  %v3610_v41 = vmul.f32 %v2746_v1, %v3446_v36  ;;  %1227 = vst [vmem:[#allocation5 + $0xb0] sm:$0xff] %v3597_v63  ;;  %v741_v22 = vmul.f32 1.442695, %v631_v27  ;;  %v630_v27 = vsub.f32 %v3386_v17, %v3540_v58 }
 0x2a0   :  { %v761_v54 = vmul.f32 1.442695, %v641_v50  ;;  %v763_v32 = vmul.f32 1.442695, %v642_v57  ;;  %2747 = vrcp.f32 %v818_v8  ;;  %1228 = vst [vmem:[#allocation5 + $0xb8] sm:$0xff] %v3613_v26 }
 0x2a1   :  { %1229 = vst [vmem:[#allocation5 + $0xc0] sm:$0xff] %v3607_v4 }
 0x2a2   :  { %2749 = vpow2.f32 %v761_v54  ;;  %1230 = vst [vmem:[#allocation5 + $0xc8] sm:$0xff] %v3610_v41 }
 0x2a3   :  { %2751 = vpow2.f32 %v763_v32 }
 0x2a5   :  { %v578_v2 = vpop.xlane.xlu2 %577 }
 0x2a6   :  { %v2748_v37 = vpop.eup %2747  ;;  %v643_v36 = vsub.f32 %v3456_v12, %v578_v2  ;;  %v644_v30 = vsub.f32 %v3458_v48, %v578_v2  ;;  %v632_v12 = vsub.f32 %v3394_v25, %v3548_v59  ;;  %v629_v59 = vsub.f32 %v3384_v14, %v3540_v58 }
 0x2a7   :  { %v3624_v28 = vmul.f32 %v2748_v37, %v3452_v11  ;;  %v3627_v1 = vmul.f32 %v2748_v37, %v3454_v35 }
 0x2a8   :  { %v3629_v54 = vpop.eup %2749  ;;  %v765_v50 = vmul.f32 1.442695, %v643_v36  ;;  %v767_v57 = vmul.f32 1.442695, %v644_v30  ;;  %v743_v11 = vmul.f32 1.442695, %v632_v12 }
 0x2a9   :  { %v3631_v8 = vpop.eup %2751  ;;  %1231 = vst [vmem:[#allocation5 + $0xd0] sm:$0xff] %v3624_v28  ;;  %v739_v12 = vmul.f32 1.442695, %v630_v27 }
 0x2aa   :  { %2753 = vpow2.f32 %v765_v50  ;;  %v861_v48 = vadd.f32 %v3631_v8, %v3629_v54  ;;  %1232 = vst [vmem:[#allocation5 + $0xd8] sm:$0xff] %v3627_v1 }
 0x2ab   :  { %2755 = vpow2.f32 %v767_v57 }
 0x2ac   :  { %862 = vadd.xlane.f32.xlu1 %v861_v48  ;;  %2757 = vpow2.f32 %v741_v22 }
 0x2ad   :  { %v581_v35 = vpop.xlane.xlu2 %580 }
 0x2ae   :  { %v645_v32 = vsub.f32 %v3468_v7, %v581_v35  ;;  %v646_v2 = vsub.f32 %v3470_v43, %v581_v35  ;;  %v737_v7 = vmul.f32 1.442695, %v629_v59 }
 0x2af   :  { %v824_v37 = vpop.xlane.xlu1 %823 }
 0x2b0   :  { %v3641_v25 = vpop.eup %2753  ;;  %v769_v36 = vmul.f32 1.442695, %v645_v32  ;;  %v771_v30 = vmul.f32 1.442695, %v646_v2  ;;  %2759 = vrcp.f32 %v824_v37  ;;  %v628_v2 = vsub.f32 %v3378_v9, %v3528_v62 }
 0x2b1   :  { %v3645_v50 = vpop.eup %2755  ;;  %2761 = vpow2.f32 %v743_v11  ;;  %v627_v11 = vsub.f32 %v3376_v6, %v3528_v62  ;;  %v595_v6 = vsub.f32 %v3248_v46, %v3366_v60  ;;  %v625_v46 = vsub.f32 %v3368_v61, %v3516_v15 }
 0x2b2   :  { %2763 = vpow2.f32 %v769_v36  ;;  %v864_v43 = vadd.f32 %v3645_v50, %v3641_v25  ;;  %v3651_v57 = vpop.eup %2757  ;;  %v735_v36 = vmul.f32 1.442695, %v628_v2  ;;  %v593_v61 = vsub.f32 %v3240_v42, %v3358_v52  ;;  %v4953_v42 = vld [vmem:[#allocation26_spill] sm:$0xff] }
 0x2b3   :  { %2765 = vpow2.f32 %v771_v30  ;;  %v733_v59 = vmul.f32 1.442695, %v627_v11  ;;  %v4952_v11 = vld [vmem:[#allocation16_spill] sm:$0xff] }
 0x2b4   :  { %865 = vadd.xlane.f32.xlu1 %v864_v43  ;;  %v594_v2 = vsub.f32 %v4952_v11, %v3358_v52 }
 0x2b5   :  { %v821_v14 = vpop.xlane.xlu2 %820 }
 0x2b6   :  { %v2760_v48 = vpop.eup %2759  ;;  %2767 = vrcp.f32 %v821_v14  ;;  %v596_v14 = vsub.f32 %v3250_v47, %v3366_v60  ;;  %v729_v60 = vmul.f32 1.442695, %v625_v46 }
 0x2b7   :  { %v3653_v22 = vpop.eup %2761  ;;  %v935_v35 = vmul.f32 %v2760_v48, %v3474_v23  ;;  %v936_v17 = vmul.f32 %v2760_v48, %v3476_v24  ;;  %2769 = vpow2.f32 %v737_v7  ;;  %v669_v48 = vmul.f32 1.442695, %v595_v6 }
 0x2b8   :  { %v3657_v58 = vpop.eup %2763  ;;  %2771 = vpow2.f32 %v739_v12  ;;  %v846_v23 = vadd.f32 %v3653_v22, %v3651_v57  ;;  %v671_v47 = vmul.f32 1.442695, %v596_v14  ;;  %v667_v6 = vmul.f32 1.442695, %v594_v2  ;;  %v4960_v2 = vld [vmem:[#allocation20_spill] sm:$0xff] }
 0x2b9   :  { %v3661_v32 = vpop.eup %2765  ;;  %1019 = vmatpush.xpose.msrb.mxu0 %v935_v35  ;;  %1235 = vst [vmem:[#allocation5 + $0xf0] sm:$0xff] %v935_v35  ;;  %1039 = vmatpush.xpose.msrb.mxu1 %v936_v17  ;;  %2773 = vpow2.f32 %v733_v59 }
 0x2ba   :  { %1236 = vst [vmem:[#allocation5 + $0xf8] sm:$0xff] %v936_v17  ;;  %v867_v24 = vadd.f32 %v3661_v32, %v3657_v58  ;;  %2775 = vpow2.f32 %v735_v36 }
 0x2bc   :  { %v2768_v37 = vpop.eup %2767  ;;  %847 = vadd.xlane.f32.xlu1 %v846_v23  ;;  %868 = vadd.xlane.f32.xlu2 %v867_v24  ;;  %v665_v24 = vmul.f32 1.442695, %v593_v61 }
 0x2bd   :  { %v584_v9 = vpop.xlane.xlu2 %583  ;;  %v933_v62 = vmul.f32 %v2768_v37, %v3480_v39  ;;  %v934_v30 = vmul.f32 %v2768_v37, %v3482_v38  ;;  %v3673_v27 = vpop.eup %2769  ;;  %v4954_v37 = vld [vmem:[#allocation27_spill] sm:$0xff] }
 0x2be   :  { %v647_v43 = vsub.f32 %v3490_v34, %v584_v9  ;;  %v648_v7 = vsub.f32 %v3492_v29, %v584_v9  ;;  %v3677_v12 = vpop.eup %2771  ;;  %v626_v34 = vsub.f32 %v3370_v0, %v3516_v15  ;;  %v624_v59 = vsub.f32 %v4954_v37, %v3574_v31  ;;  %v4955_v9 = vld [vmem:[#allocation23_spill] sm:$0xff] }
 0x2bf   :  { %1020 = vmatpush.xpose.msrb.mxu0 %v933_v62  ;;  %1233 = vst [vmem:[#allocation5 + $0xe0] sm:$0xff] %v933_v62  ;;  %1040 = vmatpush.xpose.msrb.mxu1 %v934_v30  ;;  %v843_v29 = vadd.f32 %v3677_v12, %v3673_v27  ;;  %v3691_v0 = vpop.eup %2773  ;;  %v4956_v62 = vld [vmem:[#allocation14_spill] sm:$0xff] }
 0x2c0   :  { %v773_v39 = vmul.f32 1.442695, %v647_v43  ;;  %v775_v38 = vmul.f32 1.442695, %v648_v7  ;;  %1234 = vst [vmem:[#allocation5 + $0xe8] sm:$0xff] %v934_v30  ;;  %v3693_v15 = vpop.eup %2775  ;;  %v591_v30 = vsub.f32 %v4956_v62, %v4955_v9 }
 0x2c1   :  { %v731_v35 = vmul.f32 1.442695, %v626_v34  ;;  %v840_v52 = vadd.f32 %v3693_v15, %v3691_v0  ;;  %v727_v7 = vmul.f32 1.442695, %v624_v59  ;;  %v4958_v34 = vld [vmem:[#allocation24_spill] sm:$0xff] }
 0x2c2   :  { %2777 = vpow2.f32 %v773_v39 }
 0x2c3   :  { %2779 = vpow2.f32 %v775_v38  ;;  %1021 = vmatpush.xpose.msrb.mxu0 %v3624_v28  ;;  %1041 = vmatpush.xpose.msrb.mxu1 %v3627_v1  ;;  %v623_v1 = vsub.f32 %v4953_v42, %v3574_v31  ;;  %v4961_v42 = vld [vmem:[#allocation12_spill] sm:$0xff] }
 0x2c4   :  { %844 = vadd.xlane.f32.xlu1 %v843_v29  ;;  %2781 = vpow2.f32 %v669_v48  ;;  %v621_v29 = vsub.f32 %v4958_v34, %v3504_v44 }
 0x2c5   :  { %v809_v17 = vpop.xlane.xlu2 %808  ;;  %v725_v43 = vmul.f32 1.442695, %v623_v1  ;;  %v589_v1 = vsub.f32 %v4961_v42, %v4960_v2 }
 0x2c6   :  { %2783 = vrcp.f32 %v809_v17 }
 0x2c7   :  { %2785 = vpow2.f32 %v671_v47  ;;  %1022 = vmatpush.xpose.msrb.mxu0 %v3607_v4  ;;  %1042 = vmatpush.xpose.msrb.mxu1 %v3610_v41 }
 0x2c8   :  { %v3699_v28 = vpop.eup %2777  ;;  %2787 = vpow2.f32 %v729_v60 }
 0x2c9   :  { %v3703_v23 = vpop.eup %2779  ;;  %2789 = vpow2.f32 %v731_v35 }
 0x2ca   :  { %v870_v4 = vadd.f32 %v3703_v23, %v3699_v28  ;;  %v3711_v41 = vpop.eup %2781  ;;  %2791 = vpow2.f32 %v665_v24  ;;  %v721_v24 = vmul.f32 1.442695, %v621_v29 }
 0x2cb   :  { %1023 = vmatpush.xpose.msrb.mxu0 %v3597_v63  ;;  %1043 = vmatpush.xpose.msrb.mxu1 %v3613_v26  ;;  %v4957_v26 = vld [vmem:[#allocation15_spill] sm:$0xff] }
 0x2cc   :  { %v2784_v36 = vpop.eup %2783  ;;  %841 = vadd.xlane.f32.xlu1 %v840_v52  ;;  %871 = vadd.xlane.f32.xlu2 %v870_v4  ;;  %v592_v48 = vsub.f32 %v4957_v26, %v4955_v9  ;;  %v4962_v9 = vld [vmem:[#allocation13_spill] sm:$0xff] }
 0x2cd   :  { %v3717_v31 = vpop.eup %2785  ;;  %v806_v14 = vpop.xlane.xlu2 %805  ;;  %v925_v46 = vmul.f32 %v2784_v36, %v3500_v19  ;;  %v926_v39 = vmul.f32 %v2784_v36, %v3502_v20  ;;  %v661_v19 = vmul.f32 1.442695, %v591_v30  ;;  %v4959_v20 = vld [vmem:[#allocation25_spill] sm:$0xff]  ;;  %v590_v62 = vsub.f32 %v4962_v9, %v4960_v2  ;;  %v4963_v30 = vld [vmem:[#allocation18_spill] sm:$0xff] }
 0x2ce   :  { %v3721_v38 = vpop.eup %2787  ;;  %2793 = vrcp.f32 %v806_v14  ;;  %v622_v47 = vsub.f32 %v4959_v20, %v3504_v44  ;;  %v792_v61 = vadd.f32 %v3717_v31, %v3711_v41  ;;  %v663_v17 = vmul.f32 1.442695, %v592_v48  ;;  %v4967_v2 = vld [vmem:[#allocation10_spill] sm:$0xff] }
 0x2cf   :  { %v3723_v63 = vpop.eup %2789  ;;  %2795 = vpow2.f32 %v667_v6  ;;  %1024 = vmatpush.xpose.msrb.mxu0 %v925_v46  ;;  %1225 = vst [vmem:[#allocation5 + $0xa0] sm:$0xff] %v925_v46  ;;  %1044 = vmatpush.xpose.msrb.mxu1 %v926_v39  ;;  %v659_v26 = vmul.f32 1.442695, %v590_v62 }
 0x2d0   :  { %2797 = vpow2.f32 %v725_v43  ;;  %1226 = vst [vmem:[#allocation5 + $0xa8] sm:$0xff] %v926_v39  ;;  %v837_v60 = vadd.f32 %v3723_v63, %v3721_v38  ;;  %v3735_v35 = vpop.eup %2791  ;;  %v723_v44 = vmul.f32 1.442695, %v622_v47  ;;  %v617_v43 = vsub.f32 %v4963_v30, %v3564_v18  ;;  %v4965_v47 = vld [vmem:[#allocation29_spill] sm:$0xff] }
 0x2d1   :  { %2799 = vpow2.f32 %v727_v7 }
 0x2d2   :  { %2801 = vpow2.f32 %v661_v19  ;;  %v713_v34 = vmul.f32 1.442695, %v617_v43  ;;  %v4969_v43 = vld [vmem:[#allocation30_spill] sm:$0xff] }
 0x2d4   :  { %v2794_v11 = vpop.eup %2793  ;;  %838 = vadd.xlane.f32.xlu1 %v837_v60  ;;  %793 = vadd.xlane.f32.xlu2 %v792_v61 }
 0x2d5   :  { %v3739_v37 = vpop.eup %2795  ;;  %v803_v59 = vpop.xlane.xlu2 %802  ;;  %v923_v52 = vmul.f32 %v2794_v11, %v3512_v56  ;;  %v924_v4 = vmul.f32 %v2794_v11, %v3514_v16  ;;  %v657_v56 = vmul.f32 1.442695, %v589_v1  ;;  %v4964_v16 = vld [vmem:[#allocation19_spill] sm:$0xff]  ;;  %v4966_v11 = vld [vmem:[#allocation28_spill] sm:$0xff] }
 0x2d6   :  { %v3743_v6 = vpop.eup %2797  ;;  %2803 = vrcp.f32 %v803_v59  ;;  %v618_v7 = vsub.f32 %v4964_v16, %v3564_v18  ;;  %v789_v46 = vadd.f32 %v3739_v37, %v3735_v35  ;;  %v587_v42 = vsub.f32 %v4967_v2, %v4966_v11  ;;  %v4968_v1 = vld [vmem:[#allocation11_spill] sm:$0xff]  ;;  %v542_v2 = vpop.xlane.xlu0 %541 }
 0x2d7   :  { %v3745_v36 = vpop.eup %2799  ;;  %2805 = vpow2.f32 %v663_v17  ;;  %1025 = vmatpush.xpose.msrb.mxu0 %v923_v52  ;;  %1223 = vst [vmem:[#allocation5 + $0x90] sm:$0xff] %v923_v52  ;;  %1045 = vmatpush.xpose.msrb.mxu1 %v924_v4  ;;  %v4970_v16 = vld [vmem:[#allocation31_spill] sm:$0xff] }
 0x2d8   :  { %2807 = vpow2.f32 %v721_v24  ;;  %1224 = vst [vmem:[#allocation5 + $0x98] sm:$0xff] %v924_v4  ;;  %v834_v14 = vadd.f32 %v3745_v36, %v3743_v6  ;;  %v3757_v39 = vpop.eup %2801  ;;  %v715_v19 = vmul.f32 1.442695, %v618_v7  ;;  %v588_v24 = vsub.f32 %v4968_v1, %v4966_v11 }
 0x2d9   :  { %2809 = vpow2.f32 %v723_v44  ;;  %v653_v4 = vmul.f32 1.442695, %v587_v42 }
 0x2da   :  { %2811 = vpow2.f32 %v657_v56  ;;  %v655_v62 = vmul.f32 1.442695, %v588_v24  ;;  %v4974_v24 = vld [vmem:[#allocation32_spill] sm:$0xff] }
 0x2dc   :  { %v2804_v48 = vpop.eup %2803  ;;  %835 = vadd.xlane.f32.xlu1 %v834_v14  ;;  %790 = vadd.xlane.f32.xlu2 %v789_v46 }
 0x2dd   :  { %v3759_v29 = vpop.eup %2805  ;;  %v800_v20 = vpop.xlane.xlu2 %799  ;;  %v921_v18 = vmul.f32 %v2804_v48, %v3524_v10  ;;  %v922_v60 = vmul.f32 %v2804_v48, %v4965_v47  ;;  %v4972_v48 = vld [vmem:[#allocation8_spill] sm:$0xff] }
 0x2de   :  { %v3763_v61 = vpop.eup %2807  ;;  %2813 = vrcp.f32 %v800_v20  ;;  %v786_v44 = vadd.f32 %v3759_v29, %v3757_v39 }
 0x2df   :  { %v3765_v17 = vpop.eup %2809  ;;  %2815 = vpow2.f32 %v659_v26  ;;  %1026 = vmatpush.xpose.msrb.mxu0 %v921_v18  ;;  %1221 = vst [vmem:[#allocation5 + $0x80] sm:$0xff] %v921_v18  ;;  %1046 = vmatpush.xpose.msrb.mxu1 %v922_v60  ;;  %v4971_v26 = vld [vmem:[#allocation17_spill] sm:$0xff] }
 0x2e0   :  { %2817 = vpow2.f32 %v713_v34  ;;  %1222 = vst [vmem:[#allocation5 + $0x88] sm:$0xff] %v922_v60  ;;  %v831_v10 = vadd.f32 %v3765_v17, %v3763_v61  ;;  %v3775_v59 = vpop.eup %2811  ;;  %v585_v34 = vsub.f32 %v4972_v48, %v4971_v26 }
 0x2e1   :  { %2819 = vpow2.f32 %v715_v19  ;;  %v4973_v19 = vld [vmem:[#allocation9_spill] sm:$0xff] }
 0x2e2   :  { %v586_v20 = vsub.f32 %v4973_v19, %v4971_v26  ;;  %v649_v11 = vmul.f32 1.442695, %v585_v34 }
 0x2e4   :  { %v2814_v52 = vpop.eup %2813  ;;  %832 = vadd.xlane.f32.xlu1 %v831_v10  ;;  %787 = vadd.xlane.f32.xlu2 %v786_v44  ;;  %v651_v42 = vmul.f32 1.442695, %v586_v20 }
 0x2e5   :  { %v3777_v9 = vpop.eup %2815  ;;  %v797_v30 = vpop.xlane.xlu2 %796  ;;  %v919_v56 = vmul.f32 %v2814_v52, %v4969_v43  ;;  %v920_v7 = vmul.f32 %v2814_v52, %v4970_v16 }
 0x2e6   :  { %v3781_v14 = vpop.eup %2817  ;;  %2821 = vrcp.f32 %v797_v30  ;;  %v783_v47 = vadd.f32 %v3777_v9, %v3775_v59  ;;  %v4976_v30 = vld [vmem:[#allocation22_spill] sm:$0xff] }
 0x2e7   :  { %v3783_v46 = vpop.eup %2819  ;;  %1027 = vmatpush.xpose.msrb.mxu0 %v919_v56  ;;  %1219 = vst [vmem:[#allocation5 + $0x70] sm:$0xff] %v919_v56  ;;  %1047 = vmatpush.xpose.msrb.mxu1 %v920_v7  ;;  %2823 = vpow2.f32 %v653_v4  ;;  %v4975_v4 = vld [vmem:[#allocation21_spill] sm:$0xff]  ;;  %v620_v43 = vsub.f32 %v4976_v30, %v542_v2 }
 0x2e8   :  { %1220 = vst [vmem:[#allocation5 + $0x78] sm:$0xff] %v920_v7  ;;  %2825 = vpow2.f32 %v655_v62  ;;  %v825_v18 = vadd.f32 %v3783_v46, %v3781_v14  ;;  %v619_v62 = vsub.f32 %v4975_v4, %v542_v2 }
 0x2e9   :  { %2827 = vpow2.f32 %v649_v11  ;;  %v719_v16 = vmul.f32 1.442695, %v620_v43 }
 0x2ea   :  { %2829 = vpow2.f32 %v651_v42 }
 0x2ec   :  { %v2822_v60 = vpop.eup %2821  ;;  %826 = vadd.xlane.f32.xlu1 %v825_v18  ;;  %784 = vadd.xlane.f32.xlu2 %v783_v47 }
 0x2ed   :  { %v917_v1 = vmul.f32 %v2822_v60, %v3544_v51  ;;  %v918_v10 = vmul.f32 %v2822_v60, %v4974_v24  ;;  %v3795_v44 = vpop.eup %2823  ;;  %v717_v51 = vmul.f32 1.442695, %v619_v62 }
 0x2ee   :  { %v3797_v52 = vpop.eup %2825 }
 0x2ef   :  { %1028 = vmatpush.xpose.msrb.mxu0 %v917_v1  ;;  %1217 = vst [vmem:[#allocation5 + $0x60] sm:$0xff] %v917_v1  ;;  %1048 = vmatpush.xpose.msrb.mxu1 %v918_v10  ;;  %v780_v56 = vadd.f32 %v3797_v52, %v3795_v44  ;;  %v3803_v7 = vpop.eup %2827  ;;  %2831 = vpow2.f32 %v717_v51 }
 0x2f0   :  { %1218 = vst [vmem:[#allocation5 + $0x68] sm:$0xff] %v918_v10  ;;  %v3805_v26 = vpop.eup %2829 }
 0x2f1   :  { %v777_v34 = vadd.f32 %v3805_v26, %v3803_v7 }
 0x2f4   :  { %781 = vadd.xlane.f32.xlu2 %v780_v56 }
 0x2f5   :  { %v3809_v19 = vpop.eup %2831 }
 0x2f7   :  { %v851_v48 = vpop.xlane.xlu1 %850 }
 0x2f8   :  { %2833 = vrcp.f32 %v851_v48 }
 0x2f9   :  { %2835 = vpow2.f32 %v719_v16 }
 0x2fc   :  { %778 = vadd.xlane.f32.xlu2 %v777_v34 }
 0x2fe   :  { %v2834_v20 = vpop.eup %2833 }
 0x2ff   :  { %v3811_v18 = vpop.eup %2835  ;;  %v854_v47 = vpop.xlane.xlu1 %853  ;;  %v3814_v60 = vmul.f32 %v2834_v20, %v3556_v53  ;;  %v3817_v11 = vmul.f32 %v2834_v20, %v3558_v5 }
 0x300   :  { %2837 = vrcp.f32 %v854_v47  ;;  %v828_v2 = vadd.f32 %v3811_v18, %v3809_v19 }
 0x301   :  { %1253 = vst [vmem:[#allocation5 + $0x180] sm:$0xff] %v3814_v60 }
 0x302   :  { %1254 = vst [vmem:[#allocation5 + $0x188] sm:$0xff] %v3817_v11 }
 0x304   :  { %829 = vadd.xlane.f32.xlu2 %v828_v2 }
 0x306   :  { %v2838_v42 = vpop.eup %2837 }
 0x307   :  { %v857_v1 = vpop.xlane.xlu1 %856  ;;  %v3824_v24 = vmul.f32 %v2838_v42, %v3566_v40  ;;  %v3827_v53 = vmul.f32 %v2838_v42, %v3568_v55  ;;  %v3840_v40 = vld [vmem:[%s4859_s0 + $0x8] sm:$0x7] }
 0x308   :  { %2839 = vrcp.f32 %v857_v1  ;;  %2585 = vmatmul.msk.f32.vlgmr.msra.gmra.mxu0 %vm42_vm1, %v3840_v40  ;;  %2587 = vmatmul.msk.f32.vlgmr.msra.gmra.mxu1 %vm42_vm1, %v3840_v40 }
 0x309   :  { %1255 = vst [vmem:[#allocation5 + $0x190] sm:$0xff] %v3824_v24 }
 0x30a   :  { %1256 = vst [vmem:[#allocation5 + $0x198] sm:$0xff] %v3827_v53 }
 0x30e   :  { %v2840_v5 = vpop.eup %2839 }
 0x30f   :  { %v860_v10 = vpop.xlane.xlu1 %859  ;;  %v3832_v4 = vmul.f32 %v2840_v5, %v3576_v45  ;;  %v3835_v62 = vmul.f32 %v2840_v5, %v3578_v49  ;;  %v4977_v49 = vld [vmem:[#allocation33_spill] sm:$0xff] }
 0x310   :  { %2841 = vrcp.f32 %v860_v10 }
 0x311   :  { %1257 = vst [vmem:[#allocation5 + $0x1a0] sm:$0xff] %v3832_v4 }
 0x312   :  { %1258 = vst [vmem:[#allocation5 + $0x1a8] sm:$0xff] %v3835_v62 }
 0x316   :  { %v2842_v55 = vpop.eup %2841 }
 0x317   :  { %v3849_v45 = vmul.f32 %v2842_v55, %v3585_v33  ;;  %v3852_v30 = vmul.f32 %v2842_v55, %v4977_v49 }
 0x319   :  { %1259 = vst [vmem:[#allocation5 + $0x1b0] sm:$0xff] %v3849_v45 }
 0x31a   :  { %1260 = vst [vmem:[#allocation5 + $0x1b8] sm:$0xff] %v3852_v30 }
 0x31f   :  { %v863_v43 = vpop.xlane.xlu1 %862 }
 0x320   :  { %2843 = vrcp.f32 %v863_v43 }
 0x326   :  { %v2844_v56 = vpop.eup %2843 }
 0x327   :  { %v866_v51 = vpop.xlane.xlu1 %865  ;;  %v3857_v16 = vmul.f32 %v2844_v56, %v3629_v54  ;;  %v3860_v48 = vmul.f32 %v2844_v56, %v3631_v8 }
 0x328   :  { %2845 = vrcp.f32 %v866_v51 }
 0x329   :  { %1261 = vst [vmem:[#allocation5 + $0x1c0] sm:$0xff] %v3857_v16 }
 0x32a   :  { %1262 = vst [vmem:[#allocation5 + $0x1c8] sm:$0xff] %v3860_v48 }
 0x32e   :  { %v2846_v33 = vpop.eup %2845 }
 0x32f   :  { %v848_v34 = vpop.xlane.xlu1 %847  ;;  %v869_v20 = vpop.xlane.xlu2 %868  ;;  %v3865_v47 = vmul.f32 %v2846_v33, %v3641_v25  ;;  %v3868_v2 = vmul.f32 %v2846_v33, %v3645_v50 }
 0x330   :  { %2847 = vrcp.f32 %v848_v34 }
 0x331   :  { %2849 = vrcp.f32 %v869_v20  ;;  %1263 = vst [vmem:[#allocation5 + $0x1d0] sm:$0xff] %v3865_v47 }
 0x332   :  { %1264 = vst [vmem:[#allocation5 + $0x1d8] sm:$0xff] %v3868_v2 }
 0x336   :  { %v2848_v54 = vpop.eup %2847 }
 0x337   :  { %v2850_v8 = vpop.eup %2849  ;;  %v845_v42 = vpop.xlane.xlu1 %844  ;;  %v3873_v1 = vmul.f32 %v2848_v54, %v3651_v57  ;;  %v3882_v50 = vmul.f32 %v2848_v54, %v3653_v22 }
 0x338   :  { %2851 = vrcp.f32 %v845_v42  ;;  %v3876_v5 = vmul.f32 %v2850_v8, %v3657_v58  ;;  %v3879_v25 = vmul.f32 %v2850_v8, %v3661_v32 }
 0x339   :  { %1251 = vst [vmem:[#allocation5 + $0x170] sm:$0xff] %v3873_v1 }
 0x33a   :  { %1265 = vst [vmem:[#allocation5 + $0x1e0] sm:$0xff] %v3876_v5 }
 0x33b   :  { %1266 = vst [vmem:[#allocation5 + $0x1e8] sm:$0xff] %v3879_v25 }
 0x33c   :  { %1252 = vst [vmem:[#allocation5 + $0x178] sm:$0xff] %v3882_v50 }
 0x33e   :  { %v2852_v57 = vpop.eup %2851 }
 0x33f   :  { %v842_v10 = vpop.xlane.xlu1 %841  ;;  %v872_v55 = vpop.xlane.xlu2 %871  ;;  %v3889_v58 = vmul.f32 %v2852_v57, %v3673_v27  ;;  %v3892_v32 = vmul.f32 %v2852_v57, %v3677_v12 }
 0x340   :  { %2853 = vrcp.f32 %v842_v10 }
 0x341   :  { %2855 = vrcp.f32 %v872_v55  ;;  %1249 = vst [vmem:[#allocation5 + $0x160] sm:$0xff] %v3889_v58 }
 0x342   :  { %1250 = vst [vmem:[#allocation5 + $0x168] sm:$0xff] %v3892_v32 }
 0x346   :  { %v2854_v22 = vpop.eup %2853 }
 0x347   :  { %v2856_v49 = vpop.eup %2855  ;;  %v839_v43 = vpop.xlane.xlu1 %838  ;;  %v3897_v51 = vmul.f32 %v2854_v22, %v3691_v0  ;;  %v3906_v33 = vmul.f32 %v2854_v22, %v3693_v15 }
 0x348   :  { %v794_v56 = vpop.xlane.xlu2 %793  ;;  %2857 = vrcp.f32 %v839_v43  ;;  %v3900_v27 = vmul.f32 %v2856_v49, %v3699_v28  ;;  %v3903_v12 = vmul.f32 %v2856_v49, %v3703_v23 }
 0x349   :  { %2859 = vrcp.f32 %v794_v56  ;;  %1247 = vst [vmem:[#allocation5 + $0x150] sm:$0xff] %v3897_v51 }
 0x34a   :  { %1267 = vst [vmem:[#allocation5 + $0x1f0] sm:$0xff] %v3900_v27 }
 0x34b   :  { %1268 = vst [vmem:[#allocation5 + $0x1f8] sm:$0xff] %v3903_v12 }
 0x34c   :  { %1248 = vst [vmem:[#allocation5 + $0x158] sm:$0xff] %v3906_v33 }
 0x34e   :  { %v2858_v0 = vpop.eup %2857 }
 0x34f   :  { %v2860_v34 = vpop.eup %2859  ;;  %v836_v20 = vpop.xlane.xlu1 %835  ;;  %v3913_v54 = vmul.f32 %v2858_v0, %v3721_v38  ;;  %v3918_v8 = vmul.f32 %v2858_v0, %v3723_v63 }
 0x350   :  { %v791_v28 = vpop.xlane.xlu2 %790  ;;  %2861 = vrcp.f32 %v836_v20  ;;  %v915_v15 = vmul.f32 %v2860_v34, %v3711_v41  ;;  %v916_v23 = vmul.f32 %v2860_v34, %v3717_v31 }
 0x351   :  { %2863 = vrcp.f32 %v791_v28  ;;  %1245 = vst [vmem:[#allocation5 + $0x140] sm:$0xff] %v3913_v54 }
 0x352   :  { %1029 = vmatpush.xpose.msrb.mxu0 %v915_v15  ;;  %1215 = vst [vmem:[#allocation5 + $0x50] sm:$0xff] %v915_v15  ;;  %1049 = vmatpush.xpose.msrb.mxu1 %v916_v23 }
 0x353   :  { %1216 = vst [vmem:[#allocation5 + $0x58] sm:$0xff] %v916_v23 }
 0x354   :  { %1246 = vst [vmem:[#allocation5 + $0x148] sm:$0xff] %v3918_v8 }
 0x356   :  { %v2862_v42 = vpop.eup %2861 }
 0x357   :  { %v2864_v38 = vpop.eup %2863  ;;  %v833_v57 = vpop.xlane.xlu1 %832  ;;  %v3923_v41 = vmul.f32 %v2862_v42, %v3743_v6  ;;  %v3928_v55 = vmul.f32 %v2862_v42, %v3745_v36 }
 0x358   :  { %v788_v10 = vpop.xlane.xlu2 %787  ;;  %2865 = vrcp.f32 %v833_v57  ;;  %v913_v31 = vmul.f32 %v2864_v38, %v3735_v35  ;;  %v914_v63 = vmul.f32 %v2864_v38, %v3739_v37 }
 0x359   :  { %2867 = vrcp.f32 %v788_v10  ;;  %1243 = vst [vmem:[#allocation5 + $0x130] sm:$0xff] %v3923_v41 }
 0x35a   :  { %1030 = vmatpush.xpose.msrb.mxu0 %v913_v31  ;;  %1213 = vst [vmem:[#allocation5 + $0x40] sm:$0xff] %v913_v31  ;;  %1050 = vmatpush.xpose.msrb.mxu1 %v914_v63 }
 0x35b   :  { %1214 = vst [vmem:[#allocation5 + $0x48] sm:$0xff] %v914_v63 }
 0x35c   :  { %1244 = vst [vmem:[#allocation5 + $0x138] sm:$0xff] %v3928_v55 }
 0x35e   :  { %v2866_v22 = vpop.eup %2865 }
 0x35f   :  { %v2868_v6 = vpop.eup %2867  ;;  %v827_v49 = vpop.xlane.xlu1 %826  ;;  %v3933_v35 = vmul.f32 %v2866_v22, %v3763_v61  ;;  %v3938_v56 = vmul.f32 %v2866_v22, %v3765_v17 }
 0x360   :  { %v785_v43 = vpop.xlane.xlu2 %784  ;;  %2869 = vrcp.f32 %v827_v49  ;;  %v911_v37 = vmul.f32 %v2868_v6, %v3757_v39  ;;  %v912_v36 = vmul.f32 %v2868_v6, %v3759_v29 }
 0x361   :  { %2871 = vrcp.f32 %v785_v43  ;;  %1241 = vst [vmem:[#allocation5 + $0x120] sm:$0xff] %v3933_v35 }
 0x362   :  { %1031 = vmatpush.xpose.msrb.mxu0 %v911_v37  ;;  %1211 = vst [vmem:[#allocation5 + $0x30] sm:$0xff] %v911_v37  ;;  %1051 = vmatpush.xpose.msrb.mxu1 %v912_v36 }
 0x363   :  { %1212 = vst [vmem:[#allocation5 + $0x38] sm:$0xff] %v912_v36 }
 0x364   :  { %1242 = vst [vmem:[#allocation5 + $0x128] sm:$0xff] %v3938_v56 }
 0x366   :  { %v2870_v0 = vpop.eup %2869 }
 0x367   :  { %v2872_v61 = vpop.eup %2871  ;;  %v3943_v20 = vmul.f32 %v2870_v0, %v3781_v14  ;;  %v3948_v17 = vmul.f32 %v2870_v0, %v3783_v46 }
 0x368   :  { %v782_v34 = vpop.xlane.xlu2 %781  ;;  %v909_v39 = vmul.f32 %v2872_v61, %v3775_v59  ;;  %v910_v29 = vmul.f32 %v2872_v61, %v3777_v9 }
 0x369   :  { %2873 = vrcp.f32 %v782_v34  ;;  %1237 = vst [vmem:[#allocation5 + $0x100] sm:$0xff] %v3943_v20 }
 0x36a   :  { %1032 = vmatpush.xpose.msrb.mxu0 %v909_v39  ;;  %1209 = vst [vmem:[#allocation5 + $0x20] sm:$0xff] %v909_v39  ;;  %1052 = vmatpush.xpose.msrb.mxu1 %v910_v29 }
 0x36b   :  { %1210 = vst [vmem:[#allocation5 + $0x28] sm:$0xff] %v910_v29 }
 0x36c   :  { %1238 = vst [vmem:[#allocation5 + $0x108] sm:$0xff] %v3948_v17 }
 0x36f   :  { %v2874_v28 = vpop.eup %2873 }
 0x370   :  { %v779_v15 = vpop.xlane.xlu2 %778  ;;  %v907_v14 = vmul.f32 %v2874_v28, %v3795_v44  ;;  %v908_v23 = vmul.f32 %v2874_v28, %v3797_v52 }
 0x371   :  { %2875 = vrcp.f32 %v779_v15 }
 0x372   :  { %1033 = vmatpush.xpose.msrb.mxu0 %v907_v14  ;;  %1207 = vst [vmem:[#allocation5 + $0x10] sm:$0xff] %v907_v14  ;;  %1053 = vmatpush.xpose.msrb.mxu1 %v908_v23 }
 0x373   :  { %1208 = vst [vmem:[#allocation5 + $0x18] sm:$0xff] %v908_v23 }
 0x377   :  { %v2876_v59 = vpop.eup %2875 }
 0x378   :  { %v830_v9 = vpop.xlane.xlu2 %829  ;;  %v905_v46 = vmul.f32 %v2876_v59, %v3803_v7  ;;  %v906_v42 = vmul.f32 %v2876_v59, %v3805_v26 }
 0x379   :  { %2877 = vrcp.f32 %v830_v9 }
 0x37a   :  { %1034 = vmatpush.xpose.msrb.mxu0 %v905_v46  ;;  %1205 = vst [vmem:[#allocation5] sm:$0xff] %v905_v46  ;;  %1054 = vmatpush.xpose.msrb.mxu1 %v906_v42 }
 0x37b   :  { %1206 = vst [vmem:[#allocation5 + $0x8] sm:$0xff] %v906_v42 }
 0x37e   :  { %1059 = vmatpush.xpose.msra.mxu0 %v3900_v27  ;;  %1079 = vmatpush.xpose.msra.mxu1 %v3903_v12 }
 0x37f   :  { %v2878_v44 = vpop.eup %2877 }
 0x380   :  { %v939_v52 = vmul.f32 %v2878_v44, %v3809_v19  ;;  %v940_v7 = vmul.f32 %v2878_v44, %v3811_v18  ;;  %v1275_v18 = vld.sshfl [vmem:[#allocation1] sm:$0xff pattern:$0x75316420] }
 0x382   :  { %1060 = vmatpush.xpose.msra.mxu0 %v3876_v5  ;;  %1080 = vmatpush.xpose.msra.mxu1 %v3879_v25  ;;  %1239 = vst [vmem:[#allocation5 + $0x110] sm:$0xff] %v939_v52 }
 0x383   :  { %1240 = vst [vmem:[#allocation5 + $0x118] sm:$0xff] %v940_v7 }
 0x385   :  { %v996_v26 = vpop.f32.mrf.mxu0  ;;  %v1016_v19 = vpop.f32.mrf.mxu1 }
 0x386   :  { %1061 = vmatpush.xpose.msra.mxu0 %v3865_v47  ;;  %1081 = vmatpush.xpose.msra.mxu1 %v3868_v2 }
 0x387   :  { %1035 = vmatmul.f32.vlgmr.msrb.gmra.mxu0 %v996_v26  ;;  %1055 = vmatmul.f32.vlgmr.msrb.gmra.mxu1 %v1016_v19 }
 0x38a   :  { %1062 = vmatpush.xpose.msra.mxu0 %v3857_v16  ;;  %1082 = vmatpush.xpose.msra.mxu1 %v3860_v48 }
 0x38e   :  { %1063 = vmatpush.xpose.msra.mxu0 %v3849_v45  ;;  %1083 = vmatpush.xpose.msra.mxu1 %v3852_v30  ;;  %v35_v45 = vld [vmem:[%s4859_s0 + $0x10] sm:$0x7]  ;;  %v3071_v30 = vld [vmem:[%s4859_s0] sm:$0xf] }
 0x392   :  { %1064 = vmatpush.xpose.msra.mxu0 %v3832_v4  ;;  %1084 = vmatpush.xpose.msra.mxu1 %v3835_v62 }
 0x396   :  { %1065 = vmatpush.xpose.msra.mxu0 %v3824_v24  ;;  %1085 = vmatpush.xpose.msra.mxu1 %v3827_v53 }
 0x39a   :  { %1066 = vmatpush.xpose.msra.mxu0 %v3814_v60  ;;  %1086 = vmatpush.xpose.msra.mxu1 %v3817_v11  ;;  %v1276_v60 = vld.sshfl [vmem:[#allocation1 + $0x8] sm:$0xff pattern:$0x75316420]  ;;  %v3988_v11 = vld [vmem:[#allocation2 + $0x8] sm:$0xff] }
 0x39b   :  { %1322 = vst [vmem:[#allocation1] ss:$2 sm:$0xff] %v3988_v11 }
 0x39e   :  { %1067 = vmatpush.xpose.msra.mxu0 %v3873_v1  ;;  %1087 = vmatpush.xpose.msra.mxu1 %v3882_v50 }
 0x3a2   :  { %1068 = vmatpush.xpose.msra.mxu0 %v3889_v58  ;;  %1088 = vmatpush.xpose.msra.mxu1 %v3892_v32  ;;  %v1323_v24 = vld.sshfl [vmem:[#allocation1] sm:$0xff pattern:$0x75316420]  ;;  %v1324_v16 = vld.sshfl [vmem:[#allocation1 + $0x8] sm:$0xff pattern:$0x75316420] }
 0x3a3   :  { %1327 = vxpose.xlu2.b32.start.end [1/1] (short) %v1323_v24, 128  ;;  %1359 = vxpose.xlu1.b32.start.end [1/1] (short) %v1324_v16, 128  ;;  %2199 = vst [vmem:[#allocation1] ss:$2 sm:$0xff] %v3594_v13 }
 0x3a6   :  { %1069 = vmatpush.xpose.msra.mxu0 %v3897_v51  ;;  %1089 = vmatpush.xpose.msra.mxu1 %v3906_v33 }
 0x3aa   :  { %1070 = vmatpush.xpose.msra.mxu0 %v3913_v54  ;;  %1090 = vmatpush.xpose.msra.mxu1 %v3918_v8 }
 0x3ae   :  { %1071 = vmatpush.xpose.msra.mxu0 %v3923_v41  ;;  %1091 = vmatpush.xpose.msra.mxu1 %v3928_v55 }
 0x3b2   :  { %1072 = vmatpush.xpose.msra.mxu0 %v3933_v35  ;;  %1092 = vmatpush.xpose.msra.mxu1 %v3938_v56 }
 0x3b6   :  { %1073 = vmatpush.xpose.msra.mxu0 %v939_v52  ;;  %1093 = vmatpush.xpose.msra.mxu1 %v940_v7 }
 0x3ba   :  { %1074 = vmatpush.xpose.msra.mxu0 %v3943_v20  ;;  %1094 = vmatpush.xpose.msra.mxu1 %v3948_v17 }
 0x3bd   :  { %1075 = vmatmul.f32.vlgmr.msra.gmra.mxu0 %v996_v26  ;;  %1095 = vmatmul.f32.vlgmr.msra.gmra.mxu1 %v1016_v19 }
 0x404   :  { %v1036_v53 = vpop.f32.mrf.mxu0  ;;  %v1056_v4 = vpop.f32.mrf.mxu1 }
 0x405   :  { %v1057_v62 = vadd.f32 %v1056_v4, %v1036_v53 }
 0x407   :  { %2588 = vmatpush.msk.msrb.mxu0 %vm1103_vm2, %v1057_v62 }
 0x408   :  { %2589 = vmatmul.msk.f32.vlgmr.msrb.gmra.mxu0 %vm1099_vm3, %v35_v45 }
 0x409   :  { %2592 = vmatpush.msk.msra.mxu0 %vm46_vm0, %v3601_v21 }
 0x40b   :  { %2597 = vmatpush.msk.msrb.mxu0 %vm46_vm0, %v1275_v18 }
 0x410   :  { %2593 = vmatmul.msk.f32.vlgmr.msra.gmra.mxu0 %vm42_vm1, %v35_v45 }
 0x418   :  { %2598 = vmatmul.msk.f32.vlgmr.msrb.gmra.mxu0 %vm42_vm1, %v3071_v30 }
 0x43a   :  { %v1076_v48 = vpop.f32.mrf.mxu0  ;;  %v1096_v47 = vpop.f32.mrf.mxu1 }
 0x43b   :  { %v1097_v2 = vadd.f32 %v1096_v47, %v1076_v48 }
 0x43c   :  { %v1343_v13 = vpop.trf.xlu2 }
 0x43d   :  { %2590 = vmatpush.msk.msrb.mxu1 %vm1103_vm2, %v1097_v2 }
 0x43e   :  { %2591 = vmatmul.msk.f32.vlgmr.msrb.gmra.mxu1 %vm1099_vm3, %v35_v45 }
 0x43f   :  { %2594 = vmatpush.msk.msra.mxu1 %vm46_vm0, %v3603_v3 }
 0x441   :  { %2599 = vmatpush.msk.msrb.mxu1 %vm46_vm0, %v1276_v60 }
 0x444   :  { %v1344_v25 = vpop.trf.xlu2 }
 0x446   :  { %2595 = vmatmul.msk.f32.vlgmr.msra.gmra.mxu1 %vm42_vm1, %v35_v45 }
 0x447   :  { %v1375_v37 = vpop.trf.xlu1 }
 0x44c   :  { %v1345_v58 = vpop.trf.xlu2 }
 0x44e   :  { %2600 = vmatmul.msk.f32.vlgmr.msrb.gmra.mxu1 %vm42_vm1, %v3071_v30 }
 0x44f   :  { %v1376_v56 = vpop.trf.xlu1 }
 0x454   :  { %v1346_v51 = vpop.trf.xlu2 }
 0x457   :  { %v1377_v61 = vpop.trf.xlu1 }
 0x45c   :  { %v1347_v8 = vpop.trf.xlu2 }
 0x45f   :  { %v1378_v20 = vpop.trf.xlu1 }
 0x464   :  { %v1348_v38 = vpop.trf.xlu2 }
 0x467   :  { %v1379_v17 = vpop.trf.xlu1 }
 0x46c   :  { %v1349_v57 = vpop.trf.xlu2 }
 0x46f   :  { %v1380_v59 = vpop.trf.xlu1 }
 0x474   :  { %v1350_v10 = vpop.trf.xlu2 }
 0x477   :  { %v1381_v42 = vpop.trf.xlu1 }
 0x47c   :  { %v1351_v41 = vpop.trf.xlu2 }
 0x47f   :  { %v1382_v7 = vpop.trf.xlu1 }
 0x484   :  { %v1352_v31 = vpop.trf.xlu2 }
 0x485   :  { %v1127_v21 = vpop.f32.mrf.mxu0 }
 0x487   :  { %v1383_v18 = vpop.trf.xlu1 }
 0x48c   :  { %v1353_v63 = vpop.trf.xlu2 }
 0x48d   :  { %v1176_v1 = vpop.f32.mrf.mxu0 }
 0x48e   :  { %v1177_v27 = vadd.f32 %v1176_v1, %v1127_v21 }
 0x48f   :  { %v1384_v53 = vpop.trf.xlu1 }
 0x494   :  { %v1354_v55 = vpop.trf.xlu2 }
 0x495   :  { %v1298_v5 = vpop.f32.mrf.mxu0 }
 0x496   :  { %2601 = vmatpush.msk.msra.mxu0 %vm46_vm0, %v1298_v5 }
 0x497   :  { %2602 = vmatmul.msk.f32.vlgmr.msra.gmra.mxu0 %vm42_vm1, %v1343_v13  ;;  %v1385_v45 = vpop.trf.xlu1 }
 0x49c   :  { %v1355_v22 = vpop.trf.xlu2 }
 0x49f   :  { %2603 = vmatmul.msk.f32.gmra.mxu0 %vm42_vm1, %v1344_v25  ;;  %v1386_v48 = vpop.trf.xlu1 }
 0x4a4   :  { %v1356_v6 = vpop.trf.xlu2 }
 0x4a7   :  { %2604 = vmatmul.msk.f32.gmra.mxu0 %vm42_vm1, %v1345_v58  ;;  %v1387_v21 = vpop.trf.xlu1 }
 0x4ac   :  { %v1357_v49 = vpop.trf.xlu2 }
 0x4af   :  { %2605 = vmatmul.msk.f32.gmra.mxu0 %vm42_vm1, %v1346_v51  ;;  %v1388_v5 = vpop.trf.xlu1 }
 0x4b4   :  { %v1358_v43 = vpop.trf.xlu2 }
 0x4b7   :  { %2606 = vmatmul.msk.f32.gmra.mxu0 %vm42_vm1, %v1347_v8 }
 0x4bb   :  { %v1147_v50 = vpop.f32.mrf.mxu1 }
 0x4bf   :  { %2607 = vmatmul.msk.f32.gmra.mxu0 %vm42_vm1, %v1348_v38 }
 0x4c3   :  { %v1196_v3 = vpop.f32.mrf.mxu1 }
 0x4c4   :  { %v1197_v32 = vadd.f32 %v1196_v3, %v1147_v50  ;;  %v1389_v50 = vpop.trf.xlu1 }
 0x4c6   :  { %v1201_v12 = vrot.slane %v1197_v32, 4 }
 0x4c7   :  { %2608 = vmatmul.msk.f32.gmra.mxu0 %vm42_vm1, %v1349_v57 }
 0x4c8   :  { %v1202_v33 = vsel %vm46_vm0, %v1177_v27, %v1201_v12 }
 0x4c9   :  { %1204 = vst [vmem:[%s4862_s3] sm:$0x77] %v1202_v33 }
 0x4cb   :  { %v1318_v54 = vpop.f32.mrf.mxu1 }
 0x4cc   :  { %2634 = vmatpush.msk.msra.mxu1 %vm46_vm0, %v1318_v54  ;;  %v1390_v32 = vpop.trf.xlu1 }
 0x4cd   :  { %2635 = vmatmul.msk.f32.vlgmr.msra.gmra.mxu1 %vm42_vm1, %v1343_v13 }
 0x4cf   :  { %2609 = vmatmul.msk.f32.gmra.mxu0 %vm42_vm1, %v1350_v10 }
 0x4d5   :  { %2636 = vmatmul.msk.f32.gmra.mxu1 %vm42_vm1, %v1344_v25 }
 0x4d7   :  { %2610 = vmatmul.msk.f32.gmra.mxu0 %vm42_vm1, %v1351_v41 }
 0x4dd   :  { %2637 = vmatmul.msk.f32.gmra.mxu1 %vm42_vm1, %v1345_v58 }
 0x4df   :  { %2611 = vmatmul.msk.f32.gmra.mxu0 %vm42_vm1, %v1352_v31 }
 0x4e5   :  { %2638 = vmatmul.msk.f32.gmra.mxu1 %vm42_vm1, %v1346_v51 }
 0x4e7   :  { %2612 = vmatmul.msk.f32.gmra.mxu0 %vm42_vm1, %v1353_v63 }
 0x4ed   :  { %2639 = vmatmul.msk.f32.gmra.mxu1 %vm42_vm1, %v1347_v8 }
 0x4ef   :  { %2613 = vmatmul.msk.f32.gmra.mxu0 %vm42_vm1, %v1354_v55 }
 0x4f5   :  { %2640 = vmatmul.msk.f32.gmra.mxu1 %vm42_vm1, %v1348_v38 }
 0x4f7   :  { %2614 = vmatmul.msk.f32.gmra.mxu0 %vm42_vm1, %v1355_v22 }
 0x4fd   :  { %2641 = vmatmul.msk.f32.gmra.mxu1 %vm42_vm1, %v1349_v57 }
 0x4ff   :  { %2615 = vmatmul.msk.f32.gmra.mxu0 %vm42_vm1, %v1356_v6 }
 0x505   :  { %2642 = vmatmul.msk.f32.gmra.mxu1 %vm42_vm1, %v1350_v10 }
 0x507   :  { %2616 = vmatmul.msk.f32.gmra.mxu0 %vm42_vm1, %v1357_v49 }
 0x50d   :  { %2643 = vmatmul.msk.f32.gmra.mxu1 %vm42_vm1, %v1351_v41 }
 0x50f   :  { %2617 = vmatmul.msk.f32.gmra.mxu0 %vm42_vm1, %v1358_v43 }
 0x514   :  { %v4046_v35 = vpop.f32.mrf.mxu0 }
 0x515   :  { %2644 = vmatmul.msk.f32.gmra.mxu1 %vm42_vm1, %v1352_v31  ;;  %4978 = vst [vmem:[#allocation16_spill] sm:$0xff] %v4046_v35 }
 0x517   :  { %2618 = vmatmul.msk.f32.gmra.mxu0 %vm42_vm1, %v1375_v37 }
 0x51c   :  { %v4050_v36 = vpop.f32.mrf.mxu0 }
 0x51d   :  { %2645 = vmatmul.msk.f32.gmra.mxu1 %vm42_vm1, %v1353_v63 }
 0x51f   :  { %2619 = vmatmul.msk.f32.gmra.mxu0 %vm42_vm1, %v1376_v56 }
 0x524   :  { %v4054_v0 = vpop.f32.mrf.mxu0 }
 0x525   :  { %2646 = vmatmul.msk.f32.gmra.mxu1 %vm42_vm1, %v1354_v55 }
 0x527   :  { %2620 = vmatmul.msk.f32.gmra.mxu0 %vm42_vm1, %v1377_v61 }
 0x52c   :  { %v4058_v34 = vpop.f32.mrf.mxu0 }
 0x52d   :  { %2647 = vmatmul.msk.f32.gmra.mxu1 %vm42_vm1, %v1355_v22  ;;  %4979 = vst [vmem:[#allocation26_spill] sm:$0xff] %v4058_v34 }
 0x52f   :  { %2621 = vmatmul.msk.f32.gmra.mxu0 %vm42_vm1, %v1378_v20 }
 0x534   :  { %v4064_v29 = vpop.f32.mrf.mxu0 }
 0x535   :  { %2648 = vmatmul.msk.f32.gmra.mxu1 %vm42_vm1, %v1356_v6 }
 0x537   :  { %2622 = vmatmul.msk.f32.gmra.mxu0 %vm42_vm1, %v1379_v17 }
 0x53c   :  { %v4070_v15 = vpop.f32.mrf.mxu0 }
 0x53d   :  { %2649 = vmatmul.msk.f32.gmra.mxu1 %vm42_vm1, %v1357_v49 }
 0x53f   :  { %2623 = vmatmul.msk.f32.gmra.mxu0 %vm42_vm1, %v1380_v59 }
 0x544   :  { %v4075_v23 = vpop.f32.mrf.mxu0 }
 0x545   :  { %2650 = vmatmul.msk.f32.gmra.mxu1 %vm42_vm1, %v1358_v43 }
 0x547   :  { %2624 = vmatmul.msk.f32.gmra.mxu0 %vm42_vm1, %v1381_v42 }
 0x54a   :  { %v4062_v39 = vpop.f32.mrf.mxu1 }
 0x54b   :  { %4980 = vst [vmem:[#allocation27_spill] sm:$0xff] %v4062_v39 }
 0x54c   :  { %v4081_v46 = vpop.f32.mrf.mxu0 }
 0x54d   :  { %2651 = vmatmul.msk.f32.gmra.mxu1 %vm42_vm1, %v1375_v37 }
 0x54f   :  { %2625 = vmatmul.msk.f32.gmra.mxu0 %vm42_vm1, %v1382_v7 }
 0x552   :  { %v4068_v28 = vpop.f32.mrf.mxu1 }
 0x553   :  { %v1722_v22 = vmax.f32 %v4050_v36, %v4068_v28 }
 0x554   :  { %v4087_v52 = vpop.f32.mrf.mxu0 }
 0x555   :  { %2652 = vmatmul.msk.f32.gmra.mxu1 %vm42_vm1, %v1376_v56  ;;  %v1719_v56 = vmax.f32 %v4046_v35, %v4062_v39 }
 0x557   :  { %2626 = vmatmul.msk.f32.gmra.mxu0 %vm42_vm1, %v1383_v18 }
 0x55a   :  { %v4073_v14 = vpop.f32.mrf.mxu1 }
 0x55b   :  { %v1725_v10 = vmax.f32 %v4054_v0, %v4073_v14 }
 0x55c   :  { %v4093_v19 = vpop.f32.mrf.mxu0 }
 0x55d   :  { %2653 = vmatmul.msk.f32.gmra.mxu1 %vm42_vm1, %v1377_v61 }
 0x55f   :  { %2627 = vmatmul.msk.f32.gmra.mxu0 %vm42_vm1, %v1384_v53 }
 0x562   :  { %v4079_v9 = vpop.f32.mrf.mxu1 }
 0x563   :  { %4981 = vst [vmem:[#allocation23_spill] sm:$0xff] %v4079_v9  ;;  %v1728_v49 = vmax.f32 %v4058_v34, %v4079_v9 }
 0x564   :  { %v4099_v24 = vpop.f32.mrf.mxu0 }
 0x565   :  { %2654 = vmatmul.msk.f32.gmra.mxu1 %vm42_vm1, %v1378_v20 }
 0x567   :  { %2628 = vmatmul.msk.f32.gmra.mxu0 %vm42_vm1, %v1385_v45 }
 0x56a   :  { %v4085_v44 = vpop.f32.mrf.mxu1 }
 0x56c   :  { %v4105_v62 = vpop.f32.mrf.mxu0 }
 0x56d   :  { %2655 = vmatmul.msk.f32.gmra.mxu1 %vm42_vm1, %v1379_v17 }
 0x56f   :  { %2629 = vmatmul.msk.f32.gmra.mxu0 %vm42_vm1, %v1386_v48 }
 0x572   :  { %v4091_v26 = vpop.f32.mrf.mxu1 }
 0x574   :  { %v4111_v16 = vpop.f32.mrf.mxu0 }
 0x575   :  { %2656 = vmatmul.msk.f32.gmra.mxu1 %vm42_vm1, %v1380_v59 }
 0x577   :  { %2630 = vmatmul.msk.f32.gmra.mxu0 %vm42_vm1, %v1387_v21 }
 0x57a   :  { %v4097_v60 = vpop.f32.mrf.mxu1 }
 0x57c   :  { %v4117_v2 = vpop.f32.mrf.mxu0 }
 0x57d   :  { %2657 = vmatmul.msk.f32.gmra.mxu1 %vm42_vm1, %v1381_v42 }
 0x57f   :  { %2631 = vmatmul.msk.f32.gmra.mxu0 %vm42_vm1, %v1388_v5 }
 0x582   :  { %v4103_v4 = vpop.f32.mrf.mxu1 }
 0x584   :  { %v4125_v13 = vpop.f32.mrf.mxu0 }
 0x585   :  { %2658 = vmatmul.msk.f32.gmra.mxu1 %vm42_vm1, %v1382_v7 }
 0x587   :  { %2632 = vmatmul.msk.f32.gmra.mxu0 %vm42_vm1, %v1389_v50 }
 0x58a   :  { %v4109_v30 = vpop.f32.mrf.mxu1 }
 0x58b   :  { %v1743_v59 = vmax.f32 %v4087_v52, %v4109_v30 }
 0x58c   :  { %v4131_v58 = vpop.f32.mrf.mxu0 }
 0x58d   :  { %2659 = vmatmul.msk.f32.gmra.mxu1 %vm42_vm1, %v1383_v18  ;;  %v1740_v18 = vmax.f32 %v4081_v46, %v4103_v4 }
 0x58f   :  { %2633 = vmatmul.msk.f32.gmra.mxu0 %vm42_vm1, %v1390_v32 }
 0x592   :  { %v4115_v47 = vpop.f32.mrf.mxu1 }
 0x593   :  { %v1746_v61 = vmax.f32 %v4093_v19, %v4115_v47 }
 0x594   :  { %v4137_v51 = vpop.f32.mrf.mxu0 }
 0x595   :  { %2660 = vmatmul.msk.f32.gmra.mxu1 %vm42_vm1, %v1384_v53  ;;  %4982 = vst [vmem:[#allocation14_spill] sm:$0xff] %v4137_v51 }
 0x59a   :  { %v4121_v1 = vpop.f32.mrf.mxu1 }
 0x59b   :  { %v1749_v6 = vmax.f32 %v4099_v24, %v4121_v1 }
 0x59c   :  { %v4150_v38 = vpop.f32.mrf.mxu0 }
 0x59d   :  { %2661 = vmatmul.msk.f32.gmra.mxu1 %vm42_vm1, %v1385_v45  ;;  %4983 = vst [vmem:[#allocation15_spill] sm:$0xff] %v4150_v38 }
 0x5a2   :  { %v4127_v25 = vpop.f32.mrf.mxu1 }
 0x5a3   :  { %v1752_v41 = vmax.f32 %v4105_v62, %v4127_v25 }
 0x5a4   :  { %v4161_v63 = vpop.f32.mrf.mxu0 }
 0x5a5   :  { %2662 = vmatmul.msk.f32.gmra.mxu1 %vm42_vm1, %v1386_v48  ;;  %v1737_v48 = vmax.f32 %v4075_v23, %v4097_v60 }
 0x5aa   :  { %v4133_v3 = vpop.f32.mrf.mxu1 }
 0x5ab   :  { %v1755_v54 = vmax.f32 %v4111_v16, %v4133_v3 }
 0x5ac   :  { %v4172_v43 = vpop.f32.mrf.mxu0 }
 0x5ad   :  { %2663 = vmatmul.msk.f32.gmra.mxu1 %vm42_vm1, %v1387_v21 }
 0x5b2   :  { %v4139_v27 = vpop.f32.mrf.mxu1 }
 0x5b3   :  { %v1758_v12 = vmax.f32 %v4117_v2, %v4139_v27 }
 0x5b4   :  { %v4180_v20 = vpop.f32.mrf.mxu0 }
 0x5b5   :  { %1759 = vmax.xlane.f32.xlu0 %v1758_v12  ;;  %2664 = vmatmul.msk.f32.gmra.mxu1 %vm42_vm1, %v1388_v5  ;;  %4986 = vst [vmem:[#allocation20_spill] sm:$0xff] %v4180_v20 }
 0x5ba   :  { %v4144_v33 = vpop.f32.mrf.mxu1 }
 0x5bb   :  { %v1761_v8 = vmax.f32 %v4125_v13, %v4144_v33 }
 0x5bc   :  { %v4186_v42 = vpop.f32.mrf.mxu0 }
 0x5bd   :  { %1756 = vmax.xlane.f32.xlu0 %v1755_v54  ;;  %1762 = vmax.xlane.f32.xlu1 %v1761_v8 }
 0x5be   :  { %2665 = vmatmul.msk.f32.gmra.mxu1 %vm42_vm1, %v1389_v50 }
 0x5c2   :  { %v4153_v57 = vpop.f32.mrf.mxu1 }
 0x5c3   :  { %v1764_v31 = vmax.f32 %v4131_v58, %v4153_v57 }
 0x5c4   :  { %v4198_v21 = vpop.f32.mrf.mxu0 }
 0x5c5   :  { %1753 = vmax.xlane.f32.xlu0 %v1752_v41  ;;  %1726 = vmax.xlane.f32.xlu1 %v1725_v10  ;;  %v1731_v10 = vmax.f32 %v4064_v29, %v4085_v44 }
 0x5c6   :  { %1765 = vmax.xlane.f32.xlu2 %v1764_v31  ;;  %2666 = vmatmul.msk.f32.gmra.mxu1 %vm42_vm1, %v1390_v32  ;;  %v1734_v32 = vmax.f32 %v4070_v15, %v4091_v26 }
 0x5ca   :  { %v4164_v55 = vpop.f32.mrf.mxu1 }
 0x5cb   :  { %4984 = vst [vmem:[#allocation24_spill] sm:$0xff] %v4164_v55 }
 0x5cc   :  { %v4206_v12 = vpop.f32.mrf.mxu0 }
 0x5cd   :  { %1750 = vmax.xlane.f32.xlu0 %v1749_v6  ;;  %1723 = vmax.xlane.f32.xlu1 %v1722_v22  ;;  %4990 = vst [vmem:[#allocation19_spill] sm:$0xff] %v4206_v12 }
 0x5ce   :  { %1729 = vmax.xlane.f32.xlu2 %v1728_v49 }
 0x5d2   :  { %v4174_v37 = vpop.f32.mrf.mxu1 }
 0x5d3   :  { %4985 = vst [vmem:[#allocation25_spill] sm:$0xff] %v4174_v37  ;;  %v1770_v6 = vmax.f32 %v4150_v38, %v4174_v37 }
 0x5d4   :  { %v4214_v41 = vpop.f32.mrf.mxu0 }
 0x5d5   :  { %1747 = vmax.xlane.f32.xlu0 %v1746_v61  ;;  %1720 = vmax.xlane.f32.xlu1 %v1719_v56 }
 0x5da   :  { %v4182_v17 = vpop.f32.mrf.mxu1 }
 0x5db   :  { %4987 = vst [vmem:[#allocation12_spill] sm:$0xff] %v4182_v17  ;;  %v1773_v8 = vmax.f32 %v4161_v63, %v4182_v17 }
 0x5dc   :  { %v4224_v56 = vpop.f32.mrf.mxu0 }
 0x5dd   :  { %1744 = vmax.xlane.f32.xlu0 %v1743_v59  ;;  %v1767_v59 = vmax.f32 %v4137_v51, %v4164_v55 }
 0x5e2   :  { %v4188_v7 = vpop.f32.mrf.mxu1 }
 0x5e3   :  { %4988 = vst [vmem:[#allocation13_spill] sm:$0xff] %v4188_v7  ;;  %v1776_v50 = vmax.f32 %v4172_v43, %v4188_v7 }
 0x5e5   :  { %1741 = vmax.xlane.f32.xlu0 %v1740_v18 }
 0x5ea   :  { %v4192_v53 = vpop.f32.mrf.mxu1 }
 0x5eb   :  { %4989 = vst [vmem:[#allocation18_spill] sm:$0xff] %v4192_v53  ;;  %v1779_v45 = vmax.f32 %v4180_v20, %v4192_v53 }
 0x5ed   :  { %1738 = vmax.xlane.f32.xlu0 %v1737_v48  ;;  %1780 = vmax.xlane.f32.xlu2 %v1779_v45  ;;  %v4234_v48 = vpop.f32.mrf.mxu0 }
 0x5f2   :  { %v4200_v5 = vpop.f32.mrf.mxu1 }
 0x5f5   :  { %1735 = vmax.xlane.f32.xlu0 %v1734_v32  ;;  %1777 = vmax.xlane.f32.xlu2 %v1776_v50 }
 0x5fa   :  { %v4208_v54 = vpop.f32.mrf.mxu1 }
 0x5fb   :  { %v1785_v31 = vmax.f32 %v4198_v21, %v4208_v54 }
 0x5fd   :  { %1732 = vmax.xlane.f32.xlu0 %v1731_v10  ;;  %1774 = vmax.xlane.f32.xlu2 %v1773_v8  ;;  %v4240_v8 = vpop.f32.mrf.mxu0 }
 0x602   :  { %v4218_v22 = vpop.f32.mrf.mxu1 }
 0x603   :  { %4991 = vst [vmem:[#allocation29_spill] sm:$0xff] %v4218_v22  ;;  %v1788_v49 = vmax.f32 %v4206_v12, %v4218_v22 }
 0x605   :  { %1771 = vmax.xlane.f32.xlu2 %v1770_v6  ;;  %1786 = vmax.xlane.f32.xlu0 %v1785_v31  ;;  %v2200_v6 = vld.sshfl [vmem:[#allocation1] sm:$0xff pattern:$0x75316420] }
 0x606   :  { %2667 = vmatpush.msk.msra.mxu2 %vm46_vm0, %v2200_v6 }
 0x607   :  { %2668 = vmatmul.msk.f32.vlgmr.msra.gmra.mxu2 %vm42_vm1, %v3840_v40 }
 0x60a   :  { %v4226_v61 = vpop.f32.mrf.mxu1 }
 0x60b   :  { %v1791_v18 = vmax.f32 %v4214_v41, %v4226_v61 }
 0x60d   :  { %1768 = vmax.xlane.f32.xlu2 %v1767_v59  ;;  %1789 = vmax.xlane.f32.xlu0 %v1788_v49  ;;  %v2201_v49 = vld.sshfl [vmem:[#allocation1 + $0x8] sm:$0xff pattern:$0x75316420]  ;;  %v4253_v59 = vpop.f32.mrf.mxu0 }
 0x60e   :  { %2669 = vmatpush.msk.msra.mxu3 %vm46_vm0, %v2201_v49  ;;  %2372 = vst [vmem:[#allocation1] ss:$2 sm:$0xff] %v3988_v11 }
 0x60f   :  { %2670 = vmatmul.msk.f32.vlgmr.msra.gmra.mxu3 %vm42_vm1, %v3840_v40 }
 0x612   :  { %v4232_v45 = vpop.f32.mrf.mxu1 }
 0x613   :  { %v1794_v50 = vmax.f32 %v4224_v56, %v4232_v45 }
 0x615   :  { %1792 = vmax.xlane.f32.xlu0 %v1791_v18  ;;  %v4261_v49 = vpop.f32.mrf.mxu0 }
 0x61a   :  { %v4238_v32 = vpop.f32.mrf.mxu1 }
 0x61b   :  { %v1797_v10 = vmax.f32 %v4234_v48, %v4238_v32 }
 0x61d   :  { %1795 = vmax.xlane.f32.xlu0 %v1794_v50  ;;  %v4267_v39 = vpop.f32.mrf.mxu0 }
 0x622   :  { %v4244_v31 = vpop.f32.mrf.mxu1 }
 0x623   :  { %v1800_v50 = vmax.f32 %v4240_v8, %v4244_v31 }
 0x625   :  { %1798 = vmax.xlane.f32.xlu0 %v1797_v10 }
 0x628   :  { %v1760_v18 = vpop.xlane.xlu0 %1759 }
 0x629   :  { %v1842_v7 = vsub.f32 %v4139_v27, %v1760_v18 }
 0x62a   :  { %v4257_v55 = vpop.f32.mrf.mxu1 }
 0x62b   :  { %v1803_v11 = vmax.f32 %v4253_v59, %v4257_v55 }
 0x62d   :  { %1801 = vmax.xlane.f32.xlu0 %v1800_v50 }
 0x630   :  { %v1757_v6 = vpop.xlane.xlu0 %1756  ;;  %v1763_v22 = vpop.xlane.xlu1 %1762 }
 0x632   :  { %v4263_v51 = vpop.f32.mrf.mxu1 }
 0x633   :  { %v1806_v10 = vmax.f32 %v4261_v49, %v4263_v51 }
 0x635   :  { %1804 = vmax.xlane.f32.xlu0 %v1803_v11  ;;  %v4275_v11 = vpop.f32.mrf.mxu0 }
 0x638   :  { %v1754_v40 = vpop.xlane.xlu0 %1753 }
 0x63b   :  { %v4269_v35 = vpop.f32.mrf.mxu1 }
 0x63c   :  { %v1809_v9 = vmax.f32 %v4267_v39, %v4269_v35 }
 0x63d   :  { %1807 = vmax.xlane.f32.xlu0 %v1806_v10  ;;  %v1843_v10 = vsub.f32 %v4125_v13, %v1763_v22  ;;  %v1841_v13 = vsub.f32 %v4117_v2, %v1760_v18  ;;  %v1840_v2 = vsub.f32 %v4133_v3, %v1757_v6 }
 0x640   :  { %v1751_v53 = vpop.xlane.xlu0 %1750 }
 0x641   :  { %v1835_v50 = vsub.f32 %v4099_v24, %v1751_v53  ;;  %v1836_v20 = vsub.f32 %v4121_v1, %v1751_v53  ;;  %v1844_v1 = vsub.f32 %v4144_v33, %v1763_v22  ;;  %v1782_v33 = vmax.f32 %v4186_v42, %v4200_v5 }
 0x642   :  { %v1931_v22 = vmul.f32 1.442695, %v1841_v13 }
 0x643   :  { %v1919_v34 = vmul.f32 1.442695, %v1835_v50  ;;  %v1921_v37 = vmul.f32 1.442695, %v1836_v20  ;;  %v4277_v12 = vpop.f32.mrf.mxu1 }
 0x644   :  { %v1812_v24 = vmax.f32 %v4275_v11, %v4277_v12 }
 0x645   :  { %2879 = vpow2.f32 %v1919_v34  ;;  %1810 = vmax.xlane.f32.xlu0 %v1809_v9  ;;  %v1935_v34 = vmul.f32 1.442695, %v1843_v10  ;;  %v1933_v10 = vmul.f32 1.442695, %v1842_v7 }
 0x646   :  { %2881 = vpow2.f32 %v1921_v37  ;;  %v1937_v37 = vmul.f32 1.442695, %v1844_v1 }
 0x647   :  { %2883 = vpow2.f32 %v1935_v34  ;;  %v1929_v34 = vmul.f32 1.442695, %v1840_v2 }
 0x648   :  { %v4279_v38 = vpop.xlane.xlu0 %1747  ;;  %2885 = vpow2.f32 %v1937_v37 }
 0x649   :  { %2887 = vpow2.f32 %v1931_v22 }
 0x64a   :  { %2889 = vpow2.f32 %v1933_v10  ;;  %v1766_v10 = vpop.xlane.xlu2 %1765 }
 0x64b   :  { %v4285_v53 = vpop.eup %2879 }
 0x64c   :  { %v4287_v20 = vpop.eup %2881 }
 0x64d   :  { %1813 = vmax.xlane.f32.xlu0 %v1812_v24  ;;  %v2037_v9 = vadd.f32 %v4287_v20, %v4285_v53  ;;  %v4297_v24 = vpop.eup %2883 }
 0x64e   :  { %v4299_v17 = vpop.eup %2885 }
 0x64f   :  { %2038 = vadd.xlane.f32.xlu2 %v2037_v9  ;;  %4992 = vst [vmem:[#allocation28_spill] sm:$0xff] %v4299_v17  ;;  %v1839_v9 = vsub.f32 %v4111_v16, %v1757_v6  ;;  %v2049_v27 = vadd.f32 %v4299_v17, %v4297_v24  ;;  %v4305_v37 = vpop.eup %2887  ;;  %v1838_v16 = vsub.f32 %v4127_v25, %v1754_v40 }
 0x650   :  { %v4291_v50 = vpop.xlane.xlu0 %1744  ;;  %4993 = vst [vmem:[#allocation10_spill] sm:$0xff] %v4305_v37  ;;  %v4307_v7 = vpop.eup %2889 }
 0x651   :  { %v1927_v18 = vmul.f32 1.442695, %v1839_v9  ;;  %4994 = vst [vmem:[#allocation11_spill] sm:$0xff] %v4307_v7  ;;  %v2046_v3 = vadd.f32 %v4307_v7, %v4305_v37  ;;  %v1925_v22 = vmul.f32 1.442695, %v1838_v16  ;;  %v1831_v17 = vsub.f32 %v4087_v52, %v4291_v50 }
 0x653   :  { %2891 = vpow2.f32 %v1927_v18  ;;  %v1845_v18 = vsub.f32 %v4131_v58, %v1766_v10  ;;  %v1911_v52 = vmul.f32 1.442695, %v1831_v17 }
 0x654   :  { %2893 = vpow2.f32 %v1929_v34 }
 0x655   :  { %1783 = vmax.xlane.f32.xlu0 %v1782_v33  ;;  %v1837_v33 = vsub.f32 %v4105_v62, %v1754_v40  ;;  %v1846_v62 = vsub.f32 %v4153_v57, %v1766_v10  ;;  %v1939_v40 = vmul.f32 1.442695, %v1845_v18 }
 0x657   :  { %v1923_v6 = vmul.f32 1.442695, %v1837_v33  ;;  %v1941_v34 = vmul.f32 1.442695, %v1846_v62 }
 0x658   :  { %v1742_v1 = vpop.xlane.xlu0 %1741 }
 0x659   :  { %v4315_v9 = vpop.eup %2891  ;;  %2895 = vpow2.f32 %v1923_v6  ;;  %v1830_v7 = vsub.f32 %v4103_v4, %v1742_v1 }
 0x65a   :  { %4995 = vst [vmem:[#allocation30_spill] sm:$0xff] %v4315_v9  ;;  %v4317_v2 = vpop.eup %2893  ;;  %2897 = vpow2.f32 %v1925_v22 }
 0x65b   :  { %4996 = vst [vmem:[#allocation31_spill] sm:$0xff] %v4317_v2  ;;  %v2043_v25 = vadd.f32 %v4317_v2, %v4315_v9  ;;  %2899 = vpow2.f32 %v1939_v40  ;;  %v1909_v37 = vmul.f32 1.442695, %v1830_v7 }
 0x65c   :  { %2901 = vpow2.f32 %v1941_v34 }
 0x65d   :  { %2050 = vadd.xlane.f32.xlu0 %v2049_v27 }
 0x65f   :  { %v4325_v33 = vpop.eup %2895 }
 0x660   :  { %v4309_v13 = vpop.xlane.xlu0 %1738  ;;  %4997 = vst [vmem:[#allocation17_spill] sm:$0xff] %v4325_v33  ;;  %v4327_v16 = vpop.eup %2897 }
 0x661   :  { %4998 = vst [vmem:[#allocation8_spill] sm:$0xff] %v4327_v16  ;;  %v2040_v58 = vadd.f32 %v4327_v16, %v4325_v33  ;;  %v4333_v6 = vpop.eup %2899 }
 0x662   :  { %4999 = vst [vmem:[#allocation9_spill] sm:$0xff] %v4333_v6  ;;  %v4335_v57 = vpop.eup %2901 }
 0x663   :  { %5000 = vst [vmem:[#allocation32_spill] sm:$0xff] %v4335_v57  ;;  %v2052_v10 = vadd.f32 %v4335_v57, %v4333_v6 }
 0x665   :  { %2047 = vadd.xlane.f32.xlu0 %v2046_v3 }
 0x668   :  { %v4319_v27 = vpop.xlane.xlu0 %1735 }
 0x66d   :  { %2044 = vadd.xlane.f32.xlu0 %v2043_v25  ;;  %v4343_v25 = vpop.xlane.xlu2 %1729 }
 0x66e   :  { %5002 = vst [vmem:[#allocation22_spill] sm:$0xff] %v4343_v25 }
 0x670   :  { %v4329_v3 = vpop.xlane.xlu0 %1732 }
 0x675   :  { %2041 = vadd.xlane.f32.xlu0 %v2040_v58  ;;  %v4347_v34 = vpop.xlane.xlu2 %1780 }
 0x676   :  { %5003 = vst [vmem:[#allocation33_spill] sm:$0xff] %v4347_v34 }
 0x678   :  { %v4337_v22 = vpop.xlane.xlu0 %1786 }
 0x67d   :  { %2053 = vadd.xlane.f32.xlu0 %v2052_v10  ;;  %v4351_v16 = vpop.xlane.xlu2 %1777  ;;  %v1829_v10 = vsub.f32 %v4081_v46, %v1742_v1  ;;  %v1832_v46 = vsub.f32 %v4109_v30, %v4291_v50 }
 0x67f   :  { %v1907_v34 = vmul.f32 1.442695, %v1829_v10 }
 0x680   :  { %v4341_v18 = vpop.xlane.xlu0 %1789 }
 0x681   :  { %5001 = vst [vmem:[#allocation21_spill] sm:$0xff] %v4341_v18 }
 0x685   :  { %v4357_v25 = vpop.xlane.xlu2 %1774 }
 0x688   :  { %v1793_v62 = vpop.xlane.xlu0 %1792 }
 0x689   :  { %v1863_v4 = vsub.f32 %v4214_v41, %v1793_v62  ;;  %v1864_v7 = vsub.f32 %v4226_v61, %v1793_v62  ;;  %v1824_v62 = vsub.f32 %v4085_v44, %v4329_v3 }
 0x68b   :  { %v1975_v30 = vmul.f32 1.442695, %v1863_v4 }
 0x68d   :  { %v4373_v50 = vpop.xlane.xlu2 %1771 }
 0x690   :  { %v4345_v40 = vpop.xlane.xlu0 %1795 }
 0x691   :  { %v1865_v10 = vsub.f32 %v4224_v56, %v4345_v40 }
 0x693   :  { %v1979_v56 = vmul.f32 1.442695, %v1865_v10 }
 0x698   :  { %v4349_v58 = vpop.xlane.xlu0 %1798 }
 0x6a0   :  { %v1802_v33 = vpop.xlane.xlu0 %1801 }
 0x6a1   :  { %v1869_v2 = vsub.f32 %v4240_v8, %v1802_v33  ;;  %v1870_v9 = vsub.f32 %v4244_v31, %v1802_v33 }
 0x6a3   :  { %v1987_v57 = vmul.f32 1.442695, %v1869_v2  ;;  %v1989_v6 = vmul.f32 1.442695, %v1870_v9 }
 0x6a5   :  { %2903 = vpow2.f32 %v1987_v57 }
 0x6a6   :  { %2905 = vpow2.f32 %v1989_v6  ;;  %v1977_v6 = vmul.f32 1.442695, %v1864_v7 }
 0x6a7   :  { %2907 = vpow2.f32 %v1907_v34 }
 0x6a8   :  { %v1805_v18 = vpop.xlane.xlu0 %1804  ;;  %2909 = vpow2.f32 %v1909_v37  ;;  %v1823_v37 = vsub.f32 %v4064_v29, %v4329_v3  ;;  %v1866_v29 = vsub.f32 %v4232_v45, %v4345_v40  ;;  %v1897_v3 = vmul.f32 1.442695, %v1824_v62 }
 0x6a9   :  { %v1871_v8 = vsub.f32 %v4253_v59, %v1805_v18  ;;  %v1872_v31 = vsub.f32 %v4257_v55, %v1805_v18  ;;  %v1913_v59 = vmul.f32 1.442695, %v1832_v46 }
 0x6ab   :  { %v4365_v9 = vpop.eup %2903  ;;  %v1991_v1 = vmul.f32 1.442695, %v1871_v8  ;;  %v1993_v2 = vmul.f32 1.442695, %v1872_v31 }
 0x6ac   :  { %v4368_v33 = vpop.eup %2905 }
 0x6ad   :  { %2911 = vpow2.f32 %v1991_v1  ;;  %v2088_v55 = vadd.f32 %v4368_v33, %v4365_v9  ;;  %v4375_v57 = vpop.eup %2907 }
 0x6ae   :  { %2913 = vpow2.f32 %v1993_v2  ;;  %v4381_v18 = vpop.eup %2909  ;;  %v1981_v2 = vmul.f32 1.442695, %v1866_v29 }
 0x6af   :  { %2089 = vadd.xlane.f32.xlu2 %v2088_v55  ;;  %2915 = vpow2.f32 %v1911_v52 }
 0x6b0   :  { %v1808_v41 = vpop.xlane.xlu0 %1807  ;;  %2917 = vpow2.f32 %v1913_v59  ;;  %v1825_v59 = vsub.f32 %v4070_v15, %v4319_v27 }
 0x6b1   :  { %v1873_v17 = vsub.f32 %v4261_v49, %v1808_v41  ;;  %v1874_v61 = vsub.f32 %v4263_v51, %v1808_v41  ;;  %2919 = vpow2.f32 %v1975_v30  ;;  %v1895_v51 = vmul.f32 1.442695, %v1823_v37  ;;  %v4409_v30 = vpop.xlane.xlu2 %1768  ;;  %v4413_v41 = vpop.xlane.xlu1 %1726 }
 0x6b2   :  { %2921 = vpow2.f32 %v1977_v6  ;;  %v2028_v49 = vadd.f32 %v4381_v18, %v4375_v57  ;;  %v1899_v62 = vmul.f32 1.442695, %v1825_v59 }
 0x6b3   :  { %v4385_v34 = vpop.eup %2911  ;;  %v1995_v8 = vmul.f32 1.442695, %v1873_v17  ;;  %v1997_v31 = vmul.f32 1.442695, %v1874_v61 }
 0x6b4   :  { %v4389_v46 = vpop.eup %2913 }
 0x6b5   :  { %2923 = vpow2.f32 %v1995_v8  ;;  %v2091_v44 = vadd.f32 %v4389_v46, %v4385_v34  ;;  %v4397_v4 = vpop.eup %2915 }
 0x6b6   :  { %2925 = vpow2.f32 %v1997_v31  ;;  %v4399_v1 = vpop.eup %2917 }
 0x6b7   :  { %2029 = vadd.xlane.f32.xlu2 %v2028_v49  ;;  %2092 = vadd.xlane.f32.xlu0 %v2091_v44  ;;  %v4401_v45 = vpop.eup %2919  ;;  %2927 = vpow2.f32 %v1895_v51  ;;  %v2031_v10 = vadd.f32 %v4399_v1, %v4397_v4  ;;  %v1833_v51 = vsub.f32 %v4093_v19, %v4279_v38 }
 0x6b8   :  { %v1811_v7 = vpop.xlane.xlu0 %1810  ;;  %v4405_v55 = vpop.eup %2921  ;;  %2929 = vpow2.f32 %v1897_v3 }
 0x6b9   :  { %v1875_v40 = vsub.f32 %v4267_v39, %v1811_v7  ;;  %v1876_v52 = vsub.f32 %v4269_v35, %v1811_v7  ;;  %2931 = vpow2.f32 %v1979_v56  ;;  %v1826_v35 = vsub.f32 %v4091_v26, %v4319_v27 }
 0x6ba   :  { %2933 = vpow2.f32 %v1981_v2  ;;  %v2079_v39 = vadd.f32 %v4405_v55, %v4401_v45  ;;  %v1834_v56 = vsub.f32 %v4115_v47, %v4279_v38  ;;  %v1724_v47 = vpop.xlane.xlu1 %1723  ;;  %v1915_v38 = vmul.f32 1.442695, %v1833_v51 }
 0x6bb   :  { %v4411_v6 = vpop.eup %2923  ;;  %v1999_v37 = vmul.f32 1.442695, %v1875_v40  ;;  %v2001_v17 = vmul.f32 1.442695, %v1876_v52  ;;  %v1901_v26 = vmul.f32 1.442695, %v1826_v35  ;;  %v1859_v40 = vsub.f32 %v4198_v21, %v4337_v22 }
 0x6bc   :  { %v4415_v61 = vpop.eup %2925 }
 0x6bd   :  { %2935 = vpow2.f32 %v1999_v37  ;;  %v2094_v15 = vadd.f32 %v4415_v61, %v4411_v6  ;;  %v4425_v8 = vpop.eup %2927 }
 0x6be   :  { %2937 = vpow2.f32 %v2001_v17  ;;  %v4427_v31 = vpop.eup %2929  ;;  %v1917_v17 = vmul.f32 1.442695, %v1834_v56 }
 0x6bf   :  { %2080 = vadd.xlane.f32.xlu2 %v2079_v39  ;;  %2095 = vadd.xlane.f32.xlu1 %v2094_v15  ;;  %v4429_v29 = vpop.eup %2931  ;;  %2939 = vpow2.f32 %v1899_v62  ;;  %v2019_v37 = vadd.f32 %v4427_v31, %v4425_v8  ;;  %v1967_v39 = vmul.f32 1.442695, %v1859_v40 }
 0x6c0   :  { %2032 = vadd.xlane.f32.xlu0 %v2031_v10  ;;  %v1814_v27 = vpop.xlane.xlu0 %1813  ;;  %v4435_v3 = vpop.eup %2933 }
 0x6c1   :  { %v1877_v49 = vsub.f32 %v4275_v11, %v1814_v27  ;;  %v1878_v44 = vsub.f32 %v4277_v12, %v1814_v27  ;;  %v1819_v12 = vsub.f32 %v4054_v0, %v4413_v41  ;;  %v1860_v11 = vsub.f32 %v4208_v54, %v4337_v22 }
 0x6c2   :  { %v2039_v2 = vpop.xlane.xlu2 %2038  ;;  %v2082_v35 = vadd.f32 %v4435_v3, %v4429_v29  ;;  %v1817_v54 = vsub.f32 %v4050_v36, %v1724_v47 }
 0x6c3   :  { %v4439_v7 = vpop.eup %2935  ;;  %v2003_v52 = vmul.f32 1.442695, %v1877_v49  ;;  %v2005_v59 = vmul.f32 1.442695, %v1878_v44  ;;  %2941 = vrcp.f32 %v2039_v2  ;;  %v1969_v22 = vmul.f32 1.442695, %v1860_v11 }
 0x6c4   :  { %v4443_v19 = vpop.eup %2937  ;;  %2943 = vpow2.f32 %v1901_v26  ;;  %v1887_v10 = vmul.f32 1.442695, %v1819_v12  ;;  %v1818_v49 = vsub.f32 %v4068_v28, %v1724_v47  ;;  %v1867_v2 = vsub.f32 %v4234_v48, %v4349_v58 }
 0x6c5   :  { %2945 = vpow2.f32 %v2003_v52  ;;  %v2097_v21 = vadd.f32 %v4443_v19, %v4439_v7  ;;  %v4455_v0 = vpop.eup %2939  ;;  %v1883_v52 = vmul.f32 1.442695, %v1817_v54  ;;  %v1868_v28 = vsub.f32 %v4238_v32, %v4349_v58  ;;  %v5004_v54 = vld [vmem:[#allocation12_spill] sm:$0xff] }
 0x6c6   :  { %2947 = vpow2.f32 %v2005_v59  ;;  %v1885_v48 = vmul.f32 1.442695, %v1818_v49  ;;  %v1827_v32 = vsub.f32 %v4075_v23, %v4309_v13  ;;  %v1983_v58 = vmul.f32 1.442695, %v1867_v2 }
 0x6c7   :  { %2020 = vadd.xlane.f32.xlu2 %v2019_v37  ;;  %2098 = vadd.xlane.f32.xlu1 %v2097_v21  ;;  %2949 = vpow2.f32 %v1915_v38  ;;  %v1985_v11 = vmul.f32 1.442695, %v1868_v28  ;;  %v1853_v23 = vsub.f32 %v4172_v43, %v4351_v16  ;;  %v5006_v28 = vld [vmem:[#allocation28_spill] sm:$0xff] }
 0x6c8   :  { %2083 = vadd.xlane.f32.xlu0 %v2082_v35  ;;  %v1784_v15 = vpop.xlane.xlu0 %1783  ;;  %2951 = vpow2.f32 %v1917_v17  ;;  %v1903_v35 = vmul.f32 1.442695, %v1827_v32  ;;  %v5007_v32 = vld [vmem:[#allocation15_spill] sm:$0xff] }
 0x6c9   :  { %v2942_v62 = vpop.eup %2941  ;;  %v1857_v26 = vsub.f32 %v4186_v42, %v1784_v15  ;;  %v1858_v27 = vsub.f32 %v4200_v5, %v1784_v15  ;;  %2953 = vpow2.f32 %v1967_v39  ;;  %v1851_v39 = vsub.f32 %v4161_v63, %v4357_v25 }
 0x6ca   :  { %v4460_v51 = vpop.eup %2943  ;;  %v4464_v44 = vmul.f32 %v2942_v62, %v4285_v53  ;;  %v4467_v36 = vmul.f32 %v2942_v62, %v4287_v20  ;;  %2955 = vpow2.f32 %v1969_v22  ;;  %v1820_v53 = vsub.f32 %v4073_v14, %v4413_v41  ;;  %v5005_v62 = vld [vmem:[#allocation13_spill] sm:$0xff] }
 0x6cb   :  { %v4469_v56 = vpop.eup %2945  ;;  %v1963_v42 = vmul.f32 1.442695, %v1857_v26  ;;  %v1965_v40 = vmul.f32 1.442695, %v1858_v27  ;;  %v2022_v59 = vadd.f32 %v4460_v51, %v4455_v0  ;;  %v1828_v41 = vsub.f32 %v4097_v60, %v4309_v13 }
 0x6cc   :  { %v4473_v5 = vpop.eup %2947  ;;  %2447 = vst [vmem:[#allocation5 + $0x2a0] sm:$0xff] %v4464_v44  ;;  %v1889_v37 = vmul.f32 1.442695, %v1820_v53  ;;  %v1852_v22 = vsub.f32 %v5004_v54, %v4357_v25  ;;  %v1854_v43 = vsub.f32 %v5005_v62, %v4351_v16  ;;  %v1955_v27 = vmul.f32 1.442695, %v1853_v23 }
 0x6cd   :  { %2957 = vpow2.f32 %v1963_v42  ;;  %v2100_v20 = vadd.f32 %v4473_v5, %v4469_v56  ;;  %2448 = vst [vmem:[#allocation5 + $0x2a8] sm:$0xff] %v4467_v36  ;;  %v4485_v12 = vpop.eup %2949  ;;  %v1905_v13 = vmul.f32 1.442695, %v1828_v41  ;;  %v1951_v2 = vmul.f32 1.442695, %v1851_v39  ;;  %v5012_v39 = vld [vmem:[#allocation25_spill] sm:$0xff] }
 0x6ce   :  { %2959 = vpow2.f32 %v1965_v40  ;;  %v4489_v14 = vpop.eup %2951  ;;  %v1953_v16 = vmul.f32 1.442695, %v1852_v22 }
 0x6cf   :  { %2961 = vpow2.f32 %v1887_v10  ;;  %2101 = vadd.xlane.f32.xlu1 %v2100_v20  ;;  %v4493_v38 = vpop.eup %2953  ;;  %v2034_v10 = vadd.f32 %v4489_v14, %v4485_v12 }
 0x6d0   :  { %2963 = vpow2.f32 %v1883_v52  ;;  %2023 = vadd.xlane.f32.xlu0 %v2022_v59  ;;  %v2051_v47 = vpop.xlane.xlu0 %2050  ;;  %v4495_v21 = vpop.eup %2955 }
 0x6d1   :  { %2965 = vrcp.f32 %v2051_v47  ;;  %v2073_v49 = vadd.f32 %v4495_v21, %v4493_v38 }
 0x6d2   :  { %2967 = vpow2.f32 %v1885_v48  ;;  %v1957_v48 = vmul.f32 1.442695, %v1854_v43 }
 0x6d3   :  { %v4499_v17 = vpop.eup %2957  ;;  %2969 = vpow2.f32 %v1983_v58  ;;  %v1849_v58 = vsub.f32 %v5007_v32, %v4373_v50 }
 0x6d4   :  { %v4503_v60 = vpop.eup %2959  ;;  %2971 = vpow2.f32 %v1985_v11  ;;  %v5009_v11 = vld [vmem:[#allocation19_spill] sm:$0xff] }
 0x6d5   :  { %v4507_v15 = vpop.eup %2961  ;;  %2973 = vpow2.f32 %v1889_v37  ;;  %v2070_v63 = vadd.f32 %v4503_v60, %v4499_v17  ;;  %v5010_v37 = vld [vmem:[#allocation29_spill] sm:$0xff]  ;;  %v1947_v43 = vmul.f32 1.442695, %v1849_v58 }
 0x6d6   :  { %v4515_v26 = vpop.eup %2963  ;;  %2975 = vpow2.f32 %v1903_v35 }
 0x6d7   :  { %v2966_v25 = vpop.eup %2965  ;;  %2035 = vadd.xlane.f32.xlu1 %v2034_v10  ;;  %2071 = vadd.xlane.f32.xlu2 %v2070_v63  ;;  %2977 = vpow2.f32 %v1905_v13  ;;  %v1850_v13 = vsub.f32 %v5012_v39, %v4373_v50 }
 0x6d8   :  { %v4519_v42 = vpop.eup %2967  ;;  %2074 = vadd.xlane.f32.xlu0 %v2073_v49  ;;  %v2048_v40 = vpop.xlane.xlu0 %2047  ;;  %v4522_v52 = vmul.f32 %v2966_v25, %v4297_v24  ;;  %v4525_v53 = vmul.f32 %v2966_v25, %v5006_v28  ;;  %v5008_v24 = vld [vmem:[#allocation21_spill] sm:$0xff] }
 0x6d9   :  { %v4527_v20 = vpop.eup %2969  ;;  %2979 = vrcp.f32 %v2048_v40  ;;  %v1861_v47 = vsub.f32 %v5009_v11, %v5008_v24  ;;  %v1862_v23 = vsub.f32 %v5010_v37, %v5008_v24  ;;  %v2010_v22 = vadd.f32 %v4519_v42, %v4515_v26  ;;  %v5016_v40 = vld [vmem:[#allocation11_spill] sm:$0xff]  ;;  %v5020_v11 = vld [vmem:[#allocation22_spill] sm:$0xff] }
 0x6da   :  { %v4529_v59 = vpop.eup %2971  ;;  %2981 = vpow2.f32 %v1955_v27  ;;  %2455 = vst [vmem:[#allocation5 + $0x2e0] sm:$0xff] %v4522_v52  ;;  %v1949_v32 = vmul.f32 1.442695, %v1850_v13 }
 0x6db   :  { %v4534_v41 = vpop.eup %2973  ;;  %2983 = vpow2.f32 %v1951_v2  ;;  %2456 = vst [vmem:[#allocation5 + $0x2e8] sm:$0xff] %v4525_v53  ;;  %v2085_v54 = vadd.f32 %v4529_v59, %v4527_v20  ;;  %v1971_v27 = vmul.f32 1.442695, %v1861_v47  ;;  %v1973_v25 = vmul.f32 1.442695, %v1862_v23  ;;  %v5015_v2 = vld [vmem:[#allocation10_spill] sm:$0xff] }
 0x6dc   :  { %2985 = vpow2.f32 %v1953_v16  ;;  %v4541_v35 = vpop.eup %2975  ;;  %v2013_v10 = vadd.f32 %v4534_v41, %v4507_v15  ;;  %v5021_v47 = vld [vmem:[#allocation26_spill] sm:$0xff]  ;;  %v5022_v23 = vld [vmem:[#allocation23_spill] sm:$0xff] }
 0x6dd   :  { %5011 = vst [vmem:[#allocation12_spill] sm:$0xff] %v4541_v35  ;;  %2987 = vpow2.f32 %v1957_v48  ;;  %v4549_v62 = vpop.eup %2977  ;;  %v1821_v37 = vsub.f32 %v5021_v47, %v5020_v11  ;;  %v1822_v39 = vsub.f32 %v5022_v23, %v5020_v11 }
 0x6de   :  { %5013 = vst [vmem:[#allocation13_spill] sm:$0xff] %v4549_v62  ;;  %v2025_v13 = vadd.f32 %v4549_v62, %v4541_v35 }
 0x6df   :  { %v2980_v63 = vpop.eup %2979  ;;  %2086 = vadd.xlane.f32.xlu1 %v2085_v54  ;;  %2011 = vadd.xlane.f32.xlu2 %v2010_v22 }
 0x6e0   :  { %v4553_v49 = vpop.eup %2981  ;;  %2014 = vadd.xlane.f32.xlu0 %v2013_v10  ;;  %v2045_v50 = vpop.xlane.xlu0 %2044  ;;  %v4556_v16 = vmul.f32 %v2980_v63, %v5015_v2  ;;  %v4559_v28 = vmul.f32 %v2980_v63, %v5016_v40  ;;  %v1891_v10 = vmul.f32 1.442695, %v1821_v37  ;;  %v5025_v40 = vld [vmem:[#allocation31_spill] sm:$0xff]  ;;  %v5029_v37 = vld [vmem:[#allocation33_spill] sm:$0xff] }
 0x6e1   :  { %5014 = vst [vmem:[#allocation28_spill] sm:$0xff] %v4553_v49  ;;  %v4561_v48 = vpop.eup %2983  ;;  %2989 = vrcp.f32 %v2045_v50 }
 0x6e2   :  { %5017 = vst [vmem:[#allocation15_spill] sm:$0xff] %v4561_v48  ;;  %v4563_v58 = vpop.eup %2985  ;;  %2991 = vpow2.f32 %v1947_v43 }
 0x6e3   :  { %5018 = vst [vmem:[#allocation21_spill] sm:$0xff] %v4563_v58  ;;  %v4566_v24 = vpop.eup %2987  ;;  %2993 = vpow2.f32 %v1971_v27  ;;  %v2061_v54 = vadd.f32 %v4563_v58, %v4561_v48  ;;  %v1893_v27 = vmul.f32 1.442695, %v1822_v39  ;;  %v5031_v39 = vld [vmem:[#allocation18_spill] sm:$0xff]  ;;  %v1721_v58 = vpop.xlane.xlu1 %1720  ;;  %v5033_v48 = vld [vmem:[#allocation8_spill] sm:$0xff] }
 0x6e4   :  { %2453 = vst [vmem:[#allocation5 + $0x2d0] sm:$0xff] %v4556_v16  ;;  %2995 = vpow2.f32 %v1973_v25  ;;  %v2064_v22 = vadd.f32 %v4566_v24, %v4553_v49  ;;  %v5024_v25 = vld [vmem:[#allocation30_spill] sm:$0xff]  ;;  %v5032_v49 = vld [vmem:[#allocation17_spill] sm:$0xff] }
 0x6e5   :  { %5019 = vst [vmem:[#allocation19_spill] sm:$0xff] %v4566_v24  ;;  %2997 = vpow2.f32 %v1949_v32 }
 0x6e6   :  { %2454 = vst [vmem:[#allocation5 + $0x2d8] sm:$0xff] %v4559_v28 }
 0x6e7   :  { %v2990_v43 = vpop.eup %2989  ;;  %2026 = vadd.xlane.f32.xlu1 %v2025_v13  ;;  %2062 = vadd.xlane.f32.xlu2 %v2061_v54  ;;  %v5030_v13 = vld [vmem:[#allocation20_spill] sm:$0xff] }
 0x6e8   :  { %v4579_v63 = vpop.eup %2991  ;;  %2065 = vadd.xlane.f32.xlu0 %v2064_v22  ;;  %v2042_v50 = vpop.xlane.xlu0 %2041  ;;  %v2159_v2 = vmul.f32 %v2990_v43, %v5024_v25  ;;  %v2160_v32 = vmul.f32 %v2990_v43, %v5025_v40  ;;  %v1855_v54 = vsub.f32 %v5030_v13, %v5029_v37  ;;  %v1856_v22 = vsub.f32 %v5031_v39, %v5029_v37  ;;  %v5034_v39 = vld [vmem:[#allocation16_spill] sm:$0xff] }
 0x6e9   :  { %5023 = vst [vmem:[#allocation29_spill] sm:$0xff] %v4579_v63  ;;  %v4583_v11 = vpop.eup %2993  ;;  %2999 = vrcp.f32 %v2042_v50 }
 0x6ea   :  { %5026 = vst [vmem:[#allocation25_spill] sm:$0xff] %v4583_v11  ;;  %v4585_v47 = vpop.eup %2995  ;;  %3001 = vpow2.f32 %v1891_v10  ;;  %v1959_v40 = vmul.f32 1.442695, %v1855_v54  ;;  %v1961_v24 = vmul.f32 1.442695, %v1856_v22  ;;  %v5035_v54 = vld [vmem:[#allocation27_spill] sm:$0xff] }
 0x6eb   :  { %5027 = vst [vmem:[#allocation10_spill] sm:$0xff] %v4585_v47  ;;  %v4587_v23 = vpop.eup %2997  ;;  %3003 = vpow2.f32 %v1893_v27  ;;  %v2076_v43 = vadd.f32 %v4585_v47, %v4583_v11  ;;  %v1815_v47 = vsub.f32 %v5034_v39, %v1721_v58 }
 0x6ec   :  { %2451 = vst [vmem:[#allocation5 + $0x2c0] sm:$0xff] %v2159_v2  ;;  %v2058_v50 = vadd.f32 %v4587_v23, %v4579_v63 }
 0x6ed   :  { %5028 = vst [vmem:[#allocation11_spill] sm:$0xff] %v4587_v23 }
 0x6ee   :  { %2452 = vst [vmem:[#allocation5 + $0x2c8] sm:$0xff] %v2160_v32 }
 0x6ef   :  { %v3000_v25 = vpop.eup %2999  ;;  %2077 = vadd.xlane.f32.xlu1 %v2076_v43  ;;  %v1816_v43 = vsub.f32 %v5035_v54, %v1721_v58  ;;  %v5038_v58 = vld [vmem:[#allocation14_spill] sm:$0xff] }
 0x6f0   :  { %2059 = vadd.xlane.f32.xlu0 %v2058_v50  ;;  %v2054_v10 = vpop.xlane.xlu0 %2053  ;;  %v2157_v13 = vmul.f32 %v3000_v25, %v5032_v49  ;;  %v2158_v27 = vmul.f32 %v3000_v25, %v5033_v48  ;;  %v4599_v62 = vpop.eup %3001  ;;  %v1879_v49 = vmul.f32 1.442695, %v1815_v47  ;;  %v5036_v25 = vld [vmem:[#allocation9_spill] sm:$0xff]  ;;  %v5039_v47 = vld [vmem:[#allocation24_spill] sm:$0xff] }
 0x6f1   :  { %3005 = vrcp.f32 %v2054_v10  ;;  %v4601_v37 = vpop.eup %3003  ;;  %v1881_v48 = vmul.f32 1.442695, %v1816_v43  ;;  %v5037_v10 = vld [vmem:[#allocation32_spill] sm:$0xff] }
 0x6f2   :  { %2449 = vst [vmem:[#allocation5 + $0x2b0] sm:$0xff] %v2157_v13  ;;  %3007 = vpow2.f32 %v1959_v40  ;;  %v2016_v22 = vadd.f32 %v4601_v37, %v4599_v62  ;;  %v1848_v40 = vsub.f32 %v5039_v47, %v4409_v30 }
 0x6f3   :  { %2450 = vst [vmem:[#allocation5 + $0x2b8] sm:$0xff] %v2158_v27  ;;  %3009 = vpow2.f32 %v1961_v24  ;;  %v1847_v24 = vsub.f32 %v5038_v58, %v4409_v30 }
 0x6f4   :  { %3011 = vpow2.f32 %v1879_v49 }
 0x6f5   :  { %3013 = vpow2.f32 %v1881_v48  ;;  %v1943_v54 = vmul.f32 1.442695, %v1847_v24 }
 0x6f7   :  { %v3006_v50 = vpop.eup %3005  ;;  %2017 = vadd.xlane.f32.xlu1 %v2016_v22  ;;  %3015 = vpow2.f32 %v1943_v54 }
 0x6f8   :  { %v2165_v23 = vmul.f32 %v3006_v50, %v5036_v25  ;;  %v2166_v63 = vmul.f32 %v3006_v50, %v5037_v10  ;;  %v4609_v11 = vpop.eup %3007 }
 0x6f9   :  { %v4611_v35 = vpop.eup %3009 }
 0x6fa   :  { %2246 = vmatpush.xpose.msrb.mxu2 %v2165_v23  ;;  %2457 = vst [vmem:[#allocation5 + $0x2f0] sm:$0xff] %v2165_v23  ;;  %2266 = vmatpush.xpose.msrb.mxu3 %v2166_v63  ;;  %v2067_v39 = vadd.f32 %v4611_v35, %v4609_v11  ;;  %v1945_v23 = vmul.f32 1.442695, %v1848_v40  ;;  %v4621_v43 = vpop.eup %3011 }
 0x6fb   :  { %2458 = vst [vmem:[#allocation5 + $0x2f8] sm:$0xff] %v2166_v63  ;;  %v4623_v22 = vpop.eup %3013 }
 0x6fc   :  { %3017 = vpow2.f32 %v1945_v23  ;;  %v2007_v30 = vadd.f32 %v4623_v22, %v4621_v43 }
 0x6fe   :  { %2247 = vmatpush.xpose.msrb.mxu2 %v4522_v52  ;;  %2267 = vmatpush.xpose.msrb.mxu3 %v4525_v53  ;;  %v4629_v52 = vpop.eup %3015 }
 0x6ff   :  { %2068 = vadd.xlane.f32.xlu1 %v2067_v39 }
 0x702   :  { %2248 = vmatpush.xpose.msrb.mxu2 %v4556_v16  ;;  %2268 = vmatpush.xpose.msrb.mxu3 %v4559_v28  ;;  %v4631_v53 = vpop.eup %3017 }
 0x703   :  { %v2055_v63 = vadd.f32 %v4631_v53, %v4629_v52 }
 0x706   :  { %2249 = vmatpush.xpose.msrb.mxu2 %v2159_v2  ;;  %2269 = vmatpush.xpose.msrb.mxu3 %v2160_v32 }
 0x707   :  { %2008 = vadd.xlane.f32.xlu1 %v2007_v30 }
 0x70a   :  { %2250 = vmatpush.xpose.msrb.mxu2 %v2157_v13  ;;  %2270 = vmatpush.xpose.msrb.mxu3 %v2158_v27 }
 0x70e   :  { %2251 = vmatpush.xpose.msrb.mxu2 %v4464_v44  ;;  %2271 = vmatpush.xpose.msrb.mxu3 %v4467_v36 }
 0x70f   :  { %2056 = vadd.xlane.f32.xlu1 %v2055_v63 }
 0x722   :  { %v2090_v16 = vpop.xlane.xlu2 %2089 }
 0x723   :  { %3019 = vrcp.f32 %v2090_v16 }
 0x729   :  { %v3020_v28 = vpop.eup %3019 }
 0x72a   :  { %v2030_v2 = vpop.xlane.xlu2 %2029  ;;  %v2093_v32 = vpop.xlane.xlu0 %2092  ;;  %v4638_v50 = vmul.f32 %v3020_v28, %v4365_v9  ;;  %v4641_v49 = vmul.f32 %v3020_v28, %v4368_v33 }
 0x72b   :  { %3021 = vrcp.f32 %v2030_v2 }
 0x72c   :  { %3023 = vrcp.f32 %v2093_v32  ;;  %2481 = vst [vmem:[#allocation5 + $0x3b0] sm:$0xff] %v4638_v50 }
 0x72d   :  { %2482 = vst [vmem:[#allocation5 + $0x3b8] sm:$0xff] %v4641_v49 }
 0x731   :  { %v3022_v44 = vpop.eup %3021 }
 0x732   :  { %v3024_v36 = vpop.eup %3023  ;;  %v2081_v13 = vpop.xlane.xlu2 %2080  ;;  %v4646_v48 = vmul.f32 %v3022_v44, %v4375_v57  ;;  %v4649_v25 = vmul.f32 %v3022_v44, %v4381_v18 }
 0x733   :  { %v2096_v27 = vpop.xlane.xlu1 %2095  ;;  %3025 = vrcp.f32 %v2081_v13  ;;  %v2033_v9 = vpop.xlane.xlu0 %2032  ;;  %v4652_v33 = vmul.f32 %v3024_v36, %v4385_v34  ;;  %v4655_v10 = vmul.f32 %v3024_v36, %v4389_v46 }
 0x734   :  { %3027 = vrcp.f32 %v2096_v27  ;;  %2441 = vst [vmem:[#allocation5 + $0x270] sm:$0xff] %v4646_v48 }
 0x735   :  { %3029 = vrcp.f32 %v2033_v9  ;;  %2442 = vst [vmem:[#allocation5 + $0x278] sm:$0xff] %v4649_v25 }
 0x736   :  { %2483 = vst [vmem:[#allocation5 + $0x3c0] sm:$0xff] %v4652_v33 }
 0x737   :  { %2484 = vst [vmem:[#allocation5 + $0x3c8] sm:$0xff] %v4655_v10 }
 0x739   :  { %v3026_v57 = vpop.eup %3025 }
 0x73a   :  { %v3028_v18 = vpop.eup %3027  ;;  %v2021_v58 = vpop.xlane.xlu2 %2020  ;;  %v4662_v34 = vmul.f32 %v3026_v57, %v4401_v45  ;;  %v4679_v45 = vmul.f32 %v3026_v57, %v4405_v55 }
 0x73b   :  { %v2099_v24 = vpop.xlane.xlu1 %2098  ;;  %v3030_v47 = vpop.eup %3029  ;;  %3031 = vrcp.f32 %v2021_v58  ;;  %v4665_v40 = vmul.f32 %v3028_v18, %v4411_v6  ;;  %v4674_v23 = vmul.f32 %v3028_v18, %v4415_v61 }
 0x73c   :  { %v2084_v46 = vpop.xlane.xlu0 %2083  ;;  %3033 = vrcp.f32 %v2099_v24  ;;  %v4668_v39 = vmul.f32 %v3030_v47, %v4397_v4  ;;  %v4671_v54 = vmul.f32 %v3030_v47, %v4399_v1  ;;  %2475 = vst [vmem:[#allocation5 + $0x380] sm:$0xff] %v4662_v34 }
 0x73d   :  { %3035 = vrcp.f32 %v2084_v46  ;;  %2485 = vst [vmem:[#allocation5 + $0x3d0] sm:$0xff] %v4665_v40 }
 0x73e   :  { %2443 = vst [vmem:[#allocation5 + $0x280] sm:$0xff] %v4668_v39 }
 0x73f   :  { %2444 = vst [vmem:[#allocation5 + $0x288] sm:$0xff] %v4671_v54 }
 0x740   :  { %2486 = vst [vmem:[#allocation5 + $0x3d8] sm:$0xff] %v4674_v23 }
 0x741   :  { %v3032_v4 = vpop.eup %3031  ;;  %2476 = vst [vmem:[#allocation5 + $0x388] sm:$0xff] %v4679_v45 }
 0x742   :  { %v3034_v1 = vpop.eup %3033  ;;  %v4686_v61 = vmul.f32 %v3032_v4, %v4425_v8  ;;  %v4689_v30 = vmul.f32 %v3032_v4, %v4427_v31 }
 0x743   :  { %v2102_v6 = vpop.xlane.xlu1 %2101  ;;  %v3036_v63 = vpop.eup %3035  ;;  %v4692_v16 = vmul.f32 %v3034_v1, %v4439_v7  ;;  %v4695_v28 = vmul.f32 %v3034_v1, %v4443_v19 }
 0x744   :  { %3037 = vrcp.f32 %v2102_v6  ;;  %v2024_v55 = vpop.xlane.xlu0 %2023  ;;  %2435 = vst [vmem:[#allocation5 + $0x240] sm:$0xff] %v4686_v61  ;;  %v4699_v2 = vmul.f32 %v3036_v63, %v4429_v29  ;;  %v4703_v8 = vmul.f32 %v3036_v63, %v4435_v3 }
 0x745   :  { %3039 = vrcp.f32 %v2024_v55  ;;  %2436 = vst [vmem:[#allocation5 + $0x248] sm:$0xff] %v4689_v30 }
 0x746   :  { %2487 = vst [vmem:[#allocation5 + $0x3e0] sm:$0xff] %v4692_v16 }
 0x747   :  { %2488 = vst [vmem:[#allocation5 + $0x3e8] sm:$0xff] %v4695_v28 }
 0x748   :  { %2477 = vst [vmem:[#allocation5 + $0x390] sm:$0xff] %v4699_v2 }
 0x749   :  { %2478 = vst [vmem:[#allocation5 + $0x398] sm:$0xff] %v4703_v8 }
 0x74a   :  { %v3038_v31 = vpop.eup %3037  ;;  %v2072_v32 = vpop.xlane.xlu2 %2071 }
 0x74b   :  { %v3040_v7 = vpop.eup %3039  ;;  %v2036_v19 = vpop.xlane.xlu1 %2035  ;;  %v4710_v29 = vmul.f32 %v3038_v31, %v4469_v56  ;;  %v4719_v13 = vmul.f32 %v3038_v31, %v4473_v5 }
 0x74c   :  { %3041 = vrcp.f32 %v2036_v19  ;;  %v2075_v44 = vpop.xlane.xlu0 %2074  ;;  %v4713_v3 = vmul.f32 %v3040_v7, %v4455_v0  ;;  %v4716_v36 = vmul.f32 %v3040_v7, %v4460_v51  ;;  %v5042_v7 = vld [vmem:[#allocation15_spill] sm:$0xff] }
 0x74d   :  { %3043 = vrcp.f32 %v2072_v32  ;;  %2489 = vst [vmem:[#allocation5 + $0x3f0] sm:$0xff] %v4710_v29 }
 0x74e   :  { %3045 = vrcp.f32 %v2075_v44  ;;  %2437 = vst [vmem:[#allocation5 + $0x250] sm:$0xff] %v4713_v3  ;;  %v5044_v44 = vld [vmem:[#allocation19_spill] sm:$0xff] }
 0x74f   :  { %2438 = vst [vmem:[#allocation5 + $0x258] sm:$0xff] %v4716_v36 }
 0x750   :  { %2490 = vst [vmem:[#allocation5 + $0x3f8] sm:$0xff] %v4719_v13 }
 0x752   :  { %v3042_v56 = vpop.eup %3041  ;;  %v2012_v9 = vpop.xlane.xlu2 %2011 }
 0x753   :  { %v3044_v27 = vpop.eup %3043  ;;  %v2087_v0 = vpop.xlane.xlu1 %2086  ;;  %v2153_v51 = vmul.f32 %v3042_v56, %v4485_v12  ;;  %v2154_v57 = vmul.f32 %v3042_v56, %v4489_v14 }
 0x754   :  { %v3046_v5 = vpop.eup %3045  ;;  %3047 = vrcp.f32 %v2087_v0  ;;  %v2015_v18 = vpop.xlane.xlu0 %2014  ;;  %v4728_v58 = vmul.f32 %v3044_v27, %v4499_v17  ;;  %v4737_v12 = vmul.f32 %v3044_v27, %v4503_v60  ;;  %v5045_v27 = vld [vmem:[#allocation21_spill] sm:$0xff] }
 0x755   :  { %3049 = vrcp.f32 %v2012_v9  ;;  %2252 = vmatpush.xpose.msrb.mxu2 %v2153_v51  ;;  %2445 = vst [vmem:[#allocation5 + $0x290] sm:$0xff] %v2153_v51  ;;  %2272 = vmatpush.xpose.msrb.mxu3 %v2154_v57  ;;  %v4731_v24 = vmul.f32 %v3046_v5, %v4493_v38  ;;  %v4734_v47 = vmul.f32 %v3046_v5, %v4495_v21  ;;  %v5046_v5 = vld [vmem:[#allocation25_spill] sm:$0xff] }
 0x756   :  { %3051 = vrcp.f32 %v2015_v18  ;;  %2446 = vst [vmem:[#allocation5 + $0x298] sm:$0xff] %v2154_v57 }
 0x757   :  { %2471 = vst [vmem:[#allocation5 + $0x360] sm:$0xff] %v4731_v24 }
 0x758   :  { %2472 = vst [vmem:[#allocation5 + $0x368] sm:$0xff] %v4734_v47 }
 0x759   :  { %2253 = vmatpush.xpose.msrb.mxu2 %v4668_v39  ;;  %2273 = vmatpush.xpose.msrb.mxu3 %v4671_v54  ;;  %2469 = vst [vmem:[#allocation5 + $0x350] sm:$0xff] %v4728_v58 }
 0x75a   :  { %v3048_v14 = vpop.eup %3047  ;;  %2470 = vst [vmem:[#allocation5 + $0x358] sm:$0xff] %v4737_v12  ;;  %v2063_v17 = vpop.xlane.xlu2 %2062 }
 0x75b   :  { %v3050_v38 = vpop.eup %3049  ;;  %v2027_v21 = vpop.xlane.xlu1 %2026  ;;  %v4746_v46 = vmul.f32 %v3048_v14, %v4527_v20 }
 0x75c   :  { %v3052_v60 = vpop.eup %3051  ;;  %3053 = vrcp.f32 %v2027_v21  ;;  %v2066_v4 = vpop.xlane.xlu0 %2065  ;;  %v4749_v1 = vmul.f32 %v3050_v38, %v4515_v26  ;;  %v4752_v39 = vmul.f32 %v3050_v38, %v4519_v42  ;;  %v4761_v26 = vmul.f32 %v3048_v14, %v4529_v59  ;;  %v5043_v59 = vld [vmem:[#allocation28_spill] sm:$0xff]  ;;  %v5047_v14 = vld [vmem:[#allocation10_spill] sm:$0xff]  ;;  %v5048_v21 = vld [vmem:[#allocation29_spill] sm:$0xff] }
 0x75d   :  { %3055 = vrcp.f32 %v2063_v17  ;;  %2254 = vmatpush.xpose.msrb.mxu2 %v4646_v48  ;;  %2274 = vmatpush.xpose.msrb.mxu3 %v4649_v25  ;;  %v2139_v54 = vmul.f32 %v3052_v60, %v4507_v15  ;;  %v2140_v6 = vmul.f32 %v3052_v60, %v4534_v41  ;;  %2479 = vst [vmem:[#allocation5 + $0x3a0] sm:$0xff] %v4746_v46  ;;  %v5040_v15 = vld [vmem:[#allocation12_spill] sm:$0xff]  ;;  %v5041_v41 = vld [vmem:[#allocation13_spill] sm:$0xff] }
 0x75e   :  { %3057 = vrcp.f32 %v2066_v4  ;;  %2429 = vst [vmem:[#allocation5 + $0x210] sm:$0xff] %v4749_v1 }
 0x75f   :  { %2431 = vst [vmem:[#allocation5 + $0x220] sm:$0xff] %v2139_v54 }
 0x760   :  { %2432 = vst [vmem:[#allocation5 + $0x228] sm:$0xff] %v2140_v6 }
 0x761   :  { %2430 = vst [vmem:[#allocation5 + $0x218] sm:$0xff] %v4752_v39 }
 0x762   :  { %v3054_v42 = vpop.eup %3053  ;;  %2480 = vst [vmem:[#allocation5 + $0x3a8] sm:$0xff] %v4761_v26 }
 0x763   :  { %v3056_v20 = vpop.eup %3055  ;;  %v2078_v48 = vpop.xlane.xlu1 %2077  ;;  %v2147_v25 = vmul.f32 %v3054_v42, %v5040_v15  ;;  %v2148_v63 = vmul.f32 %v3054_v42, %v5041_v41 }
 0x764   :  { %v3058_v55 = vpop.eup %3057  ;;  %3059 = vrcp.f32 %v2078_v48  ;;  %v2060_v31 = vpop.xlane.xlu0 %2059  ;;  %v4768_v19 = vmul.f32 %v3056_v20, %v5042_v7  ;;  %v4777_v0 = vmul.f32 %v3056_v20, %v5045_v27 }
 0x765   :  { %3061 = vrcp.f32 %v2060_v31  ;;  %2255 = vmatpush.xpose.msrb.mxu2 %v2147_v25  ;;  %2439 = vst [vmem:[#allocation5 + $0x260] sm:$0xff] %v2147_v25  ;;  %2275 = vmatpush.xpose.msrb.mxu3 %v2148_v63  ;;  %v4771_v32 = vmul.f32 %v3058_v55, %v5043_v59  ;;  %v4774_v56 = vmul.f32 %v3058_v55, %v5044_v44 }
 0x766   :  { %2440 = vst [vmem:[#allocation5 + $0x268] sm:$0xff] %v2148_v63 }
 0x767   :  { %2465 = vst [vmem:[#allocation5 + $0x330] sm:$0xff] %v4771_v32 }
 0x768   :  { %2466 = vst [vmem:[#allocation5 + $0x338] sm:$0xff] %v4774_v56 }
 0x769   :  { %2256 = vmatpush.xpose.msrb.mxu2 %v4713_v3  ;;  %2276 = vmatpush.xpose.msrb.mxu3 %v4716_v36  ;;  %2463 = vst [vmem:[#allocation5 + $0x320] sm:$0xff] %v4768_v19  ;;  %v5049_v3 = vld [vmem:[#allocation11_spill] sm:$0xff] }
 0x76a   :  { %v3060_v9 = vpop.eup %3059  ;;  %2464 = vst [vmem:[#allocation5 + $0x328] sm:$0xff] %v4777_v0 }
 0x76b   :  { %v3062_v51 = vpop.eup %3061  ;;  %v2018_v57 = vpop.xlane.xlu1 %2017  ;;  %v4786_v18 = vmul.f32 %v3060_v9, %v5046_v5  ;;  %v4789_v38 = vmul.f32 %v3060_v9, %v5047_v14 }
 0x76c   :  { %3063 = vrcp.f32 %v2018_v57  ;;  %v4792_v17 = vmul.f32 %v3062_v51, %v5048_v21  ;;  %v4795_v60 = vmul.f32 %v3062_v51, %v5049_v3 }
 0x76d   :  { %2257 = vmatpush.xpose.msrb.mxu2 %v4686_v61  ;;  %2277 = vmatpush.xpose.msrb.mxu3 %v4689_v30  ;;  %2473 = vst [vmem:[#allocation5 + $0x370] sm:$0xff] %v4786_v18 }
 0x76e   :  { %2474 = vst [vmem:[#allocation5 + $0x378] sm:$0xff] %v4789_v38 }
 0x76f   :  { %2461 = vst [vmem:[#allocation5 + $0x310] sm:$0xff] %v4792_v17 }
 0x770   :  { %2462 = vst [vmem:[#allocation5 + $0x318] sm:$0xff] %v4795_v60 }
 0x772   :  { %v3064_v36 = vpop.eup %3063 }
 0x773   :  { %v2069_v4 = vpop.xlane.xlu1 %2068  ;;  %v2141_v42 = vmul.f32 %v3064_v36, %v4599_v62  ;;  %v2142_v20 = vmul.f32 %v3064_v36, %v4601_v37 }
 0x774   :  { %3065 = vrcp.f32 %v2069_v4 }
 0x775   :  { %2258 = vmatpush.xpose.msrb.mxu2 %v2141_v42  ;;  %2433 = vst [vmem:[#allocation5 + $0x230] sm:$0xff] %v2141_v42  ;;  %2278 = vmatpush.xpose.msrb.mxu3 %v2142_v20 }
 0x776   :  { %2434 = vst [vmem:[#allocation5 + $0x238] sm:$0xff] %v2142_v20 }
 0x779   :  { %2259 = vmatpush.xpose.msrb.mxu2 %v2139_v54  ;;  %2279 = vmatpush.xpose.msrb.mxu3 %v2140_v6 }
 0x77a   :  { %v3066_v61 = vpop.eup %3065 }
 0x77b   :  { %v2009_v30 = vpop.xlane.xlu1 %2008  ;;  %v2175_v48 = vmul.f32 %v3066_v61, %v4609_v11  ;;  %v2176_v15 = vmul.f32 %v3066_v61, %v4611_v35 }
 0x77c   :  { %3067 = vrcp.f32 %v2009_v30 }
 0x77d   :  { %2260 = vmatpush.xpose.msrb.mxu2 %v4749_v1  ;;  %2280 = vmatpush.xpose.msrb.mxu3 %v4752_v39  ;;  %2467 = vst [vmem:[#allocation5 + $0x340] sm:$0xff] %v2175_v48 }
 0x77e   :  { %2468 = vst [vmem:[#allocation5 + $0x348] sm:$0xff] %v2176_v15 }
 0x782   :  { %v3068_v62 = vpop.eup %3067 }
 0x783   :  { %v2057_v37 = vpop.xlane.xlu1 %2056  ;;  %v2135_v25 = vmul.f32 %v3068_v62, %v4621_v43  ;;  %v2136_v54 = vmul.f32 %v3068_v62, %v4623_v22  ;;  %v2223_v22 = vpop.f32.mrf.mxu2 }
 0x784   :  { %3069 = vrcp.f32 %v2057_v37 }
 0x785   :  { %2261 = vmatpush.xpose.msrb.mxu2 %v2135_v25  ;;  %2427 = vst [vmem:[#allocation5 + $0x200] sm:$0xff] %v2135_v25  ;;  %2281 = vmatpush.xpose.msrb.mxu3 %v2136_v54 }
 0x786   :  { %2428 = vst [vmem:[#allocation5 + $0x208] sm:$0xff] %v2136_v54 }
 0x788   :  { %2262 = vmatmul.f32.vlgmr.msrb.gmra.mxu2 %v2223_v22 }
 0x789   :  { %2286 = vmatpush.xpose.msra.mxu2 %v4710_v29  ;;  %2306 = vmatpush.xpose.msra.mxu3 %v4719_v13 }
 0x78a   :  { %v3070_v35 = vpop.eup %3069 }
 0x78b   :  { %v2167_v11 = vmul.f32 %v3070_v35, %v4629_v52  ;;  %v2168_v43 = vmul.f32 %v3070_v35, %v4631_v53  ;;  %v2243_v52 = vpop.f32.mrf.mxu3 }
 0x78c   :  { %2282 = vmatmul.f32.vlgmr.msrb.gmra.mxu3 %v2243_v52 }
 0x78d   :  { %2287 = vmatpush.xpose.msra.mxu2 %v4692_v16  ;;  %2307 = vmatpush.xpose.msra.mxu3 %v4695_v28  ;;  %2459 = vst [vmem:[#allocation5 + $0x300] sm:$0xff] %v2167_v11 }
 0x78e   :  { %2460 = vst [vmem:[#allocation5 + $0x308] sm:$0xff] %v2168_v43 }
 0x78f   :  { %2505 = dma.vmem_to_hbm [thread:$0]  %s2498_s13, 16384, %s2500_s11, [#allocation4], %s3129_s14, %s3129_s14, %s3130_s15  }
 0x791   :  { %2288 = vmatpush.xpose.msra.mxu2 %v4665_v40  ;;  %2308 = vmatpush.xpose.msra.mxu3 %v4674_v23 }
 0x795   :  { %2289 = vmatpush.xpose.msra.mxu2 %v4652_v33  ;;  %2309 = vmatpush.xpose.msra.mxu3 %v4655_v10  ;;  %v3072_v33 = vld [vmem:[%s4859_s0 + $0x10] sm:$0x7]  ;;  %v2373_v10 = vld.sshfl [vmem:[#allocation1] sm:$0xff pattern:$0x75316420] }
 0x799   :  { %2290 = vmatpush.xpose.msra.mxu2 %v4638_v50  ;;  %2310 = vmatpush.xpose.msra.mxu3 %v4641_v49 }
 0x79d   :  { %2291 = vmatpush.xpose.msra.mxu2 %v4746_v46  ;;  %2311 = vmatpush.xpose.msra.mxu3 %v4761_v26 }
 0x7a1   :  { %2292 = vmatpush.xpose.msra.mxu2 %v4699_v2  ;;  %2312 = vmatpush.xpose.msra.mxu3 %v4703_v8 }
 0x7a5   :  { %2293 = vmatpush.xpose.msra.mxu2 %v4662_v34  ;;  %2313 = vmatpush.xpose.msra.mxu3 %v4679_v45  ;;  %v2374_v45 = vld.sshfl [vmem:[#allocation1 + $0x8] sm:$0xff pattern:$0x75316420] }
 0x7a9   :  { %2294 = vmatpush.xpose.msra.mxu2 %v4786_v18  ;;  %2314 = vmatpush.xpose.msra.mxu3 %v4789_v38 }
 0x7ad   :  { %2295 = vmatpush.xpose.msra.mxu2 %v4731_v24  ;;  %2315 = vmatpush.xpose.msra.mxu3 %v4734_v47 }
 0x7b1   :  { %2296 = vmatpush.xpose.msra.mxu2 %v4728_v58  ;;  %2316 = vmatpush.xpose.msra.mxu3 %v4737_v12 }
 0x7b5   :  { %2297 = vmatpush.xpose.msra.mxu2 %v2175_v48  ;;  %2317 = vmatpush.xpose.msra.mxu3 %v2176_v15 }
 0x7b9   :  { %2298 = vmatpush.xpose.msra.mxu2 %v4771_v32  ;;  %2318 = vmatpush.xpose.msra.mxu3 %v4774_v56 }
 0x7bd   :  { %2299 = vmatpush.xpose.msra.mxu2 %v4768_v19  ;;  %2319 = vmatpush.xpose.msra.mxu3 %v4777_v0 }
 0x7c1   :  { %2300 = vmatpush.xpose.msra.mxu2 %v4792_v17  ;;  %2320 = vmatpush.xpose.msra.mxu3 %v4795_v60 }
 0x7c5   :  { %2301 = vmatpush.xpose.msra.mxu2 %v2167_v11  ;;  %2321 = vmatpush.xpose.msra.mxu3 %v2168_v43 }
 0x7c8   :  { %2302 = vmatmul.f32.vlgmr.msra.gmra.mxu2 %v2223_v22  ;;  %2322 = vmatmul.f32.vlgmr.msra.gmra.mxu3 %v2243_v52 }
 0x80b   :  { %v2263_v53 = vpop.f32.mrf.mxu2 }
 0x80f   :  { %v2283_v50 = vpop.f32.mrf.mxu3 }
 0x810   :  { %v2284_v49 = vadd.f32 %v2283_v50, %v2263_v53 }
 0x812   :  { %2671 = vmatpush.msk.msrb.mxu2 %vm1103_vm2, %v2284_v49 }
 0x813   :  { %2672 = vmatmul.msk.f32.vlgmr.msrb.gmra.mxu2 %vm1099_vm3, %v3072_v33 }
 0x814   :  { %2675 = vmatpush.msk.msra.mxu2 %vm46_vm0, %v2373_v10 }
 0x81b   :  { %2676 = vmatmul.msk.f32.vlgmr.msra.gmra.mxu2 %vm42_vm1, %v3072_v33 }
 0x84b   :  { %v2303_v34 = vpop.f32.mrf.mxu2  ;;  %v2323_v40 = vpop.f32.mrf.mxu3 }
 0x84c   :  { %v2324_v23 = vadd.f32 %v2323_v40, %v2303_v34 }
 0x84e   :  { %2673 = vmatpush.msk.msrb.mxu3 %vm1103_vm2, %v2324_v23 }
 0x84f   :  { %2674 = vmatmul.msk.f32.vlgmr.msrb.gmra.mxu3 %vm1099_vm3, %v3072_v33 }
 0x850   :  { %2677 = vmatpush.msk.msra.mxu3 %vm46_vm0, %v2374_v45 }
 0x857   :  { %2678 = vmatmul.msk.f32.vlgmr.msra.gmra.mxu3 %vm42_vm1, %v3072_v33 }
 0x896   :  { %v2349_v16 = vpop.f32.mrf.mxu2 }
 0x89e   :  { %v2396_v8 = vpop.f32.mrf.mxu2 }
 0x89f   :  { %v2397_v58 = vadd.f32 %v2396_v8, %v2349_v16 }
 0x8d2   :  { %v2369_v28 = vpop.f32.mrf.mxu3 }
 0x8da   :  { %v2416_v2 = vpop.f32.mrf.mxu3 }
 0x8db   :  { %v2417_v29 = vadd.f32 %v2416_v2, %v2369_v28 }
 0x8dd   :  { %v2421_v13 = vrot.slane %v2417_v29, 4 }
 0x8df   :  { %v2422_v24 = vsel %vm46_vm0, %v2397_v58, %v2421_v13 }
 0x8e0   :  { %2679 = vst [vmem:[%s4862_s3 + $0x8] sm:$0x77] %v2422_v24 }
 0x8e1   :  { %3123 = dma.done.wait [#allocation4], 16384  }
 0x8e2   :  { %3124 = vsyncadd [#allocation4], 4294950912 }
 0x8e3   :  { %2512 = vsyncpa [#allocation3], 1 }
 0x8e4   :  { %2513 = vsyncpa [#allocation4], 1 }

</bundles_post_ra>
